<compile_context>
chip_gen: v5e
topology: v5e:2x2
jax: 0.10.0
libtpu: 0.0.40
codegen_flags: <defaults>
</compile_context>

<pallas_src>
import functools

import jax
import jax.numpy as jnp
from jax import lax
from jax.experimental import pallas as pl
from jax.experimental.pallas import tpu as pltpu


# ----------------------------------------------------------------------------
# Fused kernel factory.
#
# Ref order (all VMEM, full-array residency, no grid):
#   x2d                                  (T*Bp, D)         layer-0 input, row = t*Bp + b
#   per GRU layer l:
#     wih_r, wih_z, wih_n                (D_l, H)           pre-transposed, per gate
#     whh_r, whh_z, whh_n                (H,  H)            pre-transposed, per gate
#     bih_r, bih_z, bih_n                (1,  H)
#     bhh_r, bhh_z, bhh_n                (1,  H)
#   fc: w0,b0, w1,b1, w2,b2, w3,b3, w4,b4, w5,b5             (in,out)/(1,out)
#   out_ref                              (T*Bp, 1)
#   act_ref  (scratch)                   (T*Bp, H)          reused across layers
# ----------------------------------------------------------------------------
def _make_fused_kernel(num_layers, T, B_pad, H):
    def kernel(*refs):
        idx = 0
        x_ref = refs[idx]; idx += 1
        gru_layers = []
        for _ in range(num_layers):
            gru_layers.append(refs[idx:idx + 12]); idx += 12
        fc_refs = refs[idx:idx + 12]; idx += 12
        out_ref = refs[idx]; idx += 1
        act_ref = refs[idx]; idx += 1

        for layer, lrefs in enumerate(gru_layers):
            (wih_r, wih_z, wih_n, whh_r, whh_z, whh_n,
             bih_r, bih_z, bih_n, bhh_r, bhh_z, bhh_n) = lrefs

            # Layer input: x for layer 0, previous layer's stored outputs after.
            xin = x_ref[...] if layer == 0 else act_ref[...]

            # Hoisted input projection: one matmul per gate over ALL timesteps.
            gi_r = jnp.dot(xin, wih_r[...], preferred_element_type=jnp.float32) + bih_r[...]
            gi_z = jnp.dot(xin, wih_z[...], preferred_element_type=jnp.float32) + bih_z[...]
            gi_n = jnp.dot(xin, wih_n[...], preferred_element_type=jnp.float32) + bih_n[...]

            # Hoist recurrent-weight / bias loads out of the time loop.
            w_r = whh_r[...]; w_z = whh_z[...]; w_n = whh_n[...]
            b_r = bhh_r[...]; b_z = bhh_z[...]; b_n = bhh_n[...]

            h = jnp.zeros((B_pad, H), jnp.float32)   # h_0 = 0 (PyTorch default)

            # Fully unrolled serial recurrence (static T); h carried as a value.
            for t in range(T):
                lo = t * B_pad
                gh_r = jnp.dot(h, w_r, preferred_element_type=jnp.float32) + b_r
                gh_z = jnp.dot(h, w_z, preferred_element_type=jnp.float32) + b_z
                gh_n = jnp.dot(h, w_n, preferred_element_type=jnp.float32) + b_n
                r = jax.nn.sigmoid(gi_r[lo:lo + B_pad, :] + gh_r)
                z = jax.nn.sigmoid(gi_z[lo:lo + B_pad, :] + gh_z)
                n = jnp.tanh(gi_n[lo:lo + B_pad, :] + r * gh_n)
                h = (1.0 - z) * n + z * h
                act_ref[lo:lo + B_pad, :] = h        # aligned (B_pad = 8k rows) store

        # ---- position-wise MLP head on the (T*Bp, H) slab ----
        hcur = act_ref[...]
        for i in range(5):
            w = fc_refs[2 * i][...]
            b = fc_refs[2 * i + 1][...]
            hcur = jnp.maximum(
                jnp.dot(hcur, w, preferred_element_type=jnp.float32) + b, 0.0)
        w5 = fc_refs[10][...]
        b5 = fc_refs[11][...]
        out_ref[...] = jax.nn.sigmoid(
            jnp.dot(hcur, w5, preferred_element_type=jnp.float32) + b5)

    return kernel


# ----------------------------------------------------------------------------
# Full forward pass (matches Path_Cardinality_Estimator.forward).
# gru_params: list of (wih (3H,Din), whh (3H,H), bih (1,3H), bhh (1,3H))  [PyTorch layout]
# fc_params : list of (w (in,out), b (1,out))                             [pre-transposed]
# ----------------------------------------------------------------------------
@functools.partial(jax.jit, static_argnames=("hidden_size",))
def path_cardinality_forward(x_btd, gru_params, fc_params, hidden_size):
    B, T, D = x_btd.shape
    H = hidden_size
    B_pad = ((B + 7) // 8) * 8                       # pad batch to sublane tile

    x = jnp.transpose(x_btd.astype(jnp.float32), (1, 0, 2))          # (T, B, D)
    x = jnp.pad(x, ((0, 0), (0, B_pad - B), (0, 0)))                 # (T, Bp, D)
    x2d = x.reshape(T * B_pad, D)                                    # row = t*Bp + b

    # Split / transpose GRU weights per gate (r, z, n) once, outside the kernel.
    flat = [x2d]
    for (wih, whh, bih, bhh) in gru_params:
        for g in range(3):
            flat.append(jnp.transpose(wih[g * H:(g + 1) * H, :]))    # (Din, H)
        for g in range(3):
            flat.append(jnp.transpose(whh[g * H:(g + 1) * H, :]))    # (H, H)
        for g in range(3):
            flat.append(bih[:, g * H:(g + 1) * H])                   # (1, H)
        for g in range(3):
            flat.append(bhh[:, g * H:(g + 1) * H])                   # (1, H)
    for (w, b) in fc_params:
        flat += [w, b]

    num_layers = len(gru_params)
    kernel = _make_fused_kernel(num_layers, T, B_pad, H)
    vmem = pl.BlockSpec(memory_space=pltpu.MemorySpace.VMEM)

    y = pl.pallas_call(
        kernel,
        out_shape=jax.ShapeDtypeStruct((T * B_pad, 1), jnp.float32),
        in_specs=[vmem] * len(flat),
        out_specs=vmem,
        scratch_shapes=[pltpu.VMEM((T * B_pad, H), jnp.float32)],
    )(*flat)

    y = y.reshape(T, B_pad)[:, :B]                   # drop batch padding -> (T, B)
    return jnp.transpose(y)                          # (B, T), == torch.squeeze((B,T,1))


# ----------------------------------------------------------------------------
# Pure-JAX reference (for verification only).
# ----------------------------------------------------------------------------
def reference_forward(x_btd, gru_params, fc_params, hidden_size):
    B, T, _ = x_btd.shape
    seq = jnp.transpose(x_btd, (1, 0, 2)).astype(jnp.float32)
    for (wih, whh, bih, bhh) in gru_params:
        def step(h, x_t):
            gi = x_t @ wih.T + bih[0]
            gh = h @ whh.T + bhh[0]
            Hh = hidden_size
            r = jax.nn.sigmoid(gi[:, :Hh] + gh[:, :Hh])
            z = jax.nn.sigmoid(gi[:, Hh:2 * Hh] + gh[:, Hh:2 * Hh])
            n = jnp.tanh(gi[:, 2 * Hh:] + r * gh[:, 2 * Hh:])
            h_new = (1.0 - z) * n + z * h
            return h_new, h_new
        h0 = jnp.zeros((B, hidden_size), jnp.float32)
        _, seq = lax.scan(step, h0, seq)
    h = jnp.transpose(seq, (1, 0, 2)).reshape(B * T, hidden_size)
    for i, (w, b) in enumerate(fc_params):
        h = h @ w + b[0]
        if i < len(fc_params) - 1:
            h = jnp.maximum(h, 0.0)
    return jax.nn.sigmoid(h).reshape(B, T)


# ----------------------------------------------------------------------------
# Deterministic parameter construction (mimics nn.GRU / nn.Linear shapes).
# ----------------------------------------------------------------------------
def init_params(key, num_layers, hidden_size, alphabet_size):
    H = hidden_size
    gru_params = []
    for layer in range(num_layers):
        d_in = alphabet_size if layer == 0 else H
        k = 1.0 / jnp.sqrt(H)
        key, k1, k2, k3, k4 = jax.random.split(key, 5)
        wih = jax.random.uniform(k1, (3 * H, d_in), jnp.float32, -k, k)
        whh = jax.random.uniform(k2, (3 * H, H), jnp.float32, -k, k)
        bih = jax.random.uniform(k3, (1, 3 * H), jnp.float32, -k, k)
        bhh = jax.random.uniform(k4, (1, 3 * H), jnp.float32, -k, k)
        gru_params.append((wih, whh, bih, bhh))

    sizes = [H, 128, 64, 32, 16, 8, 1]
    fc_params = []
    for i in range(len(sizes) - 1):
        fan_in, fan_out = sizes[i], sizes[i + 1]
        k = 1.0 / jnp.sqrt(fan_in)
        key, k1, k2 = jax.random.split(key, 3)
        # Stored pre-transposed: (in, out) so the kernel does x @ w + b.
        w = jax.random.uniform(k1, (fan_in, fan_out), jnp.float32, -k, k)
        b = jax.random.uniform(k2, (1, fan_out), jnp.float32, -k, k)
        fc_params.append((w, b))
    return gru_params, fc_params


if __name__ == "__main__":
    num_layers = 2
    hidden_size = 32
    alphabet_size = 16
    B, T = 2, 8

    key = jax.random.PRNGKey(0)
    key, pkey, xkey = jax.random.split(key, 3)
    gru_params, fc_params = init_params(pkey, num_layers, hidden_size, alphabet_size)

    x = jax.random.normal(xkey, (B, T, alphabet_size), jnp.float32)

    out = path_cardinality_forward(x, gru_params, fc_params, hidden_size)
    out = jax.block_until_ready(out)

    ref = reference_forward(x, gru_params, fc_params, hidden_size)
    assert out.shape == (B, T), out.shape
    assert jnp.allclose(out, ref, atol=1e-4, rtol=1e-4), float(jnp.max(jnp.abs(out - ref)))

    print("KERNEL_OK")
</pallas_src>

<mosaic_0001>
module attributes {stable_mosaic.version = 11 : i64} {
  func.func @kernel(%arg0: memref<64x16xf32, #tpu.memory_space<vmem>>, %arg1: memref<16x32xf32, #tpu.memory_space<vmem>>, %arg2: memref<16x32xf32, #tpu.memory_space<vmem>>, %arg3: memref<16x32xf32, #tpu.memory_space<vmem>>, %arg4: memref<32x32xf32, #tpu.memory_space<vmem>>, %arg5: memref<32x32xf32, #tpu.memory_space<vmem>>, %arg6: memref<32x32xf32, #tpu.memory_space<vmem>>, %arg7: memref<1x32xf32, #tpu.memory_space<vmem>>, %arg8: memref<1x32xf32, #tpu.memory_space<vmem>>, %arg9: memref<1x32xf32, #tpu.memory_space<vmem>>, %arg10: memref<1x32xf32, #tpu.memory_space<vmem>>, %arg11: memref<1x32xf32, #tpu.memory_space<vmem>>, %arg12: memref<1x32xf32, #tpu.memory_space<vmem>>, %arg13: memref<32x32xf32, #tpu.memory_space<vmem>>, %arg14: memref<32x32xf32, #tpu.memory_space<vmem>>, %arg15: memref<32x32xf32, #tpu.memory_space<vmem>>, %arg16: memref<32x32xf32, #tpu.memory_space<vmem>>, %arg17: memref<32x32xf32, #tpu.memory_space<vmem>>, %arg18: memref<32x32xf32, #tpu.memory_space<vmem>>, %arg19: memref<1x32xf32, #tpu.memory_space<vmem>>, %arg20: memref<1x32xf32, #tpu.memory_space<vmem>>, %arg21: memref<1x32xf32, #tpu.memory_space<vmem>>, %arg22: memref<1x32xf32, #tpu.memory_space<vmem>>, %arg23: memref<1x32xf32, #tpu.memory_space<vmem>>, %arg24: memref<1x32xf32, #tpu.memory_space<vmem>>, %arg25: memref<32x128xf32, #tpu.memory_space<vmem>>, %arg26: memref<1x128xf32, #tpu.memory_space<vmem>>, %arg27: memref<128x64xf32, #tpu.memory_space<vmem>>, %arg28: memref<1x64xf32, #tpu.memory_space<vmem>>, %arg29: memref<64x32xf32, #tpu.memory_space<vmem>>, %arg30: memref<1x32xf32, #tpu.memory_space<vmem>>, %arg31: memref<32x16xf32, #tpu.memory_space<vmem>>, %arg32: memref<1x16xf32, #tpu.memory_space<vmem>>, %arg33: memref<16x8xf32, #tpu.memory_space<vmem>>, %arg34: memref<1x8xf32, #tpu.memory_space<vmem>>, %arg35: memref<8x1xf32, #tpu.memory_space<vmem>>, %arg36: memref<1x1xf32, #tpu.memory_space<vmem>>, %arg37: memref<64x1xf32, #tpu.memory_space<vmem>>, %arg38: memref<64x32xf32, #tpu.memory_space<vmem>>) attributes {dimension_semantics = [], scalar_prefetch = 0 : i64, scratch_operands = 1 : i64, tpu.core_type = #tpu.core_type<tc>} {
    %c0 = arith.constant 0 : index
    %c0_0 = arith.constant 0 : index
    %0 = vector.load %arg0[%c0, %c0_0] : memref<64x16xf32, #tpu.memory_space<vmem>>, vector<64x16xf32>
    %c0_1 = arith.constant 0 : index
    %c0_2 = arith.constant 0 : index
    %1 = vector.load %arg1[%c0_1, %c0_2] : memref<16x32xf32, #tpu.memory_space<vmem>>, vector<16x32xf32>
    %cst = arith.constant dense<0.000000e+00> : vector<64x32xf32>
    %2 = tpu.matmul %0, %1, %cst {dimension_numbers = #tpu.dot_dimension_numbers<[1], [0], [0], [1], [0, 0, 1, 1], [], []>} : vector<64x16xf32>, vector<16x32xf32>, vector<64x32xf32> -> vector<64x32xf32>
    %c0_3 = arith.constant 0 : index
    %c0_4 = arith.constant 0 : index
    %3 = vector.load %arg7[%c0_3, %c0_4] : memref<1x32xf32, #tpu.memory_space<vmem>>, vector<1x32xf32>
    %4 = vector.broadcast %3 : vector<1x32xf32> to vector<64x32xf32>
    %5 = arith.addf %2, %4 : vector<64x32xf32>
    %c0_5 = arith.constant 0 : index
    %c0_6 = arith.constant 0 : index
    %6 = vector.load %arg2[%c0_5, %c0_6] : memref<16x32xf32, #tpu.memory_space<vmem>>, vector<16x32xf32>
    %cst_7 = arith.constant dense<0.000000e+00> : vector<64x32xf32>
    %7 = tpu.matmul %0, %6, %cst_7 {dimension_numbers = #tpu.dot_dimension_numbers<[1], [0], [0], [1], [0, 0, 1, 1], [], []>} : vector<64x16xf32>, vector<16x32xf32>, vector<64x32xf32> -> vector<64x32xf32>
    %c0_8 = arith.constant 0 : index
    %c0_9 = arith.constant 0 : index
    %8 = vector.load %arg8[%c0_8, %c0_9] : memref<1x32xf32, #tpu.memory_space<vmem>>, vector<1x32xf32>
    %9 = vector.broadcast %8 : vector<1x32xf32> to vector<64x32xf32>
    %10 = arith.addf %7, %9 : vector<64x32xf32>
    %c0_10 = arith.constant 0 : index
    %c0_11 = arith.constant 0 : index
    %11 = vector.load %arg3[%c0_10, %c0_11] : memref<16x32xf32, #tpu.memory_space<vmem>>, vector<16x32xf32>
    %cst_12 = arith.constant dense<0.000000e+00> : vector<64x32xf32>
    %12 = tpu.matmul %0, %11, %cst_12 {dimension_numbers = #tpu.dot_dimension_numbers<[1], [0], [0], [1], [0, 0, 1, 1], [], []>} : vector<64x16xf32>, vector<16x32xf32>, vector<64x32xf32> -> vector<64x32xf32>
    %c0_13 = arith.constant 0 : index
    %c0_14 = arith.constant 0 : index
    %13 = vector.load %arg9[%c0_13, %c0_14] : memref<1x32xf32, #tpu.memory_space<vmem>>, vector<1x32xf32>
    %14 = vector.broadcast %13 : vector<1x32xf32> to vector<64x32xf32>
    %15 = arith.addf %12, %14 : vector<64x32xf32>
    %c0_15 = arith.constant 0 : index
    %c0_16 = arith.constant 0 : index
    %16 = vector.load %arg4[%c0_15, %c0_16] : memref<32x32xf32, #tpu.memory_space<vmem>>, vector<32x32xf32>
    %c0_17 = arith.constant 0 : index
    %c0_18 = arith.constant 0 : index
    %17 = vector.load %arg5[%c0_17, %c0_18] : memref<32x32xf32, #tpu.memory_space<vmem>>, vector<32x32xf32>
    %c0_19 = arith.constant 0 : index
    %c0_20 = arith.constant 0 : index
    %18 = vector.load %arg6[%c0_19, %c0_20] : memref<32x32xf32, #tpu.memory_space<vmem>>, vector<32x32xf32>
    %c0_21 = arith.constant 0 : index
    %c0_22 = arith.constant 0 : index
    %19 = vector.load %arg10[%c0_21, %c0_22] : memref<1x32xf32, #tpu.memory_space<vmem>>, vector<1x32xf32>
    %c0_23 = arith.constant 0 : index
    %c0_24 = arith.constant 0 : index
    %20 = vector.load %arg11[%c0_23, %c0_24] : memref<1x32xf32, #tpu.memory_space<vmem>>, vector<1x32xf32>
    %c0_25 = arith.constant 0 : index
    %c0_26 = arith.constant 0 : index
    %21 = vector.load %arg12[%c0_25, %c0_26] : memref<1x32xf32, #tpu.memory_space<vmem>>, vector<1x32xf32>
    %cst_27 = arith.constant 0.000000e+00 : f32
    %22 = vector.broadcast %cst_27 : f32 to vector<8x32xf32>
    %cst_28 = arith.constant dense<0.000000e+00> : vector<8x32xf32>
    %23 = tpu.matmul %22, %16, %cst_28 {dimension_numbers = #tpu.dot_dimension_numbers<[1], [0], [0], [1], [0, 0, 1, 1], [], []>} : vector<8x32xf32>, vector<32x32xf32>, vector<8x32xf32> -> vector<8x32xf32>
    %24 = vector.broadcast %19 : vector<1x32xf32> to vector<8x32xf32>
    %25 = arith.addf %23, %24 : vector<8x32xf32>
    %cst_29 = arith.constant dense<0.000000e+00> : vector<8x32xf32>
    %26 = tpu.matmul %22, %17, %cst_29 {dimension_numbers = #tpu.dot_dimension_numbers<[1], [0], [0], [1], [0, 0, 1, 1], [], []>} : vector<8x32xf32>, vector<32x32xf32>, vector<8x32xf32> -> vector<8x32xf32>
    %27 = vector.broadcast %20 : vector<1x32xf32> to vector<8x32xf32>
    %28 = arith.addf %26, %27 : vector<8x32xf32>
    %cst_30 = arith.constant dense<0.000000e+00> : vector<8x32xf32>
    %29 = tpu.matmul %22, %18, %cst_30 {dimension_numbers = #tpu.dot_dimension_numbers<[1], [0], [0], [1], [0, 0, 1, 1], [], []>} : vector<8x32xf32>, vector<32x32xf32>, vector<8x32xf32> -> vector<8x32xf32>
    %30 = vector.broadcast %21 : vector<1x32xf32> to vector<8x32xf32>
    %31 = arith.addf %29, %30 : vector<8x32xf32>
    %32 = vector.extract_strided_slice %5 {offsets = [0, 0], sizes = [8, 32], strides = [1, 1]} : vector<64x32xf32> to vector<8x32xf32>
    %33 = arith.addf %32, %25 : vector<8x32xf32>
    %34 = arith.negf %33 : vector<8x32xf32>
    %35 = math.exp %34 : vector<8x32xf32>
    %cst_31 = arith.constant 1.000000e+00 : f32
    %36 = vector.broadcast %cst_31 : f32 to vector<8x32xf32>
    %37 = arith.addf %36, %35 : vector<8x32xf32>
    %38 = arith.divf %36, %37 : vector<8x32xf32>
    %39 = vector.extract_strided_slice %10 {offsets = [0, 0], sizes = [8, 32], strides = [1, 1]} : vector<64x32xf32> to vector<8x32xf32>
    %40 = arith.addf %39, %28 : vector<8x32xf32>
    %41 = arith.negf %40 : vector<8x32xf32>
    %42 = math.exp %41 : vector<8x32xf32>
    %cst_32 = arith.constant 1.000000e+00 : f32
    %43 = vector.broadcast %cst_32 : f32 to vector<8x32xf32>
    %44 = arith.addf %43, %42 : vector<8x32xf32>
    %45 = arith.divf %43, %44 : vector<8x32xf32>
    %46 = vector.extract_strided_slice %15 {offsets = [0, 0], sizes = [8, 32], strides = [1, 1]} : vector<64x32xf32> to vector<8x32xf32>
    %47 = arith.mulf %38, %31 : vector<8x32xf32>
    %48 = arith.addf %46, %47 : vector<8x32xf32>
    %49 = math.tanh %48 : vector<8x32xf32>
    %cst_33 = arith.constant 1.000000e+00 : f32
    %50 = vector.broadcast %cst_33 : f32 to vector<8x32xf32>
    %51 = arith.subf %50, %45 : vector<8x32xf32>
    %52 = arith.mulf %51, %49 : vector<8x32xf32>
    %53 = arith.mulf %45, %22 : vector<8x32xf32>
    %54 = arith.addf %52, %53 : vector<8x32xf32>
    %c0_34 = arith.constant 0 : index
    %c0_35 = arith.constant 0 : index
    %55 = vector.load %arg38[%c0_34, %c0_35] : memref<64x32xf32, #tpu.memory_space<vmem>>, vector<8x32xf32>
    tpu.vector_store %arg38[%c0_34, %c0_35], %54 {strides = array<i32>} : memref<64x32xf32, #tpu.memory_space<vmem>>, vector<8x32xf32>,
    %cst_36 = arith.constant dense<0.000000e+00> : vector<8x32xf32>
    %56 = tpu.matmul %54, %16, %cst_36 {dimension_numbers = #tpu.dot_dimension_numbers<[1], [0], [0], [1], [0, 0, 1, 1], [], []>} : vector<8x32xf32>, vector<32x32xf32>, vector<8x32xf32> -> vector<8x32xf32>
    %57 = vector.broadcast %19 : vector<1x32xf32> to vector<8x32xf32>
    %58 = arith.addf %56, %57 : vector<8x32xf32>
    %cst_37 = arith.constant dense<0.000000e+00> : vector<8x32xf32>
    %59 = tpu.matmul %54, %17, %cst_37 {dimension_numbers = #tpu.dot_dimension_numbers<[1], [0], [0], [1], [0, 0, 1, 1], [], []>} : vector<8x32xf32>, vector<32x32xf32>, vector<8x32xf32> -> vector<8x32xf32>
    %60 = vector.broadcast %20 : vector<1x32xf32> to vector<8x32xf32>
    %61 = arith.addf %59, %60 : vector<8x32xf32>
    %cst_38 = arith.constant dense<0.000000e+00> : vector<8x32xf32>
    %62 = tpu.matmul %54, %18, %cst_38 {dimension_numbers = #tpu.dot_dimension_numbers<[1], [0], [0], [1], [0, 0, 1, 1], [], []>} : vector<8x32xf32>, vector<32x32xf32>, vector<8x32xf32> -> vector<8x32xf32>
    %63 = vector.broadcast %21 : vector<1x32xf32> to vector<8x32xf32>
    %64 = arith.addf %62, %63 : vector<8x32xf32>
    %65 = vector.extract_strided_slice %5 {offsets = [8, 0], sizes = [8, 32], strides = [1, 1]} : vector<64x32xf32> to vector<8x32xf32>
    %66 = arith.addf %65, %58 : vector<8x32xf32>
    %67 = arith.negf %66 : vector<8x32xf32>
    %68 = math.exp %67 : vector<8x32xf32>
    %cst_39 = arith.constant 1.000000e+00 : f32
    %69 = vector.broadcast %cst_39 : f32 to vector<8x32xf32>
    %70 = arith.addf %69, %68 : vector<8x32xf32>
    %71 = arith.divf %69, %70 : vector<8x32xf32>
    %72 = vector.extract_strided_slice %10 {offsets = [8, 0], sizes = [8, 32], strides = [1, 1]} : vector<64x32xf32> to vector<8x32xf32>
    %73 = arith.addf %72, %61 : vector<8x32xf32>
    %74 = arith.negf %73 : vector<8x32xf32>
    %75 = math.exp %74 : vector<8x32xf32>
    %cst_40 = arith.constant 1.000000e+00 : f32
    %76 = vector.broadcast %cst_40 : f32 to vector<8x32xf32>
    %77 = arith.addf %76, %75 : vector<8x32xf32>
    %78 = arith.divf %76, %77 : vector<8x32xf32>
    %79 = vector.extract_strided_slice %15 {offsets = [8, 0], sizes = [8, 32], strides = [1, 1]} : vector<64x32xf32> to vector<8x32xf32>
    %80 = arith.mulf %71, %64 : vector<8x32xf32>
    %81 = arith.addf %79, %80 : vector<8x32xf32>
    %82 = math.tanh %81 : vector<8x32xf32>
    %cst_41 = arith.constant 1.000000e+00 : f32
    %83 = vector.broadcast %cst_41 : f32 to vector<8x32xf32>
    %84 = arith.subf %83, %78 : vector<8x32xf32>
    %85 = arith.mulf %84, %82 : vector<8x32xf32>
    %86 = arith.mulf %78, %54 : vector<8x32xf32>
    %87 = arith.addf %85, %86 : vector<8x32xf32>
    %c8 = arith.constant 8 : index
    %c0_42 = arith.constant 0 : index
    %88 = vector.load %arg38[%c8, %c0_42] : memref<64x32xf32, #tpu.memory_space<vmem>>, vector<8x32xf32>
    tpu.vector_store %arg38[%c8, %c0_42], %87 {strides = array<i32>} : memref<64x32xf32, #tpu.memory_space<vmem>>, vector<8x32xf32>,
    %cst_43 = arith.constant dense<0.000000e+00> : vector<8x32xf32>
    %89 = tpu.matmul %87, %16, %cst_43 {dimension_numbers = #tpu.dot_dimension_numbers<[1], [0], [0], [1], [0, 0, 1, 1], [], []>} : vector<8x32xf32>, vector<32x32xf32>, vector<8x32xf32> -> vector<8x32xf32>
    %90 = vector.broadcast %19 : vector<1x32xf32> to vector<8x32xf32>
    %91 = arith.addf %89, %90 : vector<8x32xf32>
    %cst_44 = arith.constant dense<0.000000e+00> : vector<8x32xf32>
    %92 = tpu.matmul %87, %17, %cst_44 {dimension_numbers = #tpu.dot_dimension_numbers<[1], [0], [0], [1], [0, 0, 1, 1], [], []>} : vector<8x32xf32>, vector<32x32xf32>, vector<8x32xf32> -> vector<8x32xf32>
    %93 = vector.broadcast %20 : vector<1x32xf32> to vector<8x32xf32>
    %94 = arith.addf %92, %93 : vector<8x32xf32>
    %cst_45 = arith.constant dense<0.000000e+00> : vector<8x32xf32>
    %95 = tpu.matmul %87, %18, %cst_45 {dimension_numbers = #tpu.dot_dimension_numbers<[1], [0], [0], [1], [0, 0, 1, 1], [], []>} : vector<8x32xf32>, vector<32x32xf32>, vector<8x32xf32> -> vector<8x32xf32>
    %96 = vector.broadcast %21 : vector<1x32xf32> to vector<8x32xf32>
    %97 = arith.addf %95, %96 : vector<8x32xf32>
    %98 = vector.extract_strided_slice %5 {offsets = [16, 0], sizes = [8, 32], strides = [1, 1]} : vector<64x32xf32> to vector<8x32xf32>
    %99 = arith.addf %98, %91 : vector<8x32xf32>
    %100 = arith.negf %99 : vector<8x32xf32>
    %101 = math.exp %100 : vector<8x32xf32>
    %cst_46 = arith.constant 1.000000e+00 : f32
    %102 = vector.broadcast %cst_46 : f32 to vector<8x32xf32>
    %103 = arith.addf %102, %101 : vector<8x32xf32>
    %104 = arith.divf %102, %103 : vector<8x32xf32>
    %105 = vector.extract_strided_slice %10 {offsets = [16, 0], sizes = [8, 32], strides = [1, 1]} : vector<64x32xf32> to vector<8x32xf32>
    %106 = arith.addf %105, %94 : vector<8x32xf32>
    %107 = arith.negf %106 : vector<8x32xf32>
    %108 = math.exp %107 : vector<8x32xf32>
    %cst_47 = arith.constant 1.000000e+00 : f32
    %109 = vector.broadcast %cst_47 : f32 to vector<8x32xf32>
    %110 = arith.addf %109, %108 : vector<8x32xf32>
    %111 = arith.divf %109, %110 : vector<8x32xf32>
    %112 = vector.extract_strided_slice %15 {offsets = [16, 0], sizes = [8, 32], strides = [1, 1]} : vector<64x32xf32> to vector<8x32xf32>
    %113 = arith.mulf %104, %97 : vector<8x32xf32>
    %114 = arith.addf %112, %113 : vector<8x32xf32>
    %115 = math.tanh %114 : vector<8x32xf32>
    %cst_48 = arith.constant 1.000000e+00 : f32
    %116 = vector.broadcast %cst_48 : f32 to vector<8x32xf32>
    %117 = arith.subf %116, %111 : vector<8x32xf32>
    %118 = arith.mulf %117, %115 : vector<8x32xf32>
    %119 = arith.mulf %111, %87 : vector<8x32xf32>
    %120 = arith.addf %118, %119 : vector<8x32xf32>
    %c16 = arith.constant 16 : index
    %c0_49 = arith.constant 0 : index
    %121 = vector.load %arg38[%c16, %c0_49] : memref<64x32xf32, #tpu.memory_space<vmem>>, vector<8x32xf32>
    tpu.vector_store %arg38[%c16, %c0_49], %120 {strides = array<i32>} : memref<64x32xf32, #tpu.memory_space<vmem>>, vector<8x32xf32>,
    %cst_50 = arith.constant dense<0.000000e+00> : vector<8x32xf32>
    %122 = tpu.matmul %120, %16, %cst_50 {dimension_numbers = #tpu.dot_dimension_numbers<[1], [0], [0], [1], [0, 0, 1, 1], [], []>} : vector<8x32xf32>, vector<32x32xf32>, vector<8x32xf32> -> vector<8x32xf32>
    %123 = vector.broadcast %19 : vector<1x32xf32> to vector<8x32xf32>
    %124 = arith.addf %122, %123 : vector<8x32xf32>
    %cst_51 = arith.constant dense<0.000000e+00> : vector<8x32xf32>
    %125 = tpu.matmul %120, %17, %cst_51 {dimension_numbers = #tpu.dot_dimension_numbers<[1], [0], [0], [1], [0, 0, 1, 1], [], []>} : vector<8x32xf32>, vector<32x32xf32>, vector<8x32xf32> -> vector<8x32xf32>
    %126 = vector.broadcast %20 : vector<1x32xf32> to vector<8x32xf32>
    %127 = arith.addf %125, %126 : vector<8x32xf32>
    %cst_52 = arith.constant dense<0.000000e+00> : vector<8x32xf32>
    %128 = tpu.matmul %120, %18, %cst_52 {dimension_numbers = #tpu.dot_dimension_numbers<[1], [0], [0], [1], [0, 0, 1, 1], [], []>} : vector<8x32xf32>, vector<32x32xf32>, vector<8x32xf32> -> vector<8x32xf32>
    %129 = vector.broadcast %21 : vector<1x32xf32> to vector<8x32xf32>
    %130 = arith.addf %128, %129 : vector<8x32xf32>
    %131 = vector.extract_strided_slice %5 {offsets = [24, 0], sizes = [8, 32], strides = [1, 1]} : vector<64x32xf32> to vector<8x32xf32>
    %132 = arith.addf %131, %124 : vector<8x32xf32>
    %133 = arith.negf %132 : vector<8x32xf32>
    %134 = math.exp %133 : vector<8x32xf32>
    %cst_53 = arith.constant 1.000000e+00 : f32
    %135 = vector.broadcast %cst_53 : f32 to vector<8x32xf32>
    %136 = arith.addf %135, %134 : vector<8x32xf32>
    %137 = arith.divf %135, %136 : vector<8x32xf32>
    %138 = vector.extract_strided_slice %10 {offsets = [24, 0], sizes = [8, 32], strides = [1, 1]} : vector<64x32xf32> to vector<8x32xf32>
    %139 = arith.addf %138, %127 : vector<8x32xf32>
    %140 = arith.negf %139 : vector<8x32xf32>
    %141 = math.exp %140 : vector<8x32xf32>
    %cst_54 = arith.constant 1.000000e+00 : f32
    %142 = vector.broadcast %cst_54 : f32 to vector<8x32xf32>
    %143 = arith.addf %142, %141 : vector<8x32xf32>
    %144 = arith.divf %142, %143 : vector<8x32xf32>
    %145 = vector.extract_strided_slice %15 {offsets = [24, 0], sizes = [8, 32], strides = [1, 1]} : vector<64x32xf32> to vector<8x32xf32>
    %146 = arith.mulf %137, %130 : vector<8x32xf32>
    %147 = arith.addf %145, %146 : vector<8x32xf32>
    %148 = math.tanh %147 : vector<8x32xf32>
    %cst_55 = arith.constant 1.000000e+00 : f32
    %149 = vector.broadcast %cst_55 : f32 to vector<8x32xf32>
    %150 = arith.subf %149, %144 : vector<8x32xf32>
    %151 = arith.mulf %150, %148 : vector<8x32xf32>
    %152 = arith.mulf %144, %120 : vector<8x32xf32>
    %153 = arith.addf %151, %152 : vector<8x32xf32>
    %c24 = arith.constant 24 : index
    %c0_56 = arith.constant 0 : index
    %154 = vector.load %arg38[%c24, %c0_56] : memref<64x32xf32, #tpu.memory_space<vmem>>, vector<8x32xf32>
    tpu.vector_store %arg38[%c24, %c0_56], %153 {strides = array<i32>} : memref<64x32xf32, #tpu.memory_space<vmem>>, vector<8x32xf32>,
    %cst_57 = arith.constant dense<0.000000e+00> : vector<8x32xf32>
    %155 = tpu.matmul %153, %16, %cst_57 {dimension_numbers = #tpu.dot_dimension_numbers<[1], [0], [0], [1], [0, 0, 1, 1], [], []>} : vector<8x32xf32>, vector<32x32xf32>, vector<8x32xf32> -> vector<8x32xf32>
    %156 = vector.broadcast %19 : vector<1x32xf32> to vector<8x32xf32>
    %157 = arith.addf %155, %156 : vector<8x32xf32>
    %cst_58 = arith.constant dense<0.000000e+00> : vector<8x32xf32>
    %158 = tpu.matmul %153, %17, %cst_58 {dimension_numbers = #tpu.dot_dimension_numbers<[1], [0], [0], [1], [0, 0, 1, 1], [], []>} : vector<8x32xf32>, vector<32x32xf32>, vector<8x32xf32> -> vector<8x32xf32>
    %159 = vector.broadcast %20 : vector<1x32xf32> to vector<8x32xf32>
    %160 = arith.addf %158, %159 : vector<8x32xf32>
    %cst_59 = arith.constant dense<0.000000e+00> : vector<8x32xf32>
    %161 = tpu.matmul %153, %18, %cst_59 {dimension_numbers = #tpu.dot_dimension_numbers<[1], [0], [0], [1], [0, 0, 1, 1], [], []>} : vector<8x32xf32>, vector<32x32xf32>, vector<8x32xf32> -> vector<8x32xf32>
    %162 = vector.broadcast %21 : vector<1x32xf32> to vector<8x32xf32>
    %163 = arith.addf %161, %162 : vector<8x32xf32>
    %164 = vector.extract_strided_slice %5 {offsets = [32, 0], sizes = [8, 32], strides = [1, 1]} : vector<64x32xf32> to vector<8x32xf32>
    %165 = arith.addf %164, %157 : vector<8x32xf32>
    %166 = arith.negf %165 : vector<8x32xf32>
    %167 = math.exp %166 : vector<8x32xf32>
    %cst_60 = arith.constant 1.000000e+00 : f32
    %168 = vector.broadcast %cst_60 : f32 to vector<8x32xf32>
    %169 = arith.addf %168, %167 : vector<8x32xf32>
    %170 = arith.divf %168, %169 : vector<8x32xf32>
    %171 = vector.extract_strided_slice %10 {offsets = [32, 0], sizes = [8, 32], strides = [1, 1]} : vector<64x32xf32> to vector<8x32xf32>
    %172 = arith.addf %171, %160 : vector<8x32xf32>
    %173 = arith.negf %172 : vector<8x32xf32>
    %174 = math.exp %173 : vector<8x32xf32>
    %cst_61 = arith.constant 1.000000e+00 : f32
    %175 = vector.broadcast %cst_61 : f32 to vector<8x32xf32>
    %176 = arith.addf %175, %174 : vector<8x32xf32>
    %177 = arith.divf %175, %176 : vector<8x32xf32>
    %178 = vector.extract_strided_slice %15 {offsets = [32, 0], sizes = [8, 32], strides = [1, 1]} : vector<64x32xf32> to vector<8x32xf32>
    %179 = arith.mulf %170, %163 : vector<8x32xf32>
    %180 = arith.addf %178, %179 : vector<8x32xf32>
    %181 = math.tanh %180 : vector<8x32xf32>
    %cst_62 = arith.constant 1.000000e+00 : f32
    %182 = vector.broadcast %cst_62 : f32 to vector<8x32xf32>
    %183 = arith.subf %182, %177 : vector<8x32xf32>
    %184 = arith.mulf %183, %181 : vector<8x32xf32>
    %185 = arith.mulf %177, %153 : vector<8x32xf32>
    %186 = arith.addf %184, %185 : vector<8x32xf32>
    %c32 = arith.constant 32 : index
    %c0_63 = arith.constant 0 : index
    %187 = vector.load %arg38[%c32, %c0_63] : memref<64x32xf32, #tpu.memory_space<vmem>>, vector<8x32xf32>
    tpu.vector_store %arg38[%c32, %c0_63], %186 {strides = array<i32>} : memref<64x32xf32, #tpu.memory_space<vmem>>, vector<8x32xf32>,
    %cst_64 = arith.constant dense<0.000000e+00> : vector<8x32xf32>
    %188 = tpu.matmul %186, %16, %cst_64 {dimension_numbers = #tpu.dot_dimension_numbers<[1], [0], [0], [1], [0, 0, 1, 1], [], []>} : vector<8x32xf32>, vector<32x32xf32>, vector<8x32xf32> -> vector<8x32xf32>
    %189 = vector.broadcast %19 : vector<1x32xf32> to vector<8x32xf32>
    %190 = arith.addf %188, %189 : vector<8x32xf32>
    %cst_65 = arith.constant dense<0.000000e+00> : vector<8x32xf32>
    %191 = tpu.matmul %186, %17, %cst_65 {dimension_numbers = #tpu.dot_dimension_numbers<[1], [0], [0], [1], [0, 0, 1, 1], [], []>} : vector<8x32xf32>, vector<32x32xf32>, vector<8x32xf32> -> vector<8x32xf32>
    %192 = vector.broadcast %20 : vector<1x32xf32> to vector<8x32xf32>
    %193 = arith.addf %191, %192 : vector<8x32xf32>
    %cst_66 = arith.constant dense<0.000000e+00> : vector<8x32xf32>
    %194 = tpu.matmul %186, %18, %cst_66 {dimension_numbers = #tpu.dot_dimension_numbers<[1], [0], [0], [1], [0, 0, 1, 1], [], []>} : vector<8x32xf32>, vector<32x32xf32>, vector<8x32xf32> -> vector<8x32xf32>
    %195 = vector.broadcast %21 : vector<1x32xf32> to vector<8x32xf32>
    %196 = arith.addf %194, %195 : vector<8x32xf32>
    %197 = vector.extract_strided_slice %5 {offsets = [40, 0], sizes = [8, 32], strides = [1, 1]} : vector<64x32xf32> to vector<8x32xf32>
    %198 = arith.addf %197, %190 : vector<8x32xf32>
    %199 = arith.negf %198 : vector<8x32xf32>
    %200 = math.exp %199 : vector<8x32xf32>
    %cst_67 = arith.constant 1.000000e+00 : f32
    %201 = vector.broadcast %cst_67 : f32 to vector<8x32xf32>
    %202 = arith.addf %201, %200 : vector<8x32xf32>
    %203 = arith.divf %201, %202 : vector<8x32xf32>
    %204 = vector.extract_strided_slice %10 {offsets = [40, 0], sizes = [8, 32], strides = [1, 1]} : vector<64x32xf32> to vector<8x32xf32>
    %205 = arith.addf %204, %193 : vector<8x32xf32>
    %206 = arith.negf %205 : vector<8x32xf32>
    %207 = math.exp %206 : vector<8x32xf32>
    %cst_68 = arith.constant 1.000000e+00 : f32
    %208 = vector.broadcast %cst_68 : f32 to vector<8x32xf32>
    %209 = arith.addf %208, %207 : vector<8x32xf32>
    %210 = arith.divf %208, %209 : vector<8x32xf32>
    %211 = vector.extract_strided_slice %15 {offsets = [40, 0], sizes = [8, 32], strides = [1, 1]} : vector<64x32xf32> to vector<8x32xf32>
    %212 = arith.mulf %203, %196 : vector<8x32xf32>
    %213 = arith.addf %211, %212 : vector<8x32xf32>
    %214 = math.tanh %213 : vector<8x32xf32>
    %cst_69 = arith.constant 1.000000e+00 : f32
    %215 = vector.broadcast %cst_69 : f32 to vector<8x32xf32>
    %216 = arith.subf %215, %210 : vector<8x32xf32>
    %217 = arith.mulf %216, %214 : vector<8x32xf32>
    %218 = arith.mulf %210, %186 : vector<8x32xf32>
    %219 = arith.addf %217, %218 : vector<8x32xf32>
    %c40 = arith.constant 40 : index
    %c0_70 = arith.constant 0 : index
    %220 = vector.load %arg38[%c40, %c0_70] : memref<64x32xf32, #tpu.memory_space<vmem>>, vector<8x32xf32>
    tpu.vector_store %arg38[%c40, %c0_70], %219 {strides = array<i32>} : memref<64x32xf32, #tpu.memory_space<vmem>>, vector<8x32xf32>,
    %cst_71 = arith.constant dense<0.000000e+00> : vector<8x32xf32>
    %221 = tpu.matmul %219, %16, %cst_71 {dimension_numbers = #tpu.dot_dimension_numbers<[1], [0], [0], [1], [0, 0, 1, 1], [], []>} : vector<8x32xf32>, vector<32x32xf32>, vector<8x32xf32> -> vector<8x32xf32>
    %222 = vector.broadcast %19 : vector<1x32xf32> to vector<8x32xf32>
    %223 = arith.addf %221, %222 : vector<8x32xf32>
    %cst_72 = arith.constant dense<0.000000e+00> : vector<8x32xf32>
    %224 = tpu.matmul %219, %17, %cst_72 {dimension_numbers = #tpu.dot_dimension_numbers<[1], [0], [0], [1], [0, 0, 1, 1], [], []>} : vector<8x32xf32>, vector<32x32xf32>, vector<8x32xf32> -> vector<8x32xf32>
    %225 = vector.broadcast %20 : vector<1x32xf32> to vector<8x32xf32>
    %226 = arith.addf %224, %225 : vector<8x32xf32>
    %cst_73 = arith.constant dense<0.000000e+00> : vector<8x32xf32>
    %227 = tpu.matmul %219, %18, %cst_73 {dimension_numbers = #tpu.dot_dimension_numbers<[1], [0], [0], [1], [0, 0, 1, 1], [], []>} : vector<8x32xf32>, vector<32x32xf32>, vector<8x32xf32> -> vector<8x32xf32>
    %228 = vector.broadcast %21 : vector<1x32xf32> to vector<8x32xf32>
    %229 = arith.addf %227, %228 : vector<8x32xf32>
    %230 = vector.extract_strided_slice %5 {offsets = [48, 0], sizes = [8, 32], strides = [1, 1]} : vector<64x32xf32> to vector<8x32xf32>
    %231 = arith.addf %230, %223 : vector<8x32xf32>
    %232 = arith.negf %231 : vector<8x32xf32>
    %233 = math.exp %232 : vector<8x32xf32>
    %cst_74 = arith.constant 1.000000e+00 : f32
    %234 = vector.broadcast %cst_74 : f32 to vector<8x32xf32>
    %235 = arith.addf %234, %233 : vector<8x32xf32>
    %236 = arith.divf %234, %235 : vector<8x32xf32>
    %237 = vector.extract_strided_slice %10 {offsets = [48, 0], sizes = [8, 32], strides = [1, 1]} : vector<64x32xf32> to vector<8x32xf32>
    %238 = arith.addf %237, %226 : vector<8x32xf32>
    %239 = arith.negf %238 : vector<8x32xf32>
    %240 = math.exp %239 : vector<8x32xf32>
    %cst_75 = arith.constant 1.000000e+00 : f32
    %241 = vector.broadcast %cst_75 : f32 to vector<8x32xf32>
    %242 = arith.addf %241, %240 : vector<8x32xf32>
    %243 = arith.divf %241, %242 : vector<8x32xf32>
    %244 = vector.extract_strided_slice %15 {offsets = [48, 0], sizes = [8, 32], strides = [1, 1]} : vector<64x32xf32> to vector<8x32xf32>
    %245 = arith.mulf %236, %229 : vector<8x32xf32>
    %246 = arith.addf %244, %245 : vector<8x32xf32>
    %247 = math.tanh %246 : vector<8x32xf32>
    %cst_76 = arith.constant 1.000000e+00 : f32
    %248 = vector.broadcast %cst_76 : f32 to vector<8x32xf32>
    %249 = arith.subf %248, %243 : vector<8x32xf32>
    %250 = arith.mulf %249, %247 : vector<8x32xf32>
    %251 = arith.mulf %243, %219 : vector<8x32xf32>
    %252 = arith.addf %250, %251 : vector<8x32xf32>
    %c48 = arith.constant 48 : index
    %c0_77 = arith.constant 0 : index
    %253 = vector.load %arg38[%c48, %c0_77] : memref<64x32xf32, #tpu.memory_space<vmem>>, vector<8x32xf32>
    tpu.vector_store %arg38[%c48, %c0_77], %252 {strides = array<i32>} : memref<64x32xf32, #tpu.memory_space<vmem>>, vector<8x32xf32>,
    %cst_78 = arith.constant dense<0.000000e+00> : vector<8x32xf32>
    %254 = tpu.matmul %252, %16, %cst_78 {dimension_numbers = #tpu.dot_dimension_numbers<[1], [0], [0], [1], [0, 0, 1, 1], [], []>} : vector<8x32xf32>, vector<32x32xf32>, vector<8x32xf32> -> vector<8x32xf32>
    %255 = vector.broadcast %19 : vector<1x32xf32> to vector<8x32xf32>
    %256 = arith.addf %254, %255 : vector<8x32xf32>
    %cst_79 = arith.constant dense<0.000000e+00> : vector<8x32xf32>
    %257 = tpu.matmul %252, %17, %cst_79 {dimension_numbers = #tpu.dot_dimension_numbers<[1], [0], [0], [1], [0, 0, 1, 1], [], []>} : vector<8x32xf32>, vector<32x32xf32>, vector<8x32xf32> -> vector<8x32xf32>
    %258 = vector.broadcast %20 : vector<1x32xf32> to vector<8x32xf32>
    %259 = arith.addf %257, %258 : vector<8x32xf32>
    %cst_80 = arith.constant dense<0.000000e+00> : vector<8x32xf32>
    %260 = tpu.matmul %252, %18, %cst_80 {dimension_numbers = #tpu.dot_dimension_numbers<[1], [0], [0], [1], [0, 0, 1, 1], [], []>} : vector<8x32xf32>, vector<32x32xf32>, vector<8x32xf32> -> vector<8x32xf32>
    %261 = vector.broadcast %21 : vector<1x32xf32> to vector<8x32xf32>
    %262 = arith.addf %260, %261 : vector<8x32xf32>
    %263 = vector.extract_strided_slice %5 {offsets = [56, 0], sizes = [8, 32], strides = [1, 1]} : vector<64x32xf32> to vector<8x32xf32>
    %264 = arith.addf %263, %256 : vector<8x32xf32>
    %265 = arith.negf %264 : vector<8x32xf32>
    %266 = math.exp %265 : vector<8x32xf32>
    %cst_81 = arith.constant 1.000000e+00 : f32
    %267 = vector.broadcast %cst_81 : f32 to vector<8x32xf32>
    %268 = arith.addf %267, %266 : vector<8x32xf32>
    %269 = arith.divf %267, %268 : vector<8x32xf32>
    %270 = vector.extract_strided_slice %10 {offsets = [56, 0], sizes = [8, 32], strides = [1, 1]} : vector<64x32xf32> to vector<8x32xf32>
    %271 = arith.addf %270, %259 : vector<8x32xf32>
    %272 = arith.negf %271 : vector<8x32xf32>
    %273 = math.exp %272 : vector<8x32xf32>
    %cst_82 = arith.constant 1.000000e+00 : f32
    %274 = vector.broadcast %cst_82 : f32 to vector<8x32xf32>
    %275 = arith.addf %274, %273 : vector<8x32xf32>
    %276 = arith.divf %274, %275 : vector<8x32xf32>
    %277 = vector.extract_strided_slice %15 {offsets = [56, 0], sizes = [8, 32], strides = [1, 1]} : vector<64x32xf32> to vector<8x32xf32>
    %278 = arith.mulf %269, %262 : vector<8x32xf32>
    %279 = arith.addf %277, %278 : vector<8x32xf32>
    %280 = math.tanh %279 : vector<8x32xf32>
    %cst_83 = arith.constant 1.000000e+00 : f32
    %281 = vector.broadcast %cst_83 : f32 to vector<8x32xf32>
    %282 = arith.subf %281, %276 : vector<8x32xf32>
    %283 = arith.mulf %282, %280 : vector<8x32xf32>
    %284 = arith.mulf %276, %252 : vector<8x32xf32>
    %285 = arith.addf %283, %284 : vector<8x32xf32>
    %c56 = arith.constant 56 : index
    %c0_84 = arith.constant 0 : index
    %286 = vector.load %arg38[%c56, %c0_84] : memref<64x32xf32, #tpu.memory_space<vmem>>, vector<8x32xf32>
    tpu.vector_store %arg38[%c56, %c0_84], %285 {strides = array<i32>} : memref<64x32xf32, #tpu.memory_space<vmem>>, vector<8x32xf32>,
    %c0_85 = arith.constant 0 : index
    %c0_86 = arith.constant 0 : index
    %287 = vector.load %arg38[%c0_85, %c0_86] : memref<64x32xf32, #tpu.memory_space<vmem>>, vector<64x32xf32>
    %c0_87 = arith.constant 0 : index
    %c0_88 = arith.constant 0 : index
    %288 = vector.load %arg13[%c0_87, %c0_88] : memref<32x32xf32, #tpu.memory_space<vmem>>, vector<32x32xf32>
    %cst_89 = arith.constant dense<0.000000e+00> : vector<64x32xf32>
    %289 = tpu.matmul %287, %288, %cst_89 {dimension_numbers = #tpu.dot_dimension_numbers<[1], [0], [0], [1], [0, 0, 1, 1], [], []>} : vector<64x32xf32>, vector<32x32xf32>, vector<64x32xf32> -> vector<64x32xf32>
    %c0_90 = arith.constant 0 : index
    %c0_91 = arith.constant 0 : index
    %290 = vector.load %arg19[%c0_90, %c0_91] : memref<1x32xf32, #tpu.memory_space<vmem>>, vector<1x32xf32>
    %291 = vector.broadcast %290 : vector<1x32xf32> to vector<64x32xf32>
    %292 = arith.addf %289, %291 : vector<64x32xf32>
    %c0_92 = arith.constant 0 : index
    %c0_93 = arith.constant 0 : index
    %293 = vector.load %arg14[%c0_92, %c0_93] : memref<32x32xf32, #tpu.memory_space<vmem>>, vector<32x32xf32>
    %cst_94 = arith.constant dense<0.000000e+00> : vector<64x32xf32>
    %294 = tpu.matmul %287, %293, %cst_94 {dimension_numbers = #tpu.dot_dimension_numbers<[1], [0], [0], [1], [0, 0, 1, 1], [], []>} : vector<64x32xf32>, vector<32x32xf32>, vector<64x32xf32> -> vector<64x32xf32>
    %c0_95 = arith.constant 0 : index
    %c0_96 = arith.constant 0 : index
    %295 = vector.load %arg20[%c0_95, %c0_96] : memref<1x32xf32, #tpu.memory_space<vmem>>, vector<1x32xf32>
    %296 = vector.broadcast %295 : vector<1x32xf32> to vector<64x32xf32>
    %297 = arith.addf %294, %296 : vector<64x32xf32>
    %c0_97 = arith.constant 0 : index
    %c0_98 = arith.constant 0 : index
    %298 = vector.load %arg15[%c0_97, %c0_98] : memref<32x32xf32, #tpu.memory_space<vmem>>, vector<32x32xf32>
    %cst_99 = arith.constant dense<0.000000e+00> : vector<64x32xf32>
    %299 = tpu.matmul %287, %298, %cst_99 {dimension_numbers = #tpu.dot_dimension_numbers<[1], [0], [0], [1], [0, 0, 1, 1], [], []>} : vector<64x32xf32>, vector<32x32xf32>, vector<64x32xf32> -> vector<64x32xf32>
    %c0_100 = arith.constant 0 : index
    %c0_101 = arith.constant 0 : index
    %300 = vector.load %arg21[%c0_100, %c0_101] : memref<1x32xf32, #tpu.memory_space<vmem>>, vector<1x32xf32>
    %301 = vector.broadcast %300 : vector<1x32xf32> to vector<64x32xf32>
    %302 = arith.addf %299, %301 : vector<64x32xf32>
    %c0_102 = arith.constant 0 : index
    %c0_103 = arith.constant 0 : index
    %303 = vector.load %arg16[%c0_102, %c0_103] : memref<32x32xf32, #tpu.memory_space<vmem>>, vector<32x32xf32>
    %c0_104 = arith.constant 0 : index
    %c0_105 = arith.constant 0 : index
    %304 = vector.load %arg17[%c0_104, %c0_105] : memref<32x32xf32, #tpu.memory_space<vmem>>, vector<32x32xf32>
    %c0_106 = arith.constant 0 : index
    %c0_107 = arith.constant 0 : index
    %305 = vector.load %arg18[%c0_106, %c0_107] : memref<32x32xf32, #tpu.memory_space<vmem>>, vector<32x32xf32>
    %c0_108 = arith.constant 0 : index
    %c0_109 = arith.constant 0 : index
    %306 = vector.load %arg22[%c0_108, %c0_109] : memref<1x32xf32, #tpu.memory_space<vmem>>, vector<1x32xf32>
    %c0_110 = arith.constant 0 : index
    %c0_111 = arith.constant 0 : index
    %307 = vector.load %arg23[%c0_110, %c0_111] : memref<1x32xf32, #tpu.memory_space<vmem>>, vector<1x32xf32>
    %c0_112 = arith.constant 0 : index
    %c0_113 = arith.constant 0 : index
    %308 = vector.load %arg24[%c0_112, %c0_113] : memref<1x32xf32, #tpu.memory_space<vmem>>, vector<1x32xf32>
    %cst_114 = arith.constant 0.000000e+00 : f32
    %309 = vector.broadcast %cst_114 : f32 to vector<8x32xf32>
    %cst_115 = arith.constant dense<0.000000e+00> : vector<8x32xf32>
    %310 = tpu.matmul %309, %303, %cst_115 {dimension_numbers = #tpu.dot_dimension_numbers<[1], [0], [0], [1], [0, 0, 1, 1], [], []>} : vector<8x32xf32>, vector<32x32xf32>, vector<8x32xf32> -> vector<8x32xf32>
    %311 = vector.broadcast %306 : vector<1x32xf32> to vector<8x32xf32>
    %312 = arith.addf %310, %311 : vector<8x32xf32>
    %cst_116 = arith.constant dense<0.000000e+00> : vector<8x32xf32>
    %313 = tpu.matmul %309, %304, %cst_116 {dimension_numbers = #tpu.dot_dimension_numbers<[1], [0], [0], [1], [0, 0, 1, 1], [], []>} : vector<8x32xf32>, vector<32x32xf32>, vector<8x32xf32> -> vector<8x32xf32>
    %314 = vector.broadcast %307 : vector<1x32xf32> to vector<8x32xf32>
    %315 = arith.addf %313, %314 : vector<8x32xf32>
    %cst_117 = arith.constant dense<0.000000e+00> : vector<8x32xf32>
    %316 = tpu.matmul %309, %305, %cst_117 {dimension_numbers = #tpu.dot_dimension_numbers<[1], [0], [0], [1], [0, 0, 1, 1], [], []>} : vector<8x32xf32>, vector<32x32xf32>, vector<8x32xf32> -> vector<8x32xf32>
    %317 = vector.broadcast %308 : vector<1x32xf32> to vector<8x32xf32>
    %318 = arith.addf %316, %317 : vector<8x32xf32>
    %319 = vector.extract_strided_slice %292 {offsets = [0, 0], sizes = [8, 32], strides = [1, 1]} : vector<64x32xf32> to vector<8x32xf32>
    %320 = arith.addf %319, %312 : vector<8x32xf32>
    %321 = arith.negf %320 : vector<8x32xf32>
    %322 = math.exp %321 : vector<8x32xf32>
    %cst_118 = arith.constant 1.000000e+00 : f32
    %323 = vector.broadcast %cst_118 : f32 to vector<8x32xf32>
    %324 = arith.addf %323, %322 : vector<8x32xf32>
    %325 = arith.divf %323, %324 : vector<8x32xf32>
    %326 = vector.extract_strided_slice %297 {offsets = [0, 0], sizes = [8, 32], strides = [1, 1]} : vector<64x32xf32> to vector<8x32xf32>
    %327 = arith.addf %326, %315 : vector<8x32xf32>
    %328 = arith.negf %327 : vector<8x32xf32>
    %329 = math.exp %328 : vector<8x32xf32>
    %cst_119 = arith.constant 1.000000e+00 : f32
    %330 = vector.broadcast %cst_119 : f32 to vector<8x32xf32>
    %331 = arith.addf %330, %329 : vector<8x32xf32>
    %332 = arith.divf %330, %331 : vector<8x32xf32>
    %333 = vector.extract_strided_slice %302 {offsets = [0, 0], sizes = [8, 32], strides = [1, 1]} : vector<64x32xf32> to vector<8x32xf32>
    %334 = arith.mulf %325, %318 : vector<8x32xf32>
    %335 = arith.addf %333, %334 : vector<8x32xf32>
    %336 = math.tanh %335 : vector<8x32xf32>
    %cst_120 = arith.constant 1.000000e+00 : f32
    %337 = vector.broadcast %cst_120 : f32 to vector<8x32xf32>
    %338 = arith.subf %337, %332 : vector<8x32xf32>
    %339 = arith.mulf %338, %336 : vector<8x32xf32>
    %340 = arith.mulf %332, %309 : vector<8x32xf32>
    %341 = arith.addf %339, %340 : vector<8x32xf32>
    %c0_121 = arith.constant 0 : index
    %c0_122 = arith.constant 0 : index
    %342 = vector.load %arg38[%c0_121, %c0_122] : memref<64x32xf32, #tpu.memory_space<vmem>>, vector<8x32xf32>
    tpu.vector_store %arg38[%c0_121, %c0_122], %341 {strides = array<i32>} : memref<64x32xf32, #tpu.memory_space<vmem>>, vector<8x32xf32>,
    %cst_123 = arith.constant dense<0.000000e+00> : vector<8x32xf32>
    %343 = tpu.matmul %341, %303, %cst_123 {dimension_numbers = #tpu.dot_dimension_numbers<[1], [0], [0], [1], [0, 0, 1, 1], [], []>} : vector<8x32xf32>, vector<32x32xf32>, vector<8x32xf32> -> vector<8x32xf32>
    %344 = vector.broadcast %306 : vector<1x32xf32> to vector<8x32xf32>
    %345 = arith.addf %343, %344 : vector<8x32xf32>
    %cst_124 = arith.constant dense<0.000000e+00> : vector<8x32xf32>
    %346 = tpu.matmul %341, %304, %cst_124 {dimension_numbers = #tpu.dot_dimension_numbers<[1], [0], [0], [1], [0, 0, 1, 1], [], []>} : vector<8x32xf32>, vector<32x32xf32>, vector<8x32xf32> -> vector<8x32xf32>
    %347 = vector.broadcast %307 : vector<1x32xf32> to vector<8x32xf32>
    %348 = arith.addf %346, %347 : vector<8x32xf32>
    %cst_125 = arith.constant dense<0.000000e+00> : vector<8x32xf32>
    %349 = tpu.matmul %341, %305, %cst_125 {dimension_numbers = #tpu.dot_dimension_numbers<[1], [0], [0], [1], [0, 0, 1, 1], [], []>} : vector<8x32xf32>, vector<32x32xf32>, vector<8x32xf32> -> vector<8x32xf32>
    %350 = vector.broadcast %308 : vector<1x32xf32> to vector<8x32xf32>
    %351 = arith.addf %349, %350 : vector<8x32xf32>
    %352 = vector.extract_strided_slice %292 {offsets = [8, 0], sizes = [8, 32], strides = [1, 1]} : vector<64x32xf32> to vector<8x32xf32>
    %353 = arith.addf %352, %345 : vector<8x32xf32>
    %354 = arith.negf %353 : vector<8x32xf32>
    %355 = math.exp %354 : vector<8x32xf32>
    %cst_126 = arith.constant 1.000000e+00 : f32
    %356 = vector.broadcast %cst_126 : f32 to vector<8x32xf32>
    %357 = arith.addf %356, %355 : vector<8x32xf32>
    %358 = arith.divf %356, %357 : vector<8x32xf32>
    %359 = vector.extract_strided_slice %297 {offsets = [8, 0], sizes = [8, 32], strides = [1, 1]} : vector<64x32xf32> to vector<8x32xf32>
    %360 = arith.addf %359, %348 : vector<8x32xf32>
    %361 = arith.negf %360 : vector<8x32xf32>
    %362 = math.exp %361 : vector<8x32xf32>
    %cst_127 = arith.constant 1.000000e+00 : f32
    %363 = vector.broadcast %cst_127 : f32 to vector<8x32xf32>
    %364 = arith.addf %363, %362 : vector<8x32xf32>
    %365 = arith.divf %363, %364 : vector<8x32xf32>
    %366 = vector.extract_strided_slice %302 {offsets = [8, 0], sizes = [8, 32], strides = [1, 1]} : vector<64x32xf32> to vector<8x32xf32>
    %367 = arith.mulf %358, %351 : vector<8x32xf32>
    %368 = arith.addf %366, %367 : vector<8x32xf32>
    %369 = math.tanh %368 : vector<8x32xf32>
    %cst_128 = arith.constant 1.000000e+00 : f32
    %370 = vector.broadcast %cst_128 : f32 to vector<8x32xf32>
    %371 = arith.subf %370, %365 : vector<8x32xf32>
    %372 = arith.mulf %371, %369 : vector<8x32xf32>
    %373 = arith.mulf %365, %341 : vector<8x32xf32>
    %374 = arith.addf %372, %373 : vector<8x32xf32>
    %c8_129 = arith.constant 8 : index
    %c0_130 = arith.constant 0 : index
    %375 = vector.load %arg38[%c8_129, %c0_130] : memref<64x32xf32, #tpu.memory_space<vmem>>, vector<8x32xf32>
    tpu.vector_store %arg38[%c8_129, %c0_130], %374 {strides = array<i32>} : memref<64x32xf32, #tpu.memory_space<vmem>>, vector<8x32xf32>,
    %cst_131 = arith.constant dense<0.000000e+00> : vector<8x32xf32>
    %376 = tpu.matmul %374, %303, %cst_131 {dimension_numbers = #tpu.dot_dimension_numbers<[1], [0], [0], [1], [0, 0, 1, 1], [], []>} : vector<8x32xf32>, vector<32x32xf32>, vector<8x32xf32> -> vector<8x32xf32>
    %377 = vector.broadcast %306 : vector<1x32xf32> to vector<8x32xf32>
    %378 = arith.addf %376, %377 : vector<8x32xf32>
    %cst_132 = arith.constant dense<0.000000e+00> : vector<8x32xf32>
    %379 = tpu.matmul %374, %304, %cst_132 {dimension_numbers = #tpu.dot_dimension_numbers<[1], [0], [0], [1], [0, 0, 1, 1], [], []>} : vector<8x32xf32>, vector<32x32xf32>, vector<8x32xf32> -> vector<8x32xf32>
    %380 = vector.broadcast %307 : vector<1x32xf32> to vector<8x32xf32>
    %381 = arith.addf %379, %380 : vector<8x32xf32>
    %cst_133 = arith.constant dense<0.000000e+00> : vector<8x32xf32>
    %382 = tpu.matmul %374, %305, %cst_133 {dimension_numbers = #tpu.dot_dimension_numbers<[1], [0], [0], [1], [0, 0, 1, 1], [], []>} : vector<8x32xf32>, vector<32x32xf32>, vector<8x32xf32> -> vector<8x32xf32>
    %383 = vector.broadcast %308 : vector<1x32xf32> to vector<8x32xf32>
    %384 = arith.addf %382, %383 : vector<8x32xf32>
    %385 = vector.extract_strided_slice %292 {offsets = [16, 0], sizes = [8, 32], strides = [1, 1]} : vector<64x32xf32> to vector<8x32xf32>
    %386 = arith.addf %385, %378 : vector<8x32xf32>
    %387 = arith.negf %386 : vector<8x32xf32>
    %388 = math.exp %387 : vector<8x32xf32>
    %cst_134 = arith.constant 1.000000e+00 : f32
    %389 = vector.broadcast %cst_134 : f32 to vector<8x32xf32>
    %390 = arith.addf %389, %388 : vector<8x32xf32>
    %391 = arith.divf %389, %390 : vector<8x32xf32>
    %392 = vector.extract_strided_slice %297 {offsets = [16, 0], sizes = [8, 32], strides = [1, 1]} : vector<64x32xf32> to vector<8x32xf32>
    %393 = arith.addf %392, %381 : vector<8x32xf32>
    %394 = arith.negf %393 : vector<8x32xf32>
    %395 = math.exp %394 : vector<8x32xf32>
    %cst_135 = arith.constant 1.000000e+00 : f32
    %396 = vector.broadcast %cst_135 : f32 to vector<8x32xf32>
    %397 = arith.addf %396, %395 : vector<8x32xf32>
    %398 = arith.divf %396, %397 : vector<8x32xf32>
    %399 = vector.extract_strided_slice %302 {offsets = [16, 0], sizes = [8, 32], strides = [1, 1]} : vector<64x32xf32> to vector<8x32xf32>
    %400 = arith.mulf %391, %384 : vector<8x32xf32>
    %401 = arith.addf %399, %400 : vector<8x32xf32>
    %402 = math.tanh %401 : vector<8x32xf32>
    %cst_136 = arith.constant 1.000000e+00 : f32
    %403 = vector.broadcast %cst_136 : f32 to vector<8x32xf32>
    %404 = arith.subf %403, %398 : vector<8x32xf32>
    %405 = arith.mulf %404, %402 : vector<8x32xf32>
    %406 = arith.mulf %398, %374 : vector<8x32xf32>
    %407 = arith.addf %405, %406 : vector<8x32xf32>
    %c16_137 = arith.constant 16 : index
    %c0_138 = arith.constant 0 : index
    %408 = vector.load %arg38[%c16_137, %c0_138] : memref<64x32xf32, #tpu.memory_space<vmem>>, vector<8x32xf32>
    tpu.vector_store %arg38[%c16_137, %c0_138], %407 {strides = array<i32>} : memref<64x32xf32, #tpu.memory_space<vmem>>, vector<8x32xf32>,
    %cst_139 = arith.constant dense<0.000000e+00> : vector<8x32xf32>
    %409 = tpu.matmul %407, %303, %cst_139 {dimension_numbers = #tpu.dot_dimension_numbers<[1], [0], [0], [1], [0, 0, 1, 1], [], []>} : vector<8x32xf32>, vector<32x32xf32>, vector<8x32xf32> -> vector<8x32xf32>
    %410 = vector.broadcast %306 : vector<1x32xf32> to vector<8x32xf32>
    %411 = arith.addf %409, %410 : vector<8x32xf32>
    %cst_140 = arith.constant dense<0.000000e+00> : vector<8x32xf32>
    %412 = tpu.matmul %407, %304, %cst_140 {dimension_numbers = #tpu.dot_dimension_numbers<[1], [0], [0], [1], [0, 0, 1, 1], [], []>} : vector<8x32xf32>, vector<32x32xf32>, vector<8x32xf32> -> vector<8x32xf32>
    %413 = vector.broadcast %307 : vector<1x32xf32> to vector<8x32xf32>
    %414 = arith.addf %412, %413 : vector<8x32xf32>
    %cst_141 = arith.constant dense<0.000000e+00> : vector<8x32xf32>
    %415 = tpu.matmul %407, %305, %cst_141 {dimension_numbers = #tpu.dot_dimension_numbers<[1], [0], [0], [1], [0, 0, 1, 1], [], []>} : vector<8x32xf32>, vector<32x32xf32>, vector<8x32xf32> -> vector<8x32xf32>
    %416 = vector.broadcast %308 : vector<1x32xf32> to vector<8x32xf32>
    %417 = arith.addf %415, %416 : vector<8x32xf32>
    %418 = vector.extract_strided_slice %292 {offsets = [24, 0], sizes = [8, 32], strides = [1, 1]} : vector<64x32xf32> to vector<8x32xf32>
    %419 = arith.addf %418, %411 : vector<8x32xf32>
    %420 = arith.negf %419 : vector<8x32xf32>
    %421 = math.exp %420 : vector<8x32xf32>
    %cst_142 = arith.constant 1.000000e+00 : f32
    %422 = vector.broadcast %cst_142 : f32 to vector<8x32xf32>
    %423 = arith.addf %422, %421 : vector<8x32xf32>
    %424 = arith.divf %422, %423 : vector<8x32xf32>
    %425 = vector.extract_strided_slice %297 {offsets = [24, 0], sizes = [8, 32], strides = [1, 1]} : vector<64x32xf32> to vector<8x32xf32>
    %426 = arith.addf %425, %414 : vector<8x32xf32>
    %427 = arith.negf %426 : vector<8x32xf32>
    %428 = math.exp %427 : vector<8x32xf32>
    %cst_143 = arith.constant 1.000000e+00 : f32
    %429 = vector.broadcast %cst_143 : f32 to vector<8x32xf32>
    %430 = arith.addf %429, %428 : vector<8x32xf32>
    %431 = arith.divf %429, %430 : vector<8x32xf32>
    %432 = vector.extract_strided_slice %302 {offsets = [24, 0], sizes = [8, 32], strides = [1, 1]} : vector<64x32xf32> to vector<8x32xf32>
    %433 = arith.mulf %424, %417 : vector<8x32xf32>
    %434 = arith.addf %432, %433 : vector<8x32xf32>
    %435 = math.tanh %434 : vector<8x32xf32>
    %cst_144 = arith.constant 1.000000e+00 : f32
    %436 = vector.broadcast %cst_144 : f32 to vector<8x32xf32>
    %437 = arith.subf %436, %431 : vector<8x32xf32>
    %438 = arith.mulf %437, %435 : vector<8x32xf32>
    %439 = arith.mulf %431, %407 : vector<8x32xf32>
    %440 = arith.addf %438, %439 : vector<8x32xf32>
    %c24_145 = arith.constant 24 : index
    %c0_146 = arith.constant 0 : index
    %441 = vector.load %arg38[%c24_145, %c0_146] : memref<64x32xf32, #tpu.memory_space<vmem>>, vector<8x32xf32>
    tpu.vector_store %arg38[%c24_145, %c0_146], %440 {strides = array<i32>} : memref<64x32xf32, #tpu.memory_space<vmem>>, vector<8x32xf32>,
    %cst_147 = arith.constant dense<0.000000e+00> : vector<8x32xf32>
    %442 = tpu.matmul %440, %303, %cst_147 {dimension_numbers = #tpu.dot_dimension_numbers<[1], [0], [0], [1], [0, 0, 1, 1], [], []>} : vector<8x32xf32>, vector<32x32xf32>, vector<8x32xf32> -> vector<8x32xf32>
    %443 = vector.broadcast %306 : vector<1x32xf32> to vector<8x32xf32>
    %444 = arith.addf %442, %443 : vector<8x32xf32>
    %cst_148 = arith.constant dense<0.000000e+00> : vector<8x32xf32>
    %445 = tpu.matmul %440, %304, %cst_148 {dimension_numbers = #tpu.dot_dimension_numbers<[1], [0], [0], [1], [0, 0, 1, 1], [], []>} : vector<8x32xf32>, vector<32x32xf32>, vector<8x32xf32> -> vector<8x32xf32>
    %446 = vector.broadcast %307 : vector<1x32xf32> to vector<8x32xf32>
    %447 = arith.addf %445, %446 : vector<8x32xf32>
    %cst_149 = arith.constant dense<0.000000e+00> : vector<8x32xf32>
    %448 = tpu.matmul %440, %305, %cst_149 {dimension_numbers = #tpu.dot_dimension_numbers<[1], [0], [0], [1], [0, 0, 1, 1], [], []>} : vector<8x32xf32>, vector<32x32xf32>, vector<8x32xf32> -> vector<8x32xf32>
    %449 = vector.broadcast %308 : vector<1x32xf32> to vector<8x32xf32>
    %450 = arith.addf %448, %449 : vector<8x32xf32>
    %451 = vector.extract_strided_slice %292 {offsets = [32, 0], sizes = [8, 32], strides = [1, 1]} : vector<64x32xf32> to vector<8x32xf32>
    %452 = arith.addf %451, %444 : vector<8x32xf32>
    %453 = arith.negf %452 : vector<8x32xf32>
    %454 = math.exp %453 : vector<8x32xf32>
    %cst_150 = arith.constant 1.000000e+00 : f32
    %455 = vector.broadcast %cst_150 : f32 to vector<8x32xf32>
    %456 = arith.addf %455, %454 : vector<8x32xf32>
    %457 = arith.divf %455, %456 : vector<8x32xf32>
    %458 = vector.extract_strided_slice %297 {offsets = [32, 0], sizes = [8, 32], strides = [1, 1]} : vector<64x32xf32> to vector<8x32xf32>
    %459 = arith.addf %458, %447 : vector<8x32xf32>
    %460 = arith.negf %459 : vector<8x32xf32>
    %461 = math.exp %460 : vector<8x32xf32>
    %cst_151 = arith.constant 1.000000e+00 : f32
    %462 = vector.broadcast %cst_151 : f32 to vector<8x32xf32>
    %463 = arith.addf %462, %461 : vector<8x32xf32>
    %464 = arith.divf %462, %463 : vector<8x32xf32>
    %465 = vector.extract_strided_slice %302 {offsets = [32, 0], sizes = [8, 32], strides = [1, 1]} : vector<64x32xf32> to vector<8x32xf32>
    %466 = arith.mulf %457, %450 : vector<8x32xf32>
    %467 = arith.addf %465, %466 : vector<8x32xf32>
    %468 = math.tanh %467 : vector<8x32xf32>
    %cst_152 = arith.constant 1.000000e+00 : f32
    %469 = vector.broadcast %cst_152 : f32 to vector<8x32xf32>
    %470 = arith.subf %469, %464 : vector<8x32xf32>
    %471 = arith.mulf %470, %468 : vector<8x32xf32>
    %472 = arith.mulf %464, %440 : vector<8x32xf32>
    %473 = arith.addf %471, %472 : vector<8x32xf32>
    %c32_153 = arith.constant 32 : index
    %c0_154 = arith.constant 0 : index
    %474 = vector.load %arg38[%c32_153, %c0_154] : memref<64x32xf32, #tpu.memory_space<vmem>>, vector<8x32xf32>
    tpu.vector_store %arg38[%c32_153, %c0_154], %473 {strides = array<i32>} : memref<64x32xf32, #tpu.memory_space<vmem>>, vector<8x32xf32>,
    %cst_155 = arith.constant dense<0.000000e+00> : vector<8x32xf32>
    %475 = tpu.matmul %473, %303, %cst_155 {dimension_numbers = #tpu.dot_dimension_numbers<[1], [0], [0], [1], [0, 0, 1, 1], [], []>} : vector<8x32xf32>, vector<32x32xf32>, vector<8x32xf32> -> vector<8x32xf32>
    %476 = vector.broadcast %306 : vector<1x32xf32> to vector<8x32xf32>
    %477 = arith.addf %475, %476 : vector<8x32xf32>
    %cst_156 = arith.constant dense<0.000000e+00> : vector<8x32xf32>
    %478 = tpu.matmul %473, %304, %cst_156 {dimension_numbers = #tpu.dot_dimension_numbers<[1], [0], [0], [1], [0, 0, 1, 1], [], []>} : vector<8x32xf32>, vector<32x32xf32>, vector<8x32xf32> -> vector<8x32xf32>
    %479 = vector.broadcast %307 : vector<1x32xf32> to vector<8x32xf32>
    %480 = arith.addf %478, %479 : vector<8x32xf32>
    %cst_157 = arith.constant dense<0.000000e+00> : vector<8x32xf32>
    %481 = tpu.matmul %473, %305, %cst_157 {dimension_numbers = #tpu.dot_dimension_numbers<[1], [0], [0], [1], [0, 0, 1, 1], [], []>} : vector<8x32xf32>, vector<32x32xf32>, vector<8x32xf32> -> vector<8x32xf32>
    %482 = vector.broadcast %308 : vector<1x32xf32> to vector<8x32xf32>
    %483 = arith.addf %481, %482 : vector<8x32xf32>
    %484 = vector.extract_strided_slice %292 {offsets = [40, 0], sizes = [8, 32], strides = [1, 1]} : vector<64x32xf32> to vector<8x32xf32>
    %485 = arith.addf %484, %477 : vector<8x32xf32>
    %486 = arith.negf %485 : vector<8x32xf32>
    %487 = math.exp %486 : vector<8x32xf32>
    %cst_158 = arith.constant 1.000000e+00 : f32
    %488 = vector.broadcast %cst_158 : f32 to vector<8x32xf32>
    %489 = arith.addf %488, %487 : vector<8x32xf32>
    %490 = arith.divf %488, %489 : vector<8x32xf32>
    %491 = vector.extract_strided_slice %297 {offsets = [40, 0], sizes = [8, 32], strides = [1, 1]} : vector<64x32xf32> to vector<8x32xf32>
    %492 = arith.addf %491, %480 : vector<8x32xf32>
    %493 = arith.negf %492 : vector<8x32xf32>
    %494 = math.exp %493 : vector<8x32xf32>
    %cst_159 = arith.constant 1.000000e+00 : f32
    %495 = vector.broadcast %cst_159 : f32 to vector<8x32xf32>
    %496 = arith.addf %495, %494 : vector<8x32xf32>
    %497 = arith.divf %495, %496 : vector<8x32xf32>
    %498 = vector.extract_strided_slice %302 {offsets = [40, 0], sizes = [8, 32], strides = [1, 1]} : vector<64x32xf32> to vector<8x32xf32>
    %499 = arith.mulf %490, %483 : vector<8x32xf32>
    %500 = arith.addf %498, %499 : vector<8x32xf32>
    %501 = math.tanh %500 : vector<8x32xf32>
    %cst_160 = arith.constant 1.000000e+00 : f32
    %502 = vector.broadcast %cst_160 : f32 to vector<8x32xf32>
    %503 = arith.subf %502, %497 : vector<8x32xf32>
    %504 = arith.mulf %503, %501 : vector<8x32xf32>
    %505 = arith.mulf %497, %473 : vector<8x32xf32>
    %506 = arith.addf %504, %505 : vector<8x32xf32>
    %c40_161 = arith.constant 40 : index
    %c0_162 = arith.constant 0 : index
    %507 = vector.load %arg38[%c40_161, %c0_162] : memref<64x32xf32, #tpu.memory_space<vmem>>, vector<8x32xf32>
    tpu.vector_store %arg38[%c40_161, %c0_162], %506 {strides = array<i32>} : memref<64x32xf32, #tpu.memory_space<vmem>>, vector<8x32xf32>,
    %cst_163 = arith.constant dense<0.000000e+00> : vector<8x32xf32>
    %508 = tpu.matmul %506, %303, %cst_163 {dimension_numbers = #tpu.dot_dimension_numbers<[1], [0], [0], [1], [0, 0, 1, 1], [], []>} : vector<8x32xf32>, vector<32x32xf32>, vector<8x32xf32> -> vector<8x32xf32>
    %509 = vector.broadcast %306 : vector<1x32xf32> to vector<8x32xf32>
    %510 = arith.addf %508, %509 : vector<8x32xf32>
    %cst_164 = arith.constant dense<0.000000e+00> : vector<8x32xf32>
    %511 = tpu.matmul %506, %304, %cst_164 {dimension_numbers = #tpu.dot_dimension_numbers<[1], [0], [0], [1], [0, 0, 1, 1], [], []>} : vector<8x32xf32>, vector<32x32xf32>, vector<8x32xf32> -> vector<8x32xf32>
    %512 = vector.broadcast %307 : vector<1x32xf32> to vector<8x32xf32>
    %513 = arith.addf %511, %512 : vector<8x32xf32>
    %cst_165 = arith.constant dense<0.000000e+00> : vector<8x32xf32>
    %514 = tpu.matmul %506, %305, %cst_165 {dimension_numbers = #tpu.dot_dimension_numbers<[1], [0], [0], [1], [0, 0, 1, 1], [], []>} : vector<8x32xf32>, vector<32x32xf32>, vector<8x32xf32> -> vector<8x32xf32>
    %515 = vector.broadcast %308 : vector<1x32xf32> to vector<8x32xf32>
    %516 = arith.addf %514, %515 : vector<8x32xf32>
    %517 = vector.extract_strided_slice %292 {offsets = [48, 0], sizes = [8, 32], strides = [1, 1]} : vector<64x32xf32> to vector<8x32xf32>
    %518 = arith.addf %517, %510 : vector<8x32xf32>
    %519 = arith.negf %518 : vector<8x32xf32>
    %520 = math.exp %519 : vector<8x32xf32>
    %cst_166 = arith.constant 1.000000e+00 : f32
    %521 = vector.broadcast %cst_166 : f32 to vector<8x32xf32>
    %522 = arith.addf %521, %520 : vector<8x32xf32>
    %523 = arith.divf %521, %522 : vector<8x32xf32>
    %524 = vector.extract_strided_slice %297 {offsets = [48, 0], sizes = [8, 32], strides = [1, 1]} : vector<64x32xf32> to vector<8x32xf32>
    %525 = arith.addf %524, %513 : vector<8x32xf32>
    %526 = arith.negf %525 : vector<8x32xf32>
    %527 = math.exp %526 : vector<8x32xf32>
    %cst_167 = arith.constant 1.000000e+00 : f32
    %528 = vector.broadcast %cst_167 : f32 to vector<8x32xf32>
    %529 = arith.addf %528, %527 : vector<8x32xf32>
    %530 = arith.divf %528, %529 : vector<8x32xf32>
    %531 = vector.extract_strided_slice %302 {offsets = [48, 0], sizes = [8, 32], strides = [1, 1]} : vector<64x32xf32> to vector<8x32xf32>
    %532 = arith.mulf %523, %516 : vector<8x32xf32>
    %533 = arith.addf %531, %532 : vector<8x32xf32>
    %534 = math.tanh %533 : vector<8x32xf32>
    %cst_168 = arith.constant 1.000000e+00 : f32
    %535 = vector.broadcast %cst_168 : f32 to vector<8x32xf32>
    %536 = arith.subf %535, %530 : vector<8x32xf32>
    %537 = arith.mulf %536, %534 : vector<8x32xf32>
    %538 = arith.mulf %530, %506 : vector<8x32xf32>
    %539 = arith.addf %537, %538 : vector<8x32xf32>
    %c48_169 = arith.constant 48 : index
    %c0_170 = arith.constant 0 : index
    %540 = vector.load %arg38[%c48_169, %c0_170] : memref<64x32xf32, #tpu.memory_space<vmem>>, vector<8x32xf32>
    tpu.vector_store %arg38[%c48_169, %c0_170], %539 {strides = array<i32>} : memref<64x32xf32, #tpu.memory_space<vmem>>, vector<8x32xf32>,
    %cst_171 = arith.constant dense<0.000000e+00> : vector<8x32xf32>
    %541 = tpu.matmul %539, %303, %cst_171 {dimension_numbers = #tpu.dot_dimension_numbers<[1], [0], [0], [1], [0, 0, 1, 1], [], []>} : vector<8x32xf32>, vector<32x32xf32>, vector<8x32xf32> -> vector<8x32xf32>
    %542 = vector.broadcast %306 : vector<1x32xf32> to vector<8x32xf32>
    %543 = arith.addf %541, %542 : vector<8x32xf32>
    %cst_172 = arith.constant dense<0.000000e+00> : vector<8x32xf32>
    %544 = tpu.matmul %539, %304, %cst_172 {dimension_numbers = #tpu.dot_dimension_numbers<[1], [0], [0], [1], [0, 0, 1, 1], [], []>} : vector<8x32xf32>, vector<32x32xf32>, vector<8x32xf32> -> vector<8x32xf32>
    %545 = vector.broadcast %307 : vector<1x32xf32> to vector<8x32xf32>
    %546 = arith.addf %544, %545 : vector<8x32xf32>
    %cst_173 = arith.constant dense<0.000000e+00> : vector<8x32xf32>
    %547 = tpu.matmul %539, %305, %cst_173 {dimension_numbers = #tpu.dot_dimension_numbers<[1], [0], [0], [1], [0, 0, 1, 1], [], []>} : vector<8x32xf32>, vector<32x32xf32>, vector<8x32xf32> -> vector<8x32xf32>
    %548 = vector.broadcast %308 : vector<1x32xf32> to vector<8x32xf32>
    %549 = arith.addf %547, %548 : vector<8x32xf32>
    %550 = vector.extract_strided_slice %292 {offsets = [56, 0], sizes = [8, 32], strides = [1, 1]} : vector<64x32xf32> to vector<8x32xf32>
    %551 = arith.addf %550, %543 : vector<8x32xf32>
    %552 = arith.negf %551 : vector<8x32xf32>
    %553 = math.exp %552 : vector<8x32xf32>
    %cst_174 = arith.constant 1.000000e+00 : f32
    %554 = vector.broadcast %cst_174 : f32 to vector<8x32xf32>
    %555 = arith.addf %554, %553 : vector<8x32xf32>
    %556 = arith.divf %554, %555 : vector<8x32xf32>
    %557 = vector.extract_strided_slice %297 {offsets = [56, 0], sizes = [8, 32], strides = [1, 1]} : vector<64x32xf32> to vector<8x32xf32>
    %558 = arith.addf %557, %546 : vector<8x32xf32>
    %559 = arith.negf %558 : vector<8x32xf32>
    %560 = math.exp %559 : vector<8x32xf32>
    %cst_175 = arith.constant 1.000000e+00 : f32
    %561 = vector.broadcast %cst_175 : f32 to vector<8x32xf32>
    %562 = arith.addf %561, %560 : vector<8x32xf32>
    %563 = arith.divf %561, %562 : vector<8x32xf32>
    %564 = vector.extract_strided_slice %302 {offsets = [56, 0], sizes = [8, 32], strides = [1, 1]} : vector<64x32xf32> to vector<8x32xf32>
    %565 = arith.mulf %556, %549 : vector<8x32xf32>
    %566 = arith.addf %564, %565 : vector<8x32xf32>
    %567 = math.tanh %566 : vector<8x32xf32>
    %cst_176 = arith.constant 1.000000e+00 : f32
    %568 = vector.broadcast %cst_176 : f32 to vector<8x32xf32>
    %569 = arith.subf %568, %563 : vector<8x32xf32>
    %570 = arith.mulf %569, %567 : vector<8x32xf32>
    %571 = arith.mulf %563, %539 : vector<8x32xf32>
    %572 = arith.addf %570, %571 : vector<8x32xf32>
    %c56_177 = arith.constant 56 : index
    %c0_178 = arith.constant 0 : index
    %573 = vector.load %arg38[%c56_177, %c0_178] : memref<64x32xf32, #tpu.memory_space<vmem>>, vector<8x32xf32>
    tpu.vector_store %arg38[%c56_177, %c0_178], %572 {strides = array<i32>} : memref<64x32xf32, #tpu.memory_space<vmem>>, vector<8x32xf32>,
    %c0_179 = arith.constant 0 : index
    %c0_180 = arith.constant 0 : index
    %574 = vector.load %arg38[%c0_179, %c0_180] : memref<64x32xf32, #tpu.memory_space<vmem>>, vector<64x32xf32>
    %c0_181 = arith.constant 0 : index
    %c0_182 = arith.constant 0 : index
    %575 = vector.load %arg25[%c0_181, %c0_182] : memref<32x128xf32, #tpu.memory_space<vmem>>, vector<32x128xf32>
    %c0_183 = arith.constant 0 : index
    %c0_184 = arith.constant 0 : index
    %576 = vector.load %arg26[%c0_183, %c0_184] : memref<1x128xf32, #tpu.memory_space<vmem>>, vector<1x128xf32>
    %cst_185 = arith.constant dense<0.000000e+00> : vector<64x128xf32>
    %577 = tpu.matmul %574, %575, %cst_185 {dimension_numbers = #tpu.dot_dimension_numbers<[1], [0], [0], [1], [0, 0, 1, 1], [], []>} : vector<64x32xf32>, vector<32x128xf32>, vector<64x128xf32> -> vector<64x128xf32>
    %578 = vector.broadcast %576 : vector<1x128xf32> to vector<64x128xf32>
    %579 = arith.addf %577, %578 : vector<64x128xf32>
    %cst_186 = arith.constant 0.000000e+00 : f32
    %580 = vector.broadcast %cst_186 : f32 to vector<64x128xf32>
    %581 = arith.maximumf %579, %580 : vector<64x128xf32>
    %c0_187 = arith.constant 0 : index
    %c0_188 = arith.constant 0 : index
    %582 = vector.load %arg27[%c0_187, %c0_188] : memref<128x64xf32, #tpu.memory_space<vmem>>, vector<128x64xf32>
    %c0_189 = arith.constant 0 : index
    %c0_190 = arith.constant 0 : index
    %583 = vector.load %arg28[%c0_189, %c0_190] : memref<1x64xf32, #tpu.memory_space<vmem>>, vector<1x64xf32>
    %cst_191 = arith.constant dense<0.000000e+00> : vector<64x64xf32>
    %584 = tpu.matmul %581, %582, %cst_191 {dimension_numbers = #tpu.dot_dimension_numbers<[1], [0], [0], [1], [0, 0, 1, 1], [], []>} : vector<64x128xf32>, vector<128x64xf32>, vector<64x64xf32> -> vector<64x64xf32>
    %585 = vector.broadcast %583 : vector<1x64xf32> to vector<64x64xf32>
    %586 = arith.addf %584, %585 : vector<64x64xf32>
    %cst_192 = arith.constant 0.000000e+00 : f32
    %587 = vector.broadcast %cst_192 : f32 to vector<64x64xf32>
    %588 = arith.maximumf %586, %587 : vector<64x64xf32>
    %c0_193 = arith.constant 0 : index
    %c0_194 = arith.constant 0 : index
    %589 = vector.load %arg29[%c0_193, %c0_194] : memref<64x32xf32, #tpu.memory_space<vmem>>, vector<64x32xf32>
    %c0_195 = arith.constant 0 : index
    %c0_196 = arith.constant 0 : index
    %590 = vector.load %arg30[%c0_195, %c0_196] : memref<1x32xf32, #tpu.memory_space<vmem>>, vector<1x32xf32>
    %cst_197 = arith.constant dense<0.000000e+00> : vector<64x32xf32>
    %591 = tpu.matmul %588, %589, %cst_197 {dimension_numbers = #tpu.dot_dimension_numbers<[1], [0], [0], [1], [0, 0, 1, 1], [], []>} : vector<64x64xf32>, vector<64x32xf32>, vector<64x32xf32> -> vector<64x32xf32>
    %592 = vector.broadcast %590 : vector<1x32xf32> to vector<64x32xf32>
    %593 = arith.addf %591, %592 : vector<64x32xf32>
    %cst_198 = arith.constant 0.000000e+00 : f32
    %594 = vector.broadcast %cst_198 : f32 to vector<64x32xf32>
    %595 = arith.maximumf %593, %594 : vector<64x32xf32>
    %c0_199 = arith.constant 0 : index
    %c0_200 = arith.constant 0 : index
    %596 = vector.load %arg31[%c0_199, %c0_200] : memref<32x16xf32, #tpu.memory_space<vmem>>, vector<32x16xf32>
    %c0_201 = arith.constant 0 : index
    %c0_202 = arith.constant 0 : index
    %597 = vector.load %arg32[%c0_201, %c0_202] : memref<1x16xf32, #tpu.memory_space<vmem>>, vector<1x16xf32>
    %cst_203 = arith.constant dense<0.000000e+00> : vector<64x16xf32>
    %598 = tpu.matmul %595, %596, %cst_203 {dimension_numbers = #tpu.dot_dimension_numbers<[1], [0], [0], [1], [0, 0, 1, 1], [], []>} : vector<64x32xf32>, vector<32x16xf32>, vector<64x16xf32> -> vector<64x16xf32>
    %599 = vector.broadcast %597 : vector<1x16xf32> to vector<64x16xf32>
    %600 = arith.addf %598, %599 : vector<64x16xf32>
    %cst_204 = arith.constant 0.000000e+00 : f32
    %601 = vector.broadcast %cst_204 : f32 to vector<64x16xf32>
    %602 = arith.maximumf %600, %601 : vector<64x16xf32>
    %c0_205 = arith.constant 0 : index
    %c0_206 = arith.constant 0 : index
    %603 = vector.load %arg33[%c0_205, %c0_206] : memref<16x8xf32, #tpu.memory_space<vmem>>, vector<16x8xf32>
    %c0_207 = arith.constant 0 : index
    %c0_208 = arith.constant 0 : index
    %604 = vector.load %arg34[%c0_207, %c0_208] : memref<1x8xf32, #tpu.memory_space<vmem>>, vector<1x8xf32>
    %cst_209 = arith.constant dense<0.000000e+00> : vector<64x8xf32>
    %605 = tpu.matmul %602, %603, %cst_209 {dimension_numbers = #tpu.dot_dimension_numbers<[1], [0], [0], [1], [0, 0, 1, 1], [], []>} : vector<64x16xf32>, vector<16x8xf32>, vector<64x8xf32> -> vector<64x8xf32>
    %606 = vector.broadcast %604 : vector<1x8xf32> to vector<64x8xf32>
    %607 = arith.addf %605, %606 : vector<64x8xf32>
    %cst_210 = arith.constant 0.000000e+00 : f32
    %608 = vector.broadcast %cst_210 : f32 to vector<64x8xf32>
    %609 = arith.maximumf %607, %608 : vector<64x8xf32>
    %c0_211 = arith.constant 0 : index
    %c0_212 = arith.constant 0 : index
    %610 = vector.load %arg35[%c0_211, %c0_212] : memref<8x1xf32, #tpu.memory_space<vmem>>, vector<8x1xf32>
    %c0_213 = arith.constant 0 : index
    %c0_214 = arith.constant 0 : index
    %611 = vector.load %arg36[%c0_213, %c0_214] : memref<1x1xf32, #tpu.memory_space<vmem>>, vector<1x1xf32>
    %cst_215 = arith.constant dense<0.000000e+00> : vector<64x1xf32>
    %612 = tpu.matmul %609, %610, %cst_215 {dimension_numbers = #tpu.dot_dimension_numbers<[1], [0], [0], [1], [0, 0, 1, 1], [], []>} : vector<64x8xf32>, vector<8x1xf32>, vector<64x1xf32> -> vector<64x1xf32>
    %613 = vector.broadcast %611 : vector<1x1xf32> to vector<64x1xf32>
    %614 = arith.addf %612, %613 : vector<64x1xf32>
    %615 = arith.negf %614 : vector<64x1xf32>
    %616 = math.exp %615 : vector<64x1xf32>
    %cst_216 = arith.constant 1.000000e+00 : f32
    %617 = vector.broadcast %cst_216 : f32 to vector<64x1xf32>
    %618 = arith.addf %617, %616 : vector<64x1xf32>
    %619 = arith.divf %617, %618 : vector<64x1xf32>
    %c0_217 = arith.constant 0 : index
    %c0_218 = arith.constant 0 : index
    %620 = vector.load %arg37[%c0_217, %c0_218] : memref<64x1xf32, #tpu.memory_space<vmem>>, vector<64x1xf32>
    tpu.vector_store %arg37[%c0_217, %c0_218], %619 {strides = array<i32>} : memref<64x1xf32, #tpu.memory_space<vmem>>, vector<64x1xf32>,
    return
  }
}

</mosaic_0001>

<bundles_post_ra>
// kernel: path_cardinality_forward.1
= control target key start
LH: loop header
LB: loop body
LE: loop exit
PB: predicated region body
PF: predicated region fallthrough
CT: control target
= control target key end

     0   :  { %s3452_s3 = smov 4   ;;  %s3453_s7 = smov 1   ;;  %vm170_vm0 = vcmask 130048   ;;  %v3460_v13 = vmov 0.0   ;;  %vm348_vm9 = vcmask 261120   ;;  %s4532_s0 = inlined_call_operand.smem [shape: u32[38], index: -1, kind: input, shape index: {}] }
   0x1   :  { %s2974_s6 = sld [smem:[%s4532_s0 + %s3452_s3]]   ;;  %s3454_s14 = smov 2  }
   0x2   :  { %s2971_s10 = sld [smem:[%s4532_s0 + %s3453_s7]]   ;;  %s3455_s18 = smov 5  }
   0x3   :  { %s3504_s13 = sld [smem:[%s4532_s0]]   ;;  %s3456_s22 = smov 3  }
   0x4   :  { %s2972_s17 = sld [smem:[%s4532_s0 + %s3454_s14]]   ;;  %s3457_s26 = smov 7  }
   0x5   :  { %s3512_s21 = sld [smem:[%s4532_s0 + %s3455_s18]]   ;;  %s3458_s30 = smov 6  }
   0x6   :  { %s2973_s25 = sld [smem:[%s4532_s0 + %s3456_s22]]   ;;  %s3459_s4 = smov 10  }
   0x7   :  { %v3514_v0 = vld [vmem:[%s2974_s6 + $0x18] sm:$0xff]  ;;  %v3516_v1 = vld [vmem:[%s2974_s6 + $0x10] sm:$0xff]  ;;  %s3525_s29 = sld [smem:[%s4532_s0 + %s3457_s26]]   ;;  %v3527_v4 = vld [vmem:[%s2974_s6 + $0x8] sm:$0xff]  ;;  %s3462_s12 = smov 11  }
   0x8   :  { %364 = vmatpush.msra.mxu3 %v3514_v0  ;;  %v165_v2 = vld [vmem:[%s2971_s10 + $0x8] sm:$0xff]  ;;  %v164_v3 = vld [vmem:[%s2971_s10] sm:$0xff]  ;;  %s3535_s3 = sld [smem:[%s4532_s0 + %s3458_s30]]   ;;  %s3466_s28 = smov 19  }
   0x9   :  { %3178 = vmatpush.msra.mxu1 %v165_v2  ;;  %v3530_v5 = vld [vmem:[%s3504_s13 + $0x30] sm:$0xff]  ;;  %209 = vmatpush.msra.mxu0 %v165_v2  ;;  %v156_v7 = vld [vmem:[%s3504_s13] sm:$0xff]  ;;  %s3544_s8 = sld [smem:[%s4532_s0 + %s3459_s4]]   ;;  %v3560_v15 = vld [vmem:[%s3504_s13 + $0x38] sm:$0xff]  ;;  %s3469_s14 = smov 15  }
   0xa   :  { %365 = vmatpush.msra.mxu3 %v3516_v1  ;;  %v237_v6 = vld [vmem:[%s2972_s17 + $0x8] sm:$0xff]  ;;  %v3539_v8 = vld [vmem:[%s2974_s6] sm:$0xff]  ;;  %s3461_s6 = smov 8   ;;  %s3591_s16 = sld [smem:[%s4532_s0 + %s3462_s12]]  }
   0xb   :  { %3179 = vmatpush.msra.mxu1 %v164_v3  ;;  %210 = vmatpush.msra.mxu0 %v164_v3  ;;  %v236_v9 = vld [vmem:[%s2972_s17] sm:$0xff]  ;;  %v3550_v10 = vld [vmem:[%s3512_s21 + $0x18] sm:$0xff]  ;;  %v3556_v14 = vld [vmem:[%s3512_s21 + $0x10] sm:$0xff]  ;;  %s3578_s11 = sld [smem:[%s4532_s0 + %s3461_s6]]   ;;  %s3463_s17 = smov 12  }
   0xc   :  { %366 = vmatpush.msra.mxu3 %v3527_v4  ;;  %3014 = vmatmul.msk.f32.vlgmr.msra.gmra.mxu1 %vm170_vm0, %v3530_v5  ;;  %v284_v11 = vld [vmem:[%s2973_s25 + $0x8] sm:$0xff]  ;;  %v283_v12 = vld [vmem:[%s2973_s25] sm:$0xff]  ;;  %s3635_s20 = sld [smem:[%s4532_s0 + %s3463_s17]]   ;;  %s3468_s6 = smov 14  }
   0xd   :  { %256 = vmatpush.msrb.mxu1 %v237_v6  ;;  %3008 = vmatmul.msk.f32.vlgmr.msra.gmra.mxu0 %vm170_vm0, %v156_v7  ;;  %v3563_v16 = vld [vmem:[%s3512_s21 + $0x8] sm:$0xff]  ;;  %v3573_v18 = vld [vmem:[%s3512_s21] sm:$0xff]  ;;  %s3464_s21 = smov 9   ;;  %s3872_s2 = sld [smem:[%s4532_s0 + %s3466_s28]]  }
   0xe   :  { %367 = vmatpush.msra.mxu3 %v3539_v8  ;;  %303 = vmatpush.msra.mxu2 %v284_v11  ;;  %v3566_v17 = vld [vmem:[%s3535_s3 + $0x18] sm:$0xff]  ;;  %v3586_v19 = vld [vmem:[%s3535_s3 + $0x10] sm:$0xff]  ;;  %v3597_v20 = vld [vmem:[%s3535_s3 + $0x8] sm:$0xff]  ;;  %s3641_s24 = sld [smem:[%s4532_s0 + %s3464_s21]]   ;;  %s3470_s19 = smov 18  }
   0xf   :  { %368 = vmatmul.f32.vlgmr.msra.gmra.mxu3 %v3460_v13  ;;  %257 = vmatpush.msrb.mxu1 %v236_v9  ;;  %v3604_v21 = vld [vmem:[%s3535_s3] sm:$0xff]  ;;  %v157_v42 = vld [vmem:[%s3504_s13 + $0x8] sm:$0xff]  ;;  %s3467_s3 = smov 16   ;;  %s2984_s12 = sld [smem:[%s4532_s0 + %s3468_s6]]  }
  0x10   :  { %387 = vmatpush.msrb.mxu3 %v3550_v10  ;;  %304 = vmatpush.msra.mxu2 %v283_v12  ;;  %v3648_v24 = vld [vmem:[%s3525_s29] ss:$0 sm:$0xff]  ;;  %s3915_s7 = sld [smem:[%s4532_s0 + %s3467_s3]]   ;;  %s3471_s23 = smov 17  }
  0x11   :  { %3024 = vmatmul.msk.f32.vlgmr.msra.gmra.mxu2 %vm170_vm0, %v156_v7  ;;  %703 = vmatpush.msra.mxu1 %v3514_v0  ;;  %v3651_v25 = vld [vmem:[%s3544_s8] ss:$0 sm:$0xff]  ;;  %s2985_s18 = sld [smem:[%s4532_s0 + %s3469_s14]]   ;;  %s3472_s26 = smov 20  }
  0x12   :  { %388 = vmatpush.msrb.mxu3 %v3556_v14  ;;  %632 = vmatpush.msrb.mxu2 %v3566_v17  ;;  %v3658_v31 = vld [vmem:[%s3578_s11] ss:$0 sm:$0xff]  ;;  %s3963_s25 = sld [smem:[%s4532_s0 + %s3471_s23]]   ;;  %s3473_s1 = smov 21  }
  0x13   :  { %704 = vmatpush.msra.mxu1 %v3516_v1  ;;  %814 = vmatpush.msrb.mxu0 %v3514_v0  ;;  %v3661_v33 = vld [vmem:[%s3591_s16] ss:$0 sm:$0xff]  ;;  %s3978_s30 = sld [smem:[%s4532_s0 + %s3472_s26]]   ;;  %s3474_s6 = smov 22  }
  0x14   :  { %389 = vmatpush.msrb.mxu3 %v3563_v16  ;;  %3015 = vmatmul.msk.f32.gmra.mxu1 %vm170_vm0, %v3560_v15  ;;  %v3670_v47 = vld [vmem:[%s3635_s20] ss:$0 sm:$0xff]  ;;  %s4013_s5 = sld [smem:[%s4532_s0 + %s3473_s1]]   ;;  %s3475_s14 = smov 23  }
  0x15   :  { %633 = vmatpush.msrb.mxu2 %v3586_v19  ;;  %705 = vmatpush.msra.mxu1 %v3527_v4  ;;  %v3673_v53 = vld [vmem:[%s3641_s24] ss:$0 sm:$0xff]  ;;  %s3481_s4 = smov 29   ;;  %s3482_s10 = smov 30  }
  0x16   :  { %390 = vmatpush.msrb.mxu3 %v3573_v18  ;;  %815 = vmatpush.msrb.mxu0 %v3516_v1  ;;  %s4399_s9 = sld [smem:[%s4532_s0 + %s3481_s4]]   ;;  %s3483_s17 = smov 31  }
  0x17   :  { %391 = vmatmul.f32.vlgmr.msrb.gmra.mxu3 %v3460_v13  ;;  %634 = vmatpush.msrb.mxu2 %v3597_v20  ;;  %s4428_s15 = sld [smem:[%s4532_s0 + %s3482_s10]]   ;;  %s3484_s22 = smov 32  }
  0x18   :  { %410 = vmatpush.msra.mxu3 %v3566_v17  ;;  %706 = vmatpush.msra.mxu1 %v3539_v8  ;;  %s3001_s21 = sld [smem:[%s4532_s0 + %s3483_s17]]   ;;  %s3488_s1 = smov 36  }
  0x19   :  { %635 = vmatpush.msrb.mxu2 %v3604_v21  ;;  %816 = vmatpush.msrb.mxu0 %v3527_v4 }
  0x1a   :  { %411 = vmatpush.msra.mxu3 %v3586_v19  ;;  %3009 = vmatmul.msk.f32.gmra.mxu0 %vm170_vm0, %v157_v42 }
  0x1b   :  { %723 = vmatpush.msra.mxu2 %v3550_v10  ;;  %817 = vmatpush.msrb.mxu0 %v3539_v8 }
  0x1c   :  { %3016 = vmatmul.msk.f32.vlgmr.msrb.gmra.mxu1 %vm170_vm0, %v156_v7  ;;  %412 = vmatpush.msra.mxu3 %v3597_v20 }
  0x1d   :  { %724 = vmatpush.msra.mxu2 %v3556_v14  ;;  %834 = vmatpush.msrb.mxu1 %v3550_v10 }
  0x1e   :  { %413 = vmatpush.msra.mxu3 %v3604_v21  ;;  %945 = vmatpush.msra.mxu0 %v3550_v10 }
  0x1f   :  { %414 = vmatmul.f32.vlgmr.msra.gmra.mxu3 %v3460_v13  ;;  %725 = vmatpush.msra.mxu2 %v3563_v16 }
  0x20   :  { %481 = vmatpush.msrb.mxu3 %v3514_v0  ;;  %835 = vmatpush.msrb.mxu1 %v3556_v14 }
  0x21   :  { %726 = vmatpush.msra.mxu2 %v3573_v18  ;;  %946 = vmatpush.msra.mxu0 %v3556_v14 }
  0x22   :  { %482 = vmatpush.msrb.mxu3 %v3516_v1  ;;  %836 = vmatpush.msrb.mxu1 %v3563_v16 }
  0x23   :  { %947 = vmatpush.msra.mxu0 %v3563_v16  ;;  %3025 = vmatmul.msk.f32.gmra.mxu2 %vm170_vm0, %v157_v42 }
  0x24   :  { %483 = vmatpush.msrb.mxu3 %v3527_v4  ;;  %837 = vmatpush.msrb.mxu1 %v3573_v18 }
  0x25   :  { %948 = vmatpush.msra.mxu0 %v3573_v18  ;;  %3017 = vmatmul.msk.f32.gmra.mxu1 %vm170_vm0, %v157_v42 }
  0x26   :  { %484 = vmatpush.msrb.mxu3 %v3539_v8 }
  0x28   :  { %501 = vmatpush.msra.mxu3 %v3550_v10 }
  0x2a   :  { %502 = vmatpush.msra.mxu3 %v3556_v14 }
  0x2c   :  { %503 = vmatpush.msra.mxu3 %v3563_v16 }
  0x2e   :  { %504 = vmatpush.msra.mxu3 %v3573_v18 }
  0x89   :  { %v3645_v22 = vpop.f32.mrf.mxu1 }
  0x8a   :  { %v212_v23 = vpop.f32.mrf.mxu0 }
  0x8b   :  { %v213_v26 = vadd.f32 %v3648_v24, %v212_v23 }
  0x91   :  { %v3654_v27 = vpop.f32.mrf.mxu1 }
  0x92   :  { %v369_v28 = vpop.f32.mrf.mxu3 }
  0x93   :  { %v370_v29 = vadd.f32 %v3651_v25, %v369_v28 }
  0x94   :  { %v306_v54 = vpop.f32.mrf.mxu2 }
  0x95   :  { %v418_v30 = vadd.f32 %v370_v29, %v213_v26  ;;  %v307_v61 = vadd.f32 %v3673_v53, %v306_v54 }
  0x97   :  { %v3032_v32 = vmul.f32 -1.442695, %v418_v30 }
  0x99   :  { %3240 = vpow2.f32 %v3032_v32  ;;  %v259_v34 = vpop.f32.mrf.mxu1 }
  0x9a   :  { %v260_v35 = vadd.f32 %v3658_v31, %v259_v34  ;;  %v392_v36 = vpop.f32.mrf.mxu3 }
  0x9b   :  { %v393_v37 = vadd.f32 %v3661_v33, %v392_v36  ;;  %v159_v36 = vld [vmem:[%s3504_s13 + $0x18] sm:$0xff] }
  0x9d   :  { %v438_v38 = vadd.f32 %v393_v37, %v260_v35  ;;  %v158_v35 = vld [vmem:[%s3504_s13 + $0x10] sm:$0xff]  ;;  %v160_v37 = vld [vmem:[%s3504_s13 + $0x20] sm:$0xff] }
  0x9e   :  { %3026 = vmatmul.msk.f32.gmra.mxu2 %vm170_vm0, %v158_v35  ;;  %3010 = vmatmul.msk.f32.gmra.mxu0 %vm170_vm0, %v158_v35 }
  0x9f   :  { %v3241_v39 = vpop.eup %3240  ;;  %v3033_v40 = vmul.f32 -1.442695, %v438_v38  ;;  %3018 = vmatmul.msk.f32.gmra.mxu1 %vm170_vm0, %v158_v35  ;;  %v161_v38 = vld [vmem:[%s3504_s13 + $0x28] sm:$0xff]  ;;  %s3465_s13 = smov 13  }
  0xa0   :  { %v422_v41 = vadd.f32 1.0, %v3241_v39  ;;  %v215_v39 = vpop.f32.mrf.mxu0  ;;  %s2983_s27 = sld [smem:[%s4532_s0 + %s3465_s13]]  }
  0xa1   :  { %3242 = vpow2.f32 %v3033_v40  ;;  %v216_v40 = vadd.f32 %v3648_v24, %v215_v39 }
  0xa2   :  { %3244 = vrcp.f32 %v422_v41  ;;  %v415_v49 = vpop.f32.mrf.mxu3  ;;  %v434_v50 = vand.u32 2147483648, %v422_v41  ;;  %v432_v52 = vand.u32 2147483647, %v422_v41  ;;  %vm428_vm2 = vweird.f32 %v422_v41 }
  0xa3   :  { %v416_v55 = vadd.f32 %v3670_v47, %v415_v49 }
  0xa4   :  { %v435_v58 = vor.u32 1.1754944e-38, %v434_v50  ;;  %vm433_vm4 = vcmp.eq.f32.partialorder %v432_v52, 8.507059e+37 }
  0xa6   :  { %3027 = vmatmul.msk.f32.gmra.mxu2 %vm170_vm0, %v159_v36  ;;  %3011 = vmatmul.msk.f32.gmra.mxu0 %vm170_vm0, %v159_v36 }
  0xa7   :  { %v3243_v43 = vpop.eup %3242  ;;  %3019 = vmatmul.msk.f32.gmra.mxu1 %vm170_vm0, %v159_v36 }
  0xa8   :  { %v3245_v44 = vpop.eup %3244  ;;  %v442_v45 = vadd.f32 1.0, %v3243_v43 }
  0xa9   :  { %v424_v46 = vmul.f32 %v3245_v44, %v422_v41  ;;  %vm429_vm1 = vweird.f32 %v3245_v44 }
  0xaa   :  { %3246 = vrcp.f32 %v442_v45  ;;  %vm430_vm3 = vmor %vm428_vm2, %vm429_vm1  ;;  %v454_v3 = vand.u32 2147483648, %v442_v45  ;;  %v452_v7 = vand.u32 2147483647, %v442_v45  ;;  %vm448_vm6 = vweird.f32 %v442_v45 }
  0xab   :  { %v425_v48 = vsub.f32 1.0, %v424_v46 }
  0xac   :  { %v455_v12 = vor.u32 1.1754944e-38, %v454_v3  ;;  %vm453_vm8 = vcmp.eq.f32.partialorder %v452_v7, 8.507059e+37 }
  0xad   :  { %v426_v51 = vmul.f32 %v3245_v44, %v425_v48 }
  0xae   :  { %3028 = vmatmul.msk.f32.gmra.mxu2 %vm170_vm0, %v160_v37  ;;  %3012 = vmatmul.msk.f32.gmra.mxu0 %vm170_vm0, %v160_v37 }
  0xaf   :  { %v427_v56 = vadd.f32 %v3245_v44, %v426_v51  ;;  %3020 = vmatmul.msk.f32.gmra.mxu1 %vm170_vm0, %v160_v37 }
  0xb0   :  { %v3247_v57 = vpop.eup %3246 }
  0xb1   :  { %v444_v59 = vmul.f32 %v3247_v57, %v442_v45  ;;  %v431_v60 = vsel %vm430_vm3, %v3245_v44, %v427_v56  ;;  %vm449_vm5 = vweird.f32 %v3247_v57  ;;  %v262_v44 = vpop.f32.mrf.mxu1 }
  0xb2   :  { %v436_v62 = vsel %vm433_vm4, %v435_v58, %v431_v60  ;;  %vm450_vm7 = vmor %vm448_vm6, %vm449_vm5  ;;  %v263_v46 = vadd.f32 %v3658_v31, %v262_v44 }
  0xb3   :  { %v445_v63 = vsub.f32 1.0, %v444_v59  ;;  %v458_v2 = vmul.f32 %v436_v62, %v416_v55  ;;  %v309_v62 = vpop.f32.mrf.mxu2 }
  0xb5   :  { %v446_v6 = vmul.f32 %v3247_v57, %v445_v63  ;;  %v459_v9 = vadd.f32 %v458_v2, %v307_v61 }
  0xb6   :  { %3029 = vmatmul.msk.f32.gmra.mxu2 %vm170_vm0, %v161_v38  ;;  %3013 = vmatmul.msk.f32.gmra.mxu0 %vm170_vm0, %v161_v38 }
  0xb7   :  { %v447_v11 = vadd.f32 %v3247_v57, %v446_v6  ;;  %3248 = vtanh.f32 %v459_v9  ;;  %3021 = vmatmul.msk.f32.gmra.mxu1 %vm170_vm0, %v161_v38  ;;  %v310_v6 = vadd.f32 %v3673_v53, %v309_v62 }
  0xb9   :  { %v451_v23 = vsel %vm450_vm7, %v3247_v57, %v447_v11 }
  0xba   :  { %v456_v26 = vsel %vm453_vm8, %v455_v12, %v451_v23 }
  0xbb   :  { %v461_v28 = vsub.f32 1.0, %v456_v26  ;;  %v463_v32 = vmul.f32 0.0, %v456_v26 }
  0xbd   :  { %v3249_v29 = vpop.eup %3248 }
  0xbe   :  { %v462_v30 = vmul.f32 %v3249_v29, %v461_v28  ;;  %3030 = vmatmul.msk.f32.gmra.mxu2 %vm170_vm0, %v3530_v5 }
  0xbf   :  { %3022 = vmatmul.msk.f32.gmra.mxu1 %vm170_vm0, %v3530_v5 }
  0xc0   :  { %v3677_v34 = vadd.f32 %v463_v32, %v462_v30 }
  0xc2   :  { %465 = vst.msk [vmem:[#allocation2] sm:$0xff] %vm348_vm9, %v3677_v34  ;;  %3034 = vmatmul.msk.f32.vlgmr.msrb.gmra.mxu3 %vm348_vm9, %v3677_v34 }
  0xc3   :  { %521 = vmatpush.msrb.mxu3 %v3566_v17 }
  0xc5   :  { %522 = vmatpush.msrb.mxu3 %v3586_v19 }
  0xc6   :  { %3031 = vmatmul.msk.f32.gmra.mxu2 %vm170_vm0, %v3560_v15 }
  0xc7   :  { %523 = vmatpush.msrb.mxu3 %v3597_v20  ;;  %3023 = vmatmul.msk.f32.gmra.mxu1 %vm170_vm0, %v3560_v15 }
  0xc9   :  { %524 = vmatpush.msrb.mxu3 %v3604_v21 }
  0xca   :  { %3035 = vmatmul.msk.f32.vlgmr.msra.gmra.mxu3 %vm348_vm9, %v3677_v34 }
  0xcb   :  { %592 = vmatpush.msra.mxu3 %v3514_v0 }
  0xcd   :  { %593 = vmatpush.msra.mxu3 %v3516_v1 }
  0xcf   :  { %594 = vmatpush.msra.mxu3 %v3527_v4 }
  0xd1   :  { %595 = vmatpush.msra.mxu3 %v3539_v8 }
  0xd2   :  { %3036 = vmatmul.msk.f32.vlgmr.msrb.gmra.mxu3 %vm348_vm9, %v3677_v34 }
  0xd3   :  { %612 = vmatpush.msrb.mxu3 %v3550_v10 }
  0xd5   :  { %613 = vmatpush.msrb.mxu3 %v3556_v14 }
  0xd7   :  { %614 = vmatpush.msrb.mxu3 %v3563_v16 }
  0xd9   :  { %615 = vmatpush.msrb.mxu3 %v3573_v18 }
 0x145   :  { %v486_v41 = vpop.f32.mrf.mxu3 }
 0x146   :  { %v487_v42 = vadd.f32 %v3651_v25, %v486_v41 }
 0x148   :  { %v529_v43 = vadd.f32 %v487_v42, %v216_v40 }
 0x14a   :  { %v3037_v45 = vmul.f32 -1.442695, %v529_v43 }
 0x14c   :  { %3250 = vpow2.f32 %v3037_v45 }
 0x14d   :  { %v506_v48 = vpop.f32.mrf.mxu3 }
 0x14e   :  { %v507_v49 = vadd.f32 %v3661_v33, %v506_v48 }
 0x150   :  { %v549_v50 = vadd.f32 %v507_v49, %v263_v46  ;;  %v218_v46 = vpop.f32.mrf.mxu0 }
 0x151   :  { %v219_v49 = vadd.f32 %v3648_v24, %v218_v46 }
 0x152   :  { %v3251_v51 = vpop.eup %3250  ;;  %v3038_v5 = vmul.f32 -1.442695, %v549_v50 }
 0x153   :  { %v533_v52 = vadd.f32 1.0, %v3251_v51 }
 0x154   :  { %3252 = vpow2.f32 %v3038_v5 }
 0x155   :  { %3254 = vrcp.f32 %v533_v52  ;;  %v545_v59 = vand.u32 2147483648, %v533_v52  ;;  %v543_v61 = vand.u32 2147483647, %v533_v52  ;;  %v526_v15 = vpop.f32.mrf.mxu3  ;;  %vm539_vm11 = vweird.f32 %v533_v52 }
 0x156   :  { %v527_v9 = vadd.f32 %v3670_v47, %v526_v15 }
 0x157   :  { %v546_v3 = vor.u32 1.1754944e-38, %v545_v59  ;;  %vm544_vm13 = vcmp.eq.f32.partialorder %v543_v61, 8.507059e+37 }
 0x15a   :  { %v3253_v54 = vpop.eup %3252 }
 0x15b   :  { %v3255_v55 = vpop.eup %3254  ;;  %v553_v56 = vadd.f32 1.0, %v3253_v54 }
 0x15c   :  { %v535_v57 = vmul.f32 %v3255_v55, %v533_v52  ;;  %vm540_vm10 = vweird.f32 %v3255_v55  ;;  %v265_v52 = vpop.f32.mrf.mxu1 }
 0x15d   :  { %3256 = vrcp.f32 %v553_v56  ;;  %vm541_vm12 = vmor %vm539_vm11, %vm540_vm10  ;;  %v565_v28 = vand.u32 2147483648, %v553_v56  ;;  %v563_v30 = vand.u32 2147483647, %v553_v56  ;;  %vm559_vm15 = vweird.f32 %v553_v56 }
 0x15e   :  { %v536_v58 = vsub.f32 1.0, %v535_v57 }
 0x15f   :  { %v566_v36 = vor.u32 1.1754944e-38, %v565_v28  ;;  %vm564_vm2 = vcmp.eq.f32.partialorder %v563_v30, 8.507059e+37 }
 0x160   :  { %v537_v60 = vmul.f32 %v3255_v55, %v536_v58 }
 0x162   :  { %v538_v63 = vadd.f32 %v3255_v55, %v537_v60 }
 0x163   :  { %v3257_v2 = vpop.eup %3256 }
 0x164   :  { %v555_v7 = vmul.f32 %v3257_v2, %v553_v56  ;;  %v542_v11 = vsel %vm541_vm12, %v3255_v55, %v538_v63  ;;  %vm560_vm14 = vweird.f32 %v3257_v2  ;;  %v266_v55 = vadd.f32 %v3658_v31, %v265_v52 }
 0x165   :  { %v547_v12 = vsel %vm544_vm13, %v546_v3, %v542_v11  ;;  %vm561_vm1 = vmor %vm559_vm15, %vm560_vm14 }
 0x166   :  { %v556_v23 = vsub.f32 1.0, %v555_v7  ;;  %v569_v26 = vmul.f32 %v547_v12, %v527_v9 }
 0x168   :  { %v557_v29 = vmul.f32 %v3257_v2, %v556_v23  ;;  %v570_v32 = vadd.f32 %v569_v26, %v310_v6 }
 0x16a   :  { %v558_v35 = vadd.f32 %v3257_v2, %v557_v29  ;;  %3258 = vtanh.f32 %v570_v32 }
 0x16c   :  { %v562_v37 = vsel %vm561_vm1, %v3257_v2, %v558_v35 }
 0x16d   :  { %v567_v38 = vsel %vm564_vm2, %v566_v36, %v562_v37 }
 0x16e   :  { %v572_v39 = vsub.f32 1.0, %v567_v38  ;;  %v574_v42 = vmul.f32 %v567_v38, %v3677_v34  ;;  %v312_v34 = vpop.f32.mrf.mxu2 }
 0x16f   :  { %v313_v37 = vadd.f32 %v3673_v53, %v312_v34 }
 0x170   :  { %v3259_v40 = vpop.eup %3258 }
 0x171   :  { %v573_v41 = vmul.f32 %v3259_v40, %v572_v39 }
 0x173   :  { %v3730_v43 = vadd.f32 %v574_v42, %v573_v41 }
 0x175   :  { %576 = vst.msk [vmem:[#allocation2 + $0x8] sm:$0xff] %vm348_vm9, %v3730_v43  ;;  %3039 = vmatmul.msk.f32.vlgmr.msra.gmra.mxu3 %vm348_vm9, %v3730_v43  ;;  %3041 = vmatmul.msk.f32.vlgmr.msrb.gmra.mxu2 %vm348_vm9, %v3730_v43 }
 0x176   :  { %743 = vmatpush.msra.mxu3 %v3566_v17  ;;  %854 = vmatpush.msrb.mxu2 %v3566_v17  ;;  %v3752_v44 = vpop.f32.mrf.mxu2 }
 0x178   :  { %744 = vmatpush.msra.mxu3 %v3586_v19  ;;  %855 = vmatpush.msrb.mxu2 %v3586_v19 }
 0x17a   :  { %745 = vmatpush.msra.mxu3 %v3597_v20  ;;  %856 = vmatpush.msrb.mxu2 %v3597_v20 }
 0x17c   :  { %746 = vmatpush.msra.mxu3 %v3604_v21  ;;  %857 = vmatpush.msrb.mxu2 %v3604_v21 }
 0x17d   :  { %3040 = vmatmul.msk.f32.vlgmr.msrb.gmra.mxu3 %vm348_vm9, %v3730_v43 }
 0x17e   :  { %925 = vmatpush.msrb.mxu3 %v3514_v0  ;;  %v3754_v45 = vpop.f32.mrf.mxu2 }
 0x180   :  { %926 = vmatpush.msrb.mxu3 %v3516_v1 }
 0x182   :  { %927 = vmatpush.msrb.mxu3 %v3527_v4 }
 0x184   :  { %928 = vmatpush.msrb.mxu3 %v3539_v8 }
 0x186   :  { %v3756_v48 = vpop.f32.mrf.mxu2 }
 0x18e   :  { %v3761_v56 = vpop.f32.mrf.mxu2 }
 0x196   :  { %v3764_v15 = vpop.f32.mrf.mxu2 }
 0x1f8   :  { %v597_v50 = vpop.f32.mrf.mxu3  ;;  %v637_v23 = vpop.f32.mrf.mxu2 }
 0x1f9   :  { %v598_v51 = vadd.f32 %v3651_v25, %v597_v50  ;;  %v638_v30 = vadd.f32 %v3670_v47, %v637_v23 }
 0x1fb   :  { %v640_v5 = vadd.f32 %v598_v51, %v219_v49 }
 0x1fd   :  { %v3042_v54 = vmul.f32 -1.442695, %v640_v5 }
 0x1ff   :  { %3260 = vpow2.f32 %v3042_v54 }
 0x200   :  { %v617_v57 = vpop.f32.mrf.mxu3 }
 0x201   :  { %v618_v58 = vadd.f32 %v3661_v33, %v617_v57 }
 0x203   :  { %v660_v59 = vadd.f32 %v618_v58, %v266_v55 }
 0x205   :  { %v3261_v60 = vpop.eup %3260  ;;  %v3043_v61 = vmul.f32 -1.442695, %v660_v59 }
 0x206   :  { %v644_v62 = vadd.f32 1.0, %v3261_v60 }
 0x207   :  { %3262 = vpow2.f32 %v3043_v61 }
 0x208   :  { %3264 = vrcp.f32 %v644_v62  ;;  %v656_v9 = vand.u32 2147483648, %v644_v62  ;;  %v654_v12 = vand.u32 2147483647, %v644_v62  ;;  %vm650_vm4 = vweird.f32 %v644_v62 }
 0x20a   :  { %v657_v29 = vor.u32 1.1754944e-38, %v656_v9  ;;  %vm655_vm6 = vcmp.eq.f32.partialorder %v654_v12, 8.507059e+37 }
 0x20d   :  { %v3263_v63 = vpop.eup %3262 }
 0x20e   :  { %v3265_v2 = vpop.eup %3264  ;;  %v664_v3 = vadd.f32 1.0, %v3263_v63 }
 0x20f   :  { %v646_v6 = vmul.f32 %v3265_v2, %v644_v62  ;;  %vm651_vm3 = vweird.f32 %v3265_v2  ;;  %v221_v62 = vpop.f32.mrf.mxu0 }
 0x210   :  { %3266 = vrcp.f32 %v664_v3  ;;  %vm652_vm5 = vmor %vm650_vm4, %vm651_vm3  ;;  %v676_v40 = vand.u32 2147483648, %v664_v3  ;;  %v674_v46 = vand.u32 2147483647, %v664_v3  ;;  %vm670_vm8 = vweird.f32 %v664_v3 }
 0x211   :  { %v647_v7 = vsub.f32 1.0, %v646_v6  ;;  %v222_v63 = vadd.f32 %v3648_v24, %v221_v62 }
 0x212   :  { %v677_v50 = vor.u32 1.1754944e-38, %v676_v40  ;;  %vm675_vm11 = vcmp.eq.f32.partialorder %v674_v46, 8.507059e+37 }
 0x213   :  { %v648_v11 = vmul.f32 %v3265_v2, %v647_v7 }
 0x215   :  { %v649_v26 = vadd.f32 %v3265_v2, %v648_v11 }
 0x216   :  { %v3267_v28 = vpop.eup %3266 }
 0x217   :  { %v653_v32 = vsel %vm652_vm5, %v3265_v2, %v649_v26  ;;  %v666_v35 = vmul.f32 %v3267_v28, %v664_v3  ;;  %vm671_vm7 = vweird.f32 %v3267_v28 }
 0x218   :  { %v658_v36 = vsel %vm655_vm6, %v657_v29, %v653_v32  ;;  %vm672_vm10 = vmor %vm670_vm8, %vm671_vm7 }
 0x219   :  { %v680_v38 = vmul.f32 %v658_v36, %v638_v30  ;;  %v667_v39 = vsub.f32 1.0, %v666_v35 }
 0x21b   :  { %v681_v41 = vadd.f32 %v680_v38, %v313_v37  ;;  %v668_v42 = vmul.f32 %v3267_v28, %v667_v39 }
 0x21d   :  { %3268 = vtanh.f32 %v681_v41  ;;  %v669_v49 = vadd.f32 %v3267_v28, %v668_v42 }
 0x21f   :  { %v673_v51 = vsel %vm672_vm10, %v3267_v28, %v669_v49 }
 0x220   :  { %v678_v5 = vsel %vm675_vm11, %v677_v50, %v673_v51 }
 0x221   :  { %v683_v52 = vsub.f32 1.0, %v678_v5  ;;  %v685_v34 = vmul.f32 %v678_v5, %v3730_v43  ;;  %v268_v43 = vpop.f32.mrf.mxu1 }
 0x222   :  { %v269_v11 = vadd.f32 %v3658_v31, %v268_v43 }
 0x223   :  { %v3269_v54 = vpop.eup %3268 }
 0x224   :  { %v684_v55 = vmul.f32 %v3269_v54, %v683_v52  ;;  %v316_v54 = vadd.f32 %v3673_v53, %v3752_v44 }
 0x226   :  { %v3769_v57 = vadd.f32 %v685_v34, %v684_v55 }
 0x228   :  { %687 = vst.msk [vmem:[#allocation2 + $0x10] sm:$0xff] %vm348_vm9, %v3769_v57  ;;  %3044 = vmatmul.msk.f32.vlgmr.msra.gmra.mxu1 %vm348_vm9, %v3769_v57  ;;  %3045 = vmatmul.msk.f32.vlgmr.msra.gmra.mxu2 %vm348_vm9, %v3769_v57 }
 0x229   :  { %3046 = vmatmul.msk.f32.vlgmr.msra.gmra.mxu3 %vm348_vm9, %v3769_v57  ;;  %965 = vmatpush.msra.mxu1 %v3566_v17  ;;  %v3791_v58 = vpop.f32.mrf.mxu1 }
 0x22a   :  { %1036 = vmatpush.msra.mxu2 %v3514_v0  ;;  %1056 = vmatpush.msra.mxu3 %v3550_v10 }
 0x22b   :  { %966 = vmatpush.msra.mxu1 %v3586_v19 }
 0x22c   :  { %1037 = vmatpush.msra.mxu2 %v3516_v1  ;;  %1057 = vmatpush.msra.mxu3 %v3556_v14 }
 0x22d   :  { %967 = vmatpush.msra.mxu1 %v3597_v20 }
 0x22e   :  { %1038 = vmatpush.msra.mxu2 %v3527_v4  ;;  %1058 = vmatpush.msra.mxu3 %v3563_v16 }
 0x22f   :  { %968 = vmatpush.msra.mxu1 %v3604_v21 }
 0x230   :  { %1039 = vmatpush.msra.mxu2 %v3539_v8  ;;  %1059 = vmatpush.msra.mxu3 %v3573_v18 }
 0x231   :  { %v3793_v59 = vpop.f32.mrf.mxu1 }
 0x239   :  { %v3795_v60 = vpop.f32.mrf.mxu1 }
 0x241   :  { %v3797_v61 = vpop.f32.mrf.mxu1 }
 0x2a5   :  { %v708_v2 = vpop.f32.mrf.mxu1 }
 0x2a6   :  { %v709_v3 = vadd.f32 %v3651_v25, %v708_v2 }
 0x2a8   :  { %v751_v6 = vadd.f32 %v709_v3, %v222_v63 }
 0x2aa   :  { %v3047_v7 = vmul.f32 -1.442695, %v751_v6 }
 0x2ab   :  { %v728_v9 = vpop.f32.mrf.mxu2 }
 0x2ac   :  { %3270 = vpow2.f32 %v3047_v7  ;;  %v729_v12 = vadd.f32 %v3661_v33, %v728_v9  ;;  %v748_v42 = vpop.f32.mrf.mxu3 }
 0x2ad   :  { %v749_v5 = vadd.f32 %v3670_v47, %v748_v42 }
 0x2ae   :  { %v771_v23 = vadd.f32 %v729_v12, %v269_v11 }
 0x2b0   :  { %v3048_v26 = vmul.f32 -1.442695, %v771_v23 }
 0x2b2   :  { %v3271_v28 = vpop.eup %3270  ;;  %3272 = vpow2.f32 %v3048_v26 }
 0x2b3   :  { %v755_v29 = vadd.f32 1.0, %v3271_v28 }
 0x2b5   :  { %3274 = vrcp.f32 %v755_v29  ;;  %v767_v38 = vand.u32 2147483648, %v755_v29  ;;  %v765_v40 = vand.u32 2147483647, %v755_v29  ;;  %vm761_vm13 = vweird.f32 %v755_v29 }
 0x2b7   :  { %v768_v50 = vor.u32 1.1754944e-38, %v767_v38  ;;  %vm766_vm15 = vcmp.eq.f32.partialorder %v765_v40, 8.507059e+37 }
 0x2b8   :  { %v3273_v30 = vpop.eup %3272 }
 0x2b9   :  { %v775_v32 = vadd.f32 1.0, %v3273_v30 }
 0x2bb   :  { %v3275_v35 = vpop.eup %3274  ;;  %3276 = vrcp.f32 %v775_v32  ;;  %v787_v43 = vand.u32 2147483648, %v775_v32  ;;  %v785_v63 = vand.u32 2147483647, %v775_v32  ;;  %vm781_vm2 = vweird.f32 %v775_v32 }
 0x2bc   :  { %v757_v36 = vmul.f32 %v3275_v35, %v755_v29  ;;  %vm762_vm12 = vweird.f32 %v3275_v35 }
 0x2bd   :  { %vm763_vm14 = vmor %vm761_vm13, %vm762_vm12  ;;  %v788_v6 = vor.u32 1.1754944e-38, %v787_v43  ;;  %vm786_vm4 = vcmp.eq.f32.partialorder %v785_v63, 8.507059e+37  ;;  %v319_v63 = vadd.f32 %v3673_v53, %v3754_v45 }
 0x2be   :  { %v758_v37 = vsub.f32 1.0, %v757_v36 }
 0x2c0   :  { %v759_v39 = vmul.f32 %v3275_v35, %v758_v37 }
 0x2c1   :  { %v3277_v41 = vpop.eup %3276 }
 0x2c2   :  { %v777_v46 = vmul.f32 %v3277_v41, %v775_v32  ;;  %v760_v49 = vadd.f32 %v3275_v35, %v759_v39  ;;  %vm782_vm1 = vweird.f32 %v3277_v41 }
 0x2c3   :  { %vm783_vm3 = vmor %vm781_vm2, %vm782_vm1 }
 0x2c4   :  { %v778_v51 = vsub.f32 1.0, %v777_v46  ;;  %v764_v52 = vsel %vm763_vm14, %v3275_v35, %v760_v49 }
 0x2c5   :  { %v769_v55 = vsel %vm766_vm15, %v768_v50, %v764_v52 }
 0x2c6   :  { %v779_v34 = vmul.f32 %v3277_v41, %v778_v51  ;;  %v791_v62 = vmul.f32 %v769_v55, %v749_v5 }
 0x2c8   :  { %v780_v2 = vadd.f32 %v3277_v41, %v779_v34  ;;  %v792_v3 = vadd.f32 %v791_v62, %v316_v54 }
 0x2ca   :  { %v784_v7 = vsel %vm783_vm3, %v3277_v41, %v780_v2  ;;  %3278 = vtanh.f32 %v792_v3 }
 0x2cb   :  { %v789_v9 = vsel %vm786_vm4, %v788_v6, %v784_v7 }
 0x2cc   :  { %v794_v11 = vsub.f32 1.0, %v789_v9  ;;  %v796_v44 = vmul.f32 %v789_v9, %v3769_v57 }
 0x2d0   :  { %v3279_v12 = vpop.eup %3278 }
 0x2d1   :  { %v795_v23 = vmul.f32 %v3279_v12, %v794_v11 }
 0x2d3   :  { %v3807_v26 = vadd.f32 %v796_v44, %v795_v23 }
 0x2d5   :  { %798 = vst.msk [vmem:[#allocation2 + $0x18] sm:$0xff] %vm348_vm9, %v3807_v26  ;;  %3049 = vmatmul.msk.f32.vlgmr.msrb.gmra.mxu0 %vm348_vm9, %v3807_v26  ;;  %3050 = vmatmul.msk.f32.vlgmr.msrb.gmra.mxu1 %vm348_vm9, %v3807_v26 }
 0x2d6   :  { %3051 = vmatmul.msk.f32.vlgmr.msrb.gmra.mxu2 %vm348_vm9, %v3807_v26  ;;  %1076 = vmatpush.msrb.mxu0 %v3566_v17 }
 0x2d7   :  { %1147 = vmatpush.msrb.mxu1 %v3514_v0  ;;  %1167 = vmatpush.msrb.mxu2 %v3550_v10  ;;  %v224_v0 = vpop.f32.mrf.mxu0 }
 0x2d8   :  { %1077 = vmatpush.msrb.mxu0 %v3586_v19 }
 0x2d9   :  { %1148 = vmatpush.msrb.mxu1 %v3516_v1  ;;  %1168 = vmatpush.msrb.mxu2 %v3556_v14  ;;  %v272_v1 = vadd.f32 %v3658_v31, %v3791_v58  ;;  %v225_v14 = vadd.f32 %v3648_v24, %v224_v0 }
 0x2da   :  { %1078 = vmatpush.msrb.mxu0 %v3597_v20 }
 0x2db   :  { %1149 = vmatpush.msrb.mxu1 %v3527_v4  ;;  %1169 = vmatpush.msrb.mxu2 %v3563_v16 }
 0x2dc   :  { %1079 = vmatpush.msrb.mxu0 %v3604_v21 }
 0x2dd   :  { %1150 = vmatpush.msrb.mxu1 %v3539_v8  ;;  %1170 = vmatpush.msrb.mxu2 %v3573_v18 }
 0x2df   :  { %v3829_v10 = vpop.f32.mrf.mxu0 }
 0x352   :  { %v819_v57 = vpop.f32.mrf.mxu0  ;;  %v839_v28 = vpop.f32.mrf.mxu1 }
 0x353   :  { %v820_v4 = vadd.f32 %v3651_v25, %v819_v57  ;;  %v840_v16 = vadd.f32 %v3661_v33, %v839_v28 }
 0x355   :  { %v862_v29 = vadd.f32 %v820_v4, %v225_v14  ;;  %v882_v30 = vadd.f32 %v840_v16, %v272_v1 }
 0x357   :  { %v3052_v32 = vmul.f32 -1.442695, %v862_v29  ;;  %v3053_v8 = vmul.f32 -1.442695, %v882_v30  ;;  %v228_v29 = vadd.f32 %v3648_v24, %v3829_v10  ;;  %v1253_v10 = vld [vmem:[%s2983_s27 + $0x10] sm:$0xff] }
 0x359   :  { %3280 = vpow2.f32 %v3052_v32  ;;  %v859_v5 = vpop.f32.mrf.mxu2 }
 0x35a   :  { %3282 = vpow2.f32 %v3053_v8  ;;  %v860_v55 = vadd.f32 %v3670_v47, %v859_v5 }
 0x35f   :  { %v3281_v18 = vpop.eup %3280 }
 0x360   :  { %v3283_v35 = vpop.eup %3282  ;;  %v866_v36 = vadd.f32 1.0, %v3281_v18  ;;  %v1254_v18 = vld [vmem:[%s2983_s27 + $0x18] sm:$0xff] }
 0x361   :  { %v886_v37 = vadd.f32 1.0, %v3283_v35  ;;  %v1252_v35 = vld [vmem:[%s2983_s27 + $0x8] sm:$0xff] }
 0x362   :  { %3284 = vrcp.f32 %v866_v36  ;;  %v878_v46 = vand.u32 2147483648, %v866_v36  ;;  %v876_v50 = vand.u32 2147483647, %v866_v36  ;;  %vm872_vm6 = vweird.f32 %v866_v36 }
 0x363   :  { %3286 = vrcp.f32 %v886_v37  ;;  %v898_v2 = vand.u32 2147483648, %v886_v37  ;;  %vm892_vm11 = vweird.f32 %v886_v37  ;;  %v896_v6 = vand.u32 2147483647, %v886_v37 }
 0x364   :  { %v879_v54 = vor.u32 1.1754944e-38, %v878_v46  ;;  %vm877_vm8 = vcmp.eq.f32.partialorder %v876_v50, 8.507059e+37 }
 0x365   :  { %v899_v11 = vor.u32 1.1754944e-38, %v898_v2  ;;  %vm897_vm13 = vcmp.eq.f32.partialorder %v896_v6, 8.507059e+37 }
 0x368   :  { %v3285_v38 = vpop.eup %3284 }
 0x369   :  { %v3287_v58 = vpop.eup %3286  ;;  %v868_v39 = vmul.f32 %v3285_v38, %v866_v36  ;;  %vm873_vm5 = vweird.f32 %v3285_v38 }
 0x36a   :  { %v888_v40 = vmul.f32 %v3287_v58, %v886_v37  ;;  %vm874_vm7 = vmor %vm872_vm6, %vm873_vm5  ;;  %vm893_vm10 = vweird.f32 %v3287_v58  ;;  %v1251_v37 = vld [vmem:[%s2983_s27] sm:$0xff]  ;;  %s3487_s27 = smov 35  }
 0x36b   :  { %v869_v41 = vsub.f32 1.0, %v868_v39  ;;  %vm894_vm12 = vmor %vm892_vm11, %vm893_vm10 }
 0x36c   :  { %v889_v42 = vsub.f32 1.0, %v888_v40 }
 0x36d   :  { %v870_v49 = vmul.f32 %v3285_v38, %v869_v41 }
 0x36e   :  { %v890_v51 = vmul.f32 %v3287_v58, %v889_v42 }
 0x36f   :  { %v871_v52 = vadd.f32 %v3285_v38, %v870_v49 }
 0x370   :  { %v891_v43 = vadd.f32 %v3287_v58, %v890_v51 }
 0x371   :  { %v875_v34 = vsel %vm874_vm7, %v3285_v38, %v871_v52 }
 0x372   :  { %v880_v62 = vsel %vm877_vm8, %v879_v54, %v875_v34  ;;  %v895_v9 = vsel %vm894_vm12, %v3287_v58, %v891_v43  ;;  %v322_v43 = vadd.f32 %v3673_v53, %v3756_v48  ;;  %v3882_v53 = vld [vmem:[#allocation2] sm:$0xff]  ;;  %v3886_v48 = vld [vmem:[#allocation2 + $0x8] sm:$0xff] }
 0x373   :  { %v902_v3 = vmul.f32 %v880_v62, %v860_v55  ;;  %v900_v12 = vsel %vm897_vm13, %v899_v11, %v895_v9 }
 0x374   :  { %v905_v23 = vsub.f32 1.0, %v900_v12  ;;  %v907_v57 = vmul.f32 %v900_v12, %v3807_v26  ;;  %v275_v26 = vadd.f32 %v3658_v31, %v3793_v59 }
 0x375   :  { %v903_v7 = vadd.f32 %v902_v3, %v319_v63 }
 0x377   :  { %3288 = vtanh.f32 %v903_v7 }
 0x37d   :  { %v3289_v44 = vpop.eup %3288 }
 0x37e   :  { %v906_v0 = vmul.f32 %v3289_v44, %v905_v23 }
 0x380   :  { %v3840_v28 = vadd.f32 %v907_v57, %v906_v0  ;;  %v3890_v0 = vld [vmem:[#allocation2 + $0x10] sm:$0xff]  ;;  %v3894_v57 = vld [vmem:[#allocation2 + $0x18] sm:$0xff] }
 0x382   :  { %909 = vst.msk [vmem:[#allocation2 + $0x20] sm:$0xff] %vm348_vm9, %v3840_v28  ;;  %3054 = vmatmul.msk.f32.vlgmr.msrb.gmra.mxu3 %vm348_vm9, %v3840_v28  ;;  %3055 = vmatmul.msk.f32.vlgmr.msra.gmra.mxu0 %vm348_vm9, %v3840_v28 }
 0x383   :  { %3056 = vmatmul.msk.f32.vlgmr.msra.gmra.mxu1 %vm348_vm9, %v3840_v28  ;;  %1187 = vmatpush.msrb.mxu3 %v3566_v17 }
 0x384   :  { %1295 = vmatpush.msra.mxu0 %v1254_v18  ;;  %v3934_v18 = vld [vmem:[%s3915_s7 + $0x8] sm:$0xff] }
 0x385   :  { %1188 = vmatpush.msrb.mxu3 %v3586_v19 }
 0x386   :  { %1296 = vmatpush.msra.mxu0 %v1253_v10  ;;  %v1325_v10 = vld [vmem:[%s2984_s12 + $0x8] sm:$0xff] }
 0x387   :  { %1189 = vmatpush.msrb.mxu3 %v3597_v20 }
 0x388   :  { %1297 = vmatpush.msra.mxu0 %v1252_v35  ;;  %v1374_v35 = vld [vmem:[%s2985_s18 + $0x8] sm:$0xff] }
 0x389   :  { %1190 = vmatpush.msrb.mxu3 %v3604_v21 }
 0x38a   :  { %1298 = vmatpush.msra.mxu0 %v1251_v37  ;;  %v1324_v37 = vld [vmem:[%s2984_s12] sm:$0xff] }
 0x3ff   :  { %v950_v45 = vpop.f32.mrf.mxu0 }
 0x400   :  { %v951_v1 = vadd.f32 %v3661_v33, %v950_v45  ;;  %v970_v50 = vpop.f32.mrf.mxu1 }
 0x401   :  { %v971_v52 = vadd.f32 %v3670_v47, %v970_v50 }
 0x402   :  { %v993_v14 = vadd.f32 %v951_v1, %v275_v26 }
 0x404   :  { %v3058_v4 = vmul.f32 -1.442695, %v993_v14  ;;  %v231_v14 = vadd.f32 %v3648_v24, %v3645_v22 }
 0x405   :  { %v930_v16 = vpop.f32.mrf.mxu3 }
 0x406   :  { %3290 = vpow2.f32 %v3058_v4  ;;  %v931_v17 = vadd.f32 %v3651_v25, %v930_v16  ;;  %v278_v4 = vadd.f32 %v3658_v31, %v3795_v60  ;;  %v1327_v60 = vld [vmem:[%s2984_s12 + $0x18] sm:$0xff] }
 0x407   :  { %1344 = vmatpush.msra.mxu1 %v1327_v60 }
 0x408   :  { %v973_v19 = vadd.f32 %v931_v17, %v228_v29 }
 0x40a   :  { %v3057_v30 = vmul.f32 -1.442695, %v973_v19 }
 0x40c   :  { %v3291_v20 = vpop.eup %3290  ;;  %3292 = vpow2.f32 %v3057_v30 }
 0x40d   :  { %v997_v21 = vadd.f32 1.0, %v3291_v20 }
 0x40f   :  { %3294 = vrcp.f32 %v997_v21  ;;  %v1009_v62 = vand.u32 2147483648, %v997_v21  ;;  %vm1003_vm4 = vweird.f32 %v997_v21  ;;  %v1007_v2 = vand.u32 2147483647, %v997_v21 }
 0x411   :  { %v1010_v7 = vor.u32 1.1754944e-38, %v1009_v62  ;;  %vm1008_vm6 = vcmp.eq.f32.partialorder %v1007_v2, 8.507059e+37 }
 0x412   :  { %v3293_v59 = vpop.eup %3292 }
 0x413   :  { %v977_v32 = vadd.f32 1.0, %v3293_v59  ;;  %v3931_v59 = vld [vmem:[%s3915_s7 + $0x10] sm:$0xff] }
 0x415   :  { %3296 = vrcp.f32 %v977_v32  ;;  %v3295_v8 = vpop.eup %3294  ;;  %v989_v41 = vand.u32 2147483648, %v977_v32  ;;  %v987_v46 = vand.u32 2147483647, %v977_v32  ;;  %vm983_vm15 = vweird.f32 %v977_v32 }
 0x416   :  { %v999_v36 = vmul.f32 %v3295_v8, %v997_v21  ;;  %vm1004_vm3 = vweird.f32 %v3295_v8  ;;  %v1376_v21 = vld [vmem:[%s2985_s18 + $0x18] sm:$0xff] }
 0x417   :  { %v990_v5 = vor.u32 1.1754944e-38, %v989_v41  ;;  %vm988_vm2 = vcmp.eq.f32.partialorder %v987_v46, 8.507059e+37  ;;  %vm1005_vm5 = vmor %vm1003_vm4, %vm1004_vm3 }
 0x418   :  { %v1000_v39 = vsub.f32 1.0, %v999_v36  ;;  %v3938_v36 = vld [vmem:[%s3915_s7] sm:$0xff] }
 0x41a   :  { %v1001_v49 = vmul.f32 %v3295_v8, %v1000_v39 }
 0x41b   :  { %v3297_v38 = vpop.eup %3296 }
 0x41c   :  { %v979_v58 = vmul.f32 %v3297_v38, %v977_v32  ;;  %vm984_vm14 = vweird.f32 %v3297_v38  ;;  %v1002_v34 = vadd.f32 %v3295_v8, %v1001_v49  ;;  %v1326_v32 = vld [vmem:[%s2984_s12 + $0x10] sm:$0xff]  ;;  %s4021_s12 = sld [smem:[%s4532_s0 + %s3474_s6]]   ;;  %s3489_s6 = smov 37  }
 0x41d   :  { %vm985_vm1 = vmor %vm983_vm15, %vm984_vm14  ;;  %1345 = vmatpush.msra.mxu1 %v1326_v32 }
 0x41e   :  { %v980_v40 = vsub.f32 1.0, %v979_v58  ;;  %v1006_v6 = vsel %vm1005_vm5, %v3295_v8, %v1002_v34  ;;  %v1375_v8 = vld [vmem:[%s2985_s18 + $0x10] sm:$0xff]  ;;  %v1373_v58 = vld [vmem:[%s2985_s18] sm:$0xff]  ;;  %s4046_s18 = sld [smem:[%s4532_s0 + %s3475_s14]]  }
 0x41f   :  { %v1011_v9 = vsel %vm1008_vm6, %v1010_v7, %v1006_v6  ;;  %1346 = vmatpush.msra.mxu1 %v1325_v10  ;;  %v3944_v34 = vld [vmem:[%s3635_s20] ss:$0 sm:$0xff]  ;;  %s3956_s20 = sld [smem:[%s4532_s0 + %s3470_s19]]   ;;  %s3476_s19 = smov 24  }
 0x420   :  { %v981_v42 = vmul.f32 %v3297_v38, %v980_v40  ;;  %v1016_v47 = vsub.f32 1.0, %v1011_v9  ;;  %v1018_v23 = vmul.f32 %v1011_v9, %v3840_v28  ;;  %v3898_v28 = vld [vmem:[#allocation2 + $0x20] sm:$0xff]  ;;  %s4083_s23 = sld [smem:[%s4532_s0 + %s3476_s19]]  }
 0x421   :  { %1347 = vmatpush.msra.mxu1 %v1324_v37 }
 0x422   :  { %v982_v51 = vadd.f32 %v3297_v38, %v981_v42 }
 0x424   :  { %v986_v54 = vsel %vm985_vm1, %v3297_v38, %v982_v51 }
 0x425   :  { %v991_v55 = vsel %vm988_vm2, %v990_v5, %v986_v54 }
 0x426   :  { %v1013_v63 = vmul.f32 %v991_v55, %v971_v52 }
 0x428   :  { %v1014_v3 = vadd.f32 %v1013_v63, %v322_v43 }
 0x42a   :  { %3298 = vtanh.f32 %v1014_v3  ;;  %v3948_v3 = vld [vmem:[%s3641_s24] ss:$0 sm:$0xff]  ;;  %s3486_s24 = smov 34  }
 0x42b   :  { %v325_v6 = vadd.f32 %v3948_v3, %v3761_v56  ;;  %s4474_s26 = sld [smem:[%s4532_s0 + %s3486_s24]]  }
 0x430   :  { %v3299_v11 = vpop.eup %3298 }
 0x431   :  { %v1017_v12 = vmul.f32 %v3299_v11, %v1016_v47 }
 0x433   :  { %v3867_v44 = vadd.f32 %v1018_v23, %v1017_v12 }
 0x435   :  { %1020 = vst.msk [vmem:[#allocation2 + $0x28] sm:$0xff] %vm348_vm9, %v3867_v44  ;;  %3059 = vmatmul.msk.f32.vlgmr.msra.gmra.mxu2 %vm348_vm9, %v3867_v44  ;;  %3060 = vmatmul.msk.f32.vlgmr.msra.gmra.mxu3 %vm348_vm9, %v3867_v44 }
 0x436   :  { %3061 = vmatmul.msk.f32.vlgmr.msrb.gmra.mxu0 %vm348_vm9, %v3867_v44  ;;  %1393 = vmatpush.msra.mxu2 %v1376_v21  ;;  %v3436_v21 = vld [vmem:[%s3578_s11] ss:$0 sm:$0xff]  ;;  %s3485_s11 = smov 33  }
 0x437   :  { %v281_v32 = vadd.f32 %v3436_v21, %v3797_v61 }
 0x438   :  { %1394 = vmatpush.msra.mxu2 %v1375_v8 }
 0x43a   :  { %1395 = vmatpush.msra.mxu2 %v1374_v35 }
 0x43c   :  { %v3902_v45 = vld [vmem:[#allocation2 + $0x28] sm:$0xff]  ;;  %1396 = vmatpush.msra.mxu2 %v1373_v58  ;;  %v4102_v58 = vld [vmem:[%s3872_s2] ss:$0 sm:$0xff] }
 0x43e   :  { %3069 = vmatmul.msk.f32.vlgmr.msra.gmra.mxu0 %vm348_vm9, %v3882_v53 }
 0x446   :  { %3070 = vmatmul.msk.f32.gmra.mxu0 %vm348_vm9, %v3886_v48 }
 0x44e   :  { %3071 = vmatmul.msk.f32.gmra.mxu0 %vm348_vm9, %v3890_v0 }
 0x456   :  { %3072 = vmatmul.msk.f32.gmra.mxu0 %vm348_vm9, %v3894_v57 }
 0x45e   :  { %3073 = vmatmul.msk.f32.gmra.mxu0 %vm348_vm9, %v3898_v28 }
 0x466   :  { %3074 = vmatmul.msk.f32.gmra.mxu0 %vm348_vm9, %v3902_v45 }
 0x4b3   :  { %v1081_v5 = vpop.f32.mrf.mxu0 }
 0x4b4   :  { %v1082_v43 = vadd.f32 %v3944_v34, %v1081_v5  ;;  %v4113_v5 = vld [vmem:[%s4046_s18] ss:$0 sm:$0xff] }
 0x4b8   :  { %v1041_v26 = vpop.f32.mrf.mxu2  ;;  %v1061_v1 = vpop.f32.mrf.mxu3 }
 0x4b9   :  { %v1042_v16 = vadd.f32 %v3651_v25, %v1041_v26  ;;  %v1062_v29 = vadd.f32 %v3661_v33, %v1061_v1  ;;  %v3927_v33 = vld [vmem:[%s3915_s7 + $0x18] sm:$0xff] }
 0x4ba   :  { %1452 = vmatpush.msra.mxu3 %v3927_v33  ;;  %v3966_v26 = vld [vmem:[%s3956_s20 + $0x18] sm:$0xff] }
 0x4bb   :  { %v1084_v17 = vadd.f32 %v1042_v16, %v231_v14  ;;  %v1104_v19 = vadd.f32 %v1062_v29, %v278_v4  ;;  %1720 = vmatpush.msrb.mxu0 %v3966_v26 }
 0x4bc   :  { %1453 = vmatpush.msra.mxu3 %v3931_v59 }
 0x4bd   :  { %v3062_v30 = vmul.f32 -1.442695, %v1084_v17  ;;  %v3063_v20 = vmul.f32 -1.442695, %v1104_v19  ;;  %v3973_v17 = vld [vmem:[%s3963_s25 + $0x18] sm:$0xff]  ;;  %v3992_v19 = vld [vmem:[%s3956_s20 + $0x10] sm:$0xff] }
 0x4be   :  { %1454 = vmatpush.msra.mxu3 %v3934_v18  ;;  %1721 = vmatpush.msrb.mxu0 %v3992_v19 }
 0x4bf   :  { %3300 = vpow2.f32 %v3062_v30  ;;  %v3998_v30 = vld [vmem:[%s3963_s25 + $0x8] sm:$0xff] }
 0x4c0   :  { %3302 = vpow2.f32 %v3063_v20  ;;  %1455 = vmatpush.msra.mxu3 %v3938_v36  ;;  %v4001_v20 = vld [vmem:[%s3956_s20 + $0x8] sm:$0xff] }
 0x4c1   :  { %1722 = vmatpush.msrb.mxu0 %v4001_v20 }
 0x4c5   :  { %v3301_v22 = vpop.eup %3300 }
 0x4c6   :  { %v3303_v24 = vpop.eup %3302  ;;  %v1088_v25 = vadd.f32 1.0, %v3301_v22  ;;  %v4008_v22 = vld [vmem:[%s3956_s20] sm:$0xff] }
 0x4c7   :  { %v3923_v31 = vadd.f32 1.0, %v3303_v24  ;;  %1723 = vmatpush.msrb.mxu0 %v4008_v22 }
 0x4c8   :  { %3304 = vrcp.f32 %v1088_v25  ;;  %v1100_v46 = vand.u32 2147483648, %v1088_v25  ;;  %v1098_v51 = vand.u32 2147483647, %v1088_v25  ;;  %vm1094_vm8 = vweird.f32 %v1088_v25 }
 0x4c9   :  { %3306 = vrcp.f32 %v3923_v31  ;;  %v1120_v9 = vand.u32 2147483648, %v3923_v31  ;;  %vm1114_vm13 = vweird.f32 %v3923_v31  ;;  %v1118_v47 = vand.u32 2147483647, %v3923_v31  ;;  %1902 = vmatpush.msra.mxu0 %v3927_v33 }
 0x4ca   :  { %v1101_v55 = vor.u32 1.1754944e-38, %v1100_v46  ;;  %vm1099_vm11 = vcmp.eq.f32.partialorder %v1098_v51, 8.507059e+37  ;;  %v4110_v51 = vld [vmem:[%s3978_s30] ss:$0 sm:$0xff] }
 0x4cb   :  { %v1121_v23 = vor.u32 1.1754944e-38, %v1120_v9  ;;  %vm1119_vm15 = vcmp.eq.f32.partialorder %v1118_v47, 8.507059e+37  ;;  %1903 = vmatpush.msra.mxu0 %v3931_v59 }
 0x4cd   :  { %1904 = vmatpush.msra.mxu0 %v3934_v18 }
 0x4ce   :  { %v3305_v38 = vpop.eup %3304 }
 0x4cf   :  { %v3307_v39 = vpop.eup %3306  ;;  %v1090_v40 = vmul.f32 %v3305_v38, %v1088_v25  ;;  %vm1095_vm7 = vweird.f32 %v3305_v38  ;;  %v4025_v25 = vld [vmem:[%s3963_s25] sm:$0xff]  ;;  %1905 = vmatpush.msra.mxu0 %v3938_v36 }
 0x4d0   :  { %v1110_v41 = vmul.f32 %v3307_v39, %v3923_v31  ;;  %vm1096_vm10 = vmor %vm1094_vm8, %vm1095_vm7  ;;  %vm1115_vm12 = vweird.f32 %v3307_v39 }
 0x4d1   :  { %v1091_v42 = vsub.f32 1.0, %v1090_v40  ;;  %vm1116_vm14 = vmor %vm1114_vm13, %vm1115_vm12 }
 0x4d2   :  { %v1111_v49 = vsub.f32 1.0, %v1110_v41 }
 0x4d3   :  { %v1092_v50 = vmul.f32 %v3305_v38, %v1091_v42 }
 0x4d4   :  { %v1112_v52 = vmul.f32 %v3307_v39, %v1111_v49 }
 0x4d5   :  { %v1093_v54 = vadd.f32 %v3305_v38, %v1092_v50 }
 0x4d6   :  { %v1113_v2 = vadd.f32 %v3307_v39, %v1112_v52 }
 0x4d7   :  { %v1097_v62 = vsel %vm1096_vm10, %v3305_v38, %v1093_v54 }
 0x4d8   :  { %v1102_v63 = vsel %vm1099_vm11, %v1101_v55, %v1097_v62  ;;  %v1117_v12 = vsel %vm1116_vm14, %v3307_v39, %v1113_v2  ;;  %v1300_v39 = vpop.f32.mrf.mxu0 }
 0x4d9   :  { %v1124_v7 = vmul.f32 %v1102_v63, %v1082_v43  ;;  %v1122_v56 = vsel %vm1119_vm15, %v1121_v23, %v1117_v12  ;;  %v1301_v61 = vadd.f32 %v4102_v58, %v1300_v39 }
 0x4da   :  { %v1127_v1 = vsub.f32 1.0, %v1122_v56  ;;  %v1129_v16 = vmul.f32 %v1122_v56, %v3867_v44  ;;  %v3989_v44 = vld [vmem:[%s3963_s25 + $0x10] sm:$0xff]  ;;  %s3479_s25 = smov 27  }
 0x4db   :  { %v1125_v11 = vadd.f32 %v1124_v7, %v325_v6  ;;  %s4330_s28 = sld [smem:[%s4532_s0 + %s3479_s25]]  }
 0x4dd   :  { %3308 = vtanh.f32 %v1125_v11 }
 0x4e3   :  { %v3309_v14 = vpop.eup %3308 }
 0x4e4   :  { %v1128_v4 = vmul.f32 %v3309_v14, %v1127_v1 }
 0x4e6   :  { %v3970_v29 = vadd.f32 %v1129_v16, %v1128_v4 }
 0x4e8   :  { %1131 = vst.msk [vmem:[#allocation2 + $0x30] sm:$0xff] %vm348_vm9, %v3970_v29  ;;  %3064 = vmatmul.msk.f32.vlgmr.msrb.gmra.mxu1 %vm348_vm9, %v3970_v29  ;;  %3065 = vmatmul.msk.f32.vlgmr.msrb.gmra.mxu2 %vm348_vm9, %v3970_v29 }
 0x4e9   :  { %3066 = vmatmul.msk.f32.vlgmr.msrb.gmra.mxu3 %vm348_vm9, %v3970_v29  ;;  %1791 = vmatpush.msrb.mxu1 %v3927_v33 }
 0x4ea   :  { %1475 = vmatpush.msrb.mxu3 %v3973_v17  ;;  %1811 = vmatpush.msrb.mxu2 %v3973_v17 }
 0x4eb   :  { %1792 = vmatpush.msrb.mxu1 %v3931_v59 }
 0x4ec   :  { %1476 = vmatpush.msrb.mxu3 %v3989_v44  ;;  %1812 = vmatpush.msrb.mxu2 %v3989_v44 }
 0x4ed   :  { %1793 = vmatpush.msrb.mxu1 %v3934_v18 }
 0x4ee   :  { %1477 = vmatpush.msrb.mxu3 %v3998_v30  ;;  %1813 = vmatpush.msrb.mxu2 %v3998_v30 }
 0x4ef   :  { %v1249_v24 = vld [vmem:[#allocation2 + $0x30] sm:$0xff]  ;;  %1794 = vmatpush.msrb.mxu1 %v3938_v36 }
 0x4f0   :  { %3075 = vmatmul.msk.f32.gmra.mxu0 %vm348_vm9, %v1249_v24  ;;  %3077 = vmatmul.msk.f32.vlgmr.msra.gmra.mxu1 %vm348_vm9, %v3882_v53 }
 0x4f1   :  { %3085 = vmatmul.msk.f32.vlgmr.msra.gmra.mxu2 %vm348_vm9, %v3882_v53  ;;  %1456 = vmatmul.f32.vlgmr.msra.gmra.mxu3 %v3460_v13  ;;  %v3434_v53 = vld [vmem:[%s3525_s29] ss:$0 sm:$0xff]  ;;  %s3477_s29 = smov 25  }
 0x4f2   :  { %1478 = vmatpush.msrb.mxu3 %v4025_v25  ;;  %1814 = vmatpush.msrb.mxu2 %v4025_v25 }
 0x4f3   :  { %1922 = vmatpush.msra.mxu1 %v3973_v17 }
 0x4f4   :  { %1498 = vmatpush.msra.mxu3 %v3966_v26  ;;  %1942 = vmatpush.msra.mxu2 %v3966_v26 }
 0x4f5   :  { %1923 = vmatpush.msra.mxu1 %v3989_v44 }
 0x4f6   :  { %1499 = vmatpush.msra.mxu3 %v3992_v19  ;;  %1943 = vmatpush.msra.mxu2 %v3992_v19 }
 0x4f7   :  { %1924 = vmatpush.msra.mxu1 %v3998_v30 }
 0x4f8   :  { %1500 = vmatpush.msra.mxu3 %v4001_v20  ;;  %3078 = vmatmul.msk.f32.gmra.mxu1 %vm348_vm9, %v3886_v48 }
 0x4f9   :  { %1944 = vmatpush.msra.mxu2 %v4001_v20  ;;  %1479 = vmatmul.f32.vlgmr.msrb.gmra.mxu3 %v3460_v13 }
 0x4fa   :  { %3086 = vmatmul.msk.f32.gmra.mxu2 %vm348_vm9, %v3886_v48  ;;  %1501 = vmatpush.msra.mxu3 %v4008_v22  ;;  %v234_v48 = vadd.f32 %v3434_v53, %v3654_v27  ;;  %v4105_v27 = vld [vmem:[%s4021_s12] ss:$0 sm:$0xff] }
 0x4fb   :  { %1925 = vmatpush.msra.mxu1 %v4025_v25  ;;  %1945 = vmatpush.msra.mxu2 %v4008_v22 }
 0x4fc   :  { %1569 = vmatpush.msrb.mxu3 %v3927_v33 }
 0x4fe   :  { %1570 = vmatpush.msrb.mxu3 %v3931_v59 }
 0x500   :  { %1571 = vmatpush.msrb.mxu3 %v3934_v18  ;;  %3079 = vmatmul.msk.f32.gmra.mxu1 %vm348_vm9, %v3890_v0 }
 0x501   :  { %1502 = vmatmul.f32.vlgmr.msra.gmra.mxu3 %v3460_v13 }
 0x502   :  { %3087 = vmatmul.msk.f32.gmra.mxu2 %vm348_vm9, %v3890_v0  ;;  %1572 = vmatpush.msrb.mxu3 %v3938_v36  ;;  %v3435_v0 = vld [vmem:[%s3544_s8] ss:$0 sm:$0xff]  ;;  %s4455_s8 = sld [smem:[%s4532_s0 + %s3484_s22]]  }
 0x504   :  { %1589 = vmatpush.msra.mxu3 %v3973_v17 }
 0x506   :  { %1590 = vmatpush.msra.mxu3 %v3989_v44 }
 0x508   :  { %1591 = vmatpush.msra.mxu3 %v3998_v30  ;;  %3080 = vmatmul.msk.f32.gmra.mxu1 %vm348_vm9, %v3894_v57 }
 0x50a   :  { %3088 = vmatmul.msk.f32.gmra.mxu2 %vm348_vm9, %v3894_v57  ;;  %1592 = vmatpush.msra.mxu3 %v4025_v25 }
 0x510   :  { %3081 = vmatmul.msk.f32.gmra.mxu1 %vm348_vm9, %v3898_v28 }
 0x512   :  { %3089 = vmatmul.msk.f32.gmra.mxu2 %vm348_vm9, %v3898_v28 }
 0x518   :  { %3082 = vmatmul.msk.f32.gmra.mxu1 %vm348_vm9, %v3902_v45 }
 0x51a   :  { %3090 = vmatmul.msk.f32.gmra.mxu2 %vm348_vm9, %v3902_v45  ;;  %v3437_v45 = vld [vmem:[%s3591_s16] ss:$0 sm:$0xff]  ;;  %s2995_s16 = sld [smem:[%s4532_s0 + %s3477_s29]]  }
 0x520   :  { %3083 = vmatmul.msk.f32.gmra.mxu1 %vm348_vm9, %v1249_v24 }
 0x522   :  { %3091 = vmatmul.msk.f32.gmra.mxu2 %vm348_vm9, %v1249_v24 }
 0x565   :  { %v1152_v13 = vpop.f32.mrf.mxu1 }
 0x566   :  { %v1153_v57 = vadd.f32 %v3435_v0, %v1152_v13 }
 0x568   :  { %v1195_v28 = vadd.f32 %v1153_v57, %v234_v48  ;;  %v328_v48 = vadd.f32 %v3948_v3, %v3764_v15 }
 0x56a   :  { %v3067_v31 = vmul.f32 -1.442695, %v1195_v28 }
 0x56b   :  { %v1172_v60 = vpop.f32.mrf.mxu2 }
 0x56c   :  { %3310 = vpow2.f32 %v3067_v31  ;;  %v1173_v8 = vadd.f32 %v3437_v45, %v1172_v60  ;;  %v1192_v10 = vpop.f32.mrf.mxu3 }
 0x56d   :  { %v1349_v52 = vpop.f32.mrf.mxu1  ;;  %v1193_v13 = vadd.f32 %v3944_v34, %v1192_v10 }
 0x56e   :  { %v1215_v35 = vadd.f32 %v1173_v8, %v281_v32  ;;  %v1350_v63 = vadd.f32 %v4110_v51, %v1349_v52 }
 0x570   :  { %v3068_v37 = vmul.f32 -1.442695, %v1215_v35 }
 0x572   :  { %v3311_v38 = vpop.eup %3310  ;;  %3312 = vpow2.f32 %v3068_v37  ;;  %v4121_v37 = vld [vmem:[%s4083_s23] ss:$0 sm:$0xff] }
 0x573   :  { %v1199_v40 = vadd.f32 1.0, %v3311_v38 }
 0x574   :  { %v1457_v41 = vpop.f32.mrf.mxu3 }
 0x575   :  { %3314 = vrcp.f32 %v1199_v40  ;;  %v1458_v42 = vadd.f32 %v4105_v27, %v1457_v41  ;;  %v1211_v7 = vand.u32 2147483648, %v1199_v40  ;;  %v1209_v11 = vand.u32 2147483647, %v1199_v40 }
 0x576   :  { %vm1205_vm2 = vweird.f32 %v1199_v40 }
 0x577   :  { %v1506_v49 = vadd.f32 %v1458_v42, %v1301_v61  ;;  %v1212_v4 = vor.u32 1.1754944e-38, %v1211_v7  ;;  %vm1210_vm4 = vcmp.eq.f32.partialorder %v1209_v11, 8.507059e+37 }
 0x578   :  { %v3313_v46 = vpop.eup %3312 }
 0x579   :  { %v1219_v50 = vadd.f32 1.0, %v3313_v46  ;;  %v3093_v54 = vmul.f32 -1.442695, %v1506_v49 }
 0x57b   :  { %v3315_v55 = vpop.eup %3314  ;;  %3316 = vrcp.f32 %v1219_v50  ;;  %v1231_v28 = vand.u32 2147483648, %v1219_v50  ;;  %v1229_v60 = vand.u32 2147483647, %v1219_v50  ;;  %vm1225_vm6 = vweird.f32 %v1219_v50 }
 0x57c   :  { %v1201_v43 = vmul.f32 %v3315_v55, %v1199_v40  ;;  %3318 = vpow2.f32 %v3093_v54  ;;  %v1480_v62 = vpop.f32.mrf.mxu3  ;;  %vm1206_vm1 = vweird.f32 %v3315_v55  ;;  %v4125_v54 = vld [vmem:[%s4013_s5] ss:$0 sm:$0xff] }
 0x57d   :  { %v1481_v2 = vadd.f32 %v4113_v5, %v1480_v62  ;;  %vm1207_vm3 = vmor %vm1205_vm2, %vm1206_vm1  ;;  %v1232_v8 = vor.u32 1.1754944e-38, %v1231_v28  ;;  %vm1230_vm8 = vcmp.eq.f32.partialorder %v1229_v60, 8.507059e+37  ;;  %v1398_v62 = vpop.f32.mrf.mxu2 }
 0x57e   :  { %v1202_v6 = vsub.f32 1.0, %v1201_v43 }
 0x57f   :  { %v1526_v9 = vadd.f32 %v1481_v2, %v1350_v63 }
 0x580   :  { %v1203_v47 = vmul.f32 %v3315_v55, %v1202_v6 }
 0x581   :  { %v3317_v12 = vpop.eup %3316  ;;  %v3094_v23 = vmul.f32 -1.442695, %v1526_v9 }
 0x582   :  { %v3319_v56 = vpop.eup %3318  ;;  %v1221_v1 = vmul.f32 %v3317_v12, %v1219_v50  ;;  %v1204_v14 = vadd.f32 %v3315_v55, %v1203_v47  ;;  %vm1226_vm5 = vweird.f32 %v3317_v12 }
 0x583   :  { %v1510_v16 = vadd.f32 1.0, %v3319_v56  ;;  %3320 = vpow2.f32 %v3094_v23  ;;  %vm1227_vm7 = vmor %vm1225_vm6, %vm1226_vm5 }
 0x584   :  { %v1222_v24 = vsub.f32 1.0, %v1221_v1  ;;  %v1208_v53 = vsel %vm1207_vm3, %v3315_v55, %v1204_v14  ;;  %v1503_v39 = vpop.f32.mrf.mxu3 }
 0x585   :  { %v1213_v0 = vsel %vm1210_vm4, %v1212_v4, %v1208_v53  ;;  %3322 = vrcp.f32 %v1510_v16  ;;  %v1520_v61 = vand.u32 2147483647, %v1510_v16  ;;  %v1522_v42 = vand.u32 2147483648, %v1510_v16 }
 0x586   :  { %v1223_v57 = vmul.f32 %v3317_v12, %v1222_v24  ;;  %v1235_v31 = vmul.f32 %v1213_v0, %v1193_v13  ;;  %v1504_v55 = vadd.f32 %v4121_v37, %v1503_v39  ;;  %vm1516_vm11 = vweird.f32 %v1510_v16 }
 0x587   :  { %v1523_v6 = vor.u32 1.1754944e-38, %v1522_v42  ;;  %vm1521_vm13 = vcmp.eq.f32.partialorder %v1520_v61, 8.507059e+37 }
 0x588   :  { %v1224_v21 = vadd.f32 %v3317_v12, %v1223_v57  ;;  %v1236_v32 = vadd.f32 %v1235_v31, %v328_v48  ;;  %v1303_v31 = vpop.f32.mrf.mxu0 }
 0x589   :  { %v3321_v45 = vpop.eup %3320 }
 0x58a   :  { %v1228_v34 = vsel %vm1227_vm7, %v3317_v12, %v1224_v21  ;;  %3324 = vtanh.f32 %v1236_v32  ;;  %v1530_v10 = vadd.f32 1.0, %v3321_v45  ;;  %v1304_v21 = vadd.f32 %v4102_v58, %v1303_v31 }
 0x58b   :  { %v3323_v35 = vpop.eup %3322  ;;  %v1233_v15 = vsel %vm1230_vm8, %v1232_v8, %v1228_v34  ;;  %v1352_v34 = vpop.f32.mrf.mxu1 }
 0x58c   :  { %3326 = vrcp.f32 %v1530_v10  ;;  %v1512_v3 = vmul.f32 %v3323_v35, %v1510_v16  ;;  %v1238_v38 = vsub.f32 1.0, %v1233_v15  ;;  %v1240_v49 = vmul.f32 %v1233_v15, %v3970_v29 }
 0x58d   :  { %vm1517_vm10 = vweird.f32 %v3323_v35  ;;  %v1399_v29 = vadd.f32 %v4125_v54, %v1398_v62  ;;  %v1542_v47 = vand.u32 2147483648, %v1530_v10  ;;  %v1540_v23 = vand.u32 2147483647, %v1530_v10 }
 0x58e   :  { %v1513_v40 = vsub.f32 1.0, %v1512_v3  ;;  %vm1518_vm12 = vmor %vm1516_vm11, %vm1517_vm10  ;;  %vm1536_vm15 = vweird.f32 %v1530_v10 }
 0x58f   :  { %v1543_v4 = vor.u32 1.1754944e-38, %v1542_v47  ;;  %vm1541_vm2 = vcmp.eq.f32.partialorder %v1540_v23, 8.507059e+37 }
 0x590   :  { %v3325_v41 = vpop.eup %3324  ;;  %v1514_v50 = vmul.f32 %v3323_v35, %v1513_v40 }
 0x591   :  { %v1239_v46 = vmul.f32 %v3325_v41, %v1238_v38 }
 0x592   :  { %v3327_v52 = vpop.eup %3326  ;;  %v1515_v2 = vadd.f32 %v3323_v35, %v1514_v50 }
 0x593   :  { %v1241_v43 = vadd.f32 %v1240_v49, %v1239_v46  ;;  %v1532_v63 = vmul.f32 %v3327_v52, %v1530_v10  ;;  %vm1537_vm14 = vweird.f32 %v3327_v52 }
 0x594   :  { %v1519_v9 = vsel %vm1518_vm12, %v3323_v35, %v1515_v2  ;;  %vm1538_vm1 = vmor %vm1536_vm15, %vm1537_vm14  ;;  %v1353_v35 = vadd.f32 %v4110_v51, %v1352_v34  ;;  %v1401_v2 = vpop.f32.mrf.mxu2 }
 0x595   :  { %1242 = vst.msk [vmem:[#allocation2 + $0x38] sm:$0xff] %vm348_vm9, %v1241_v43  ;;  %v1533_v7 = vsub.f32 1.0, %v1532_v63  ;;  %v1524_v11 = vsel %vm1521_vm13, %v1523_v6, %v1519_v9 }
 0x596   :  { %v1546_v56 = vmul.f32 %v1524_v11, %v1504_v55  ;;  %v1402_v11 = vadd.f32 %v4125_v54, %v1401_v2 }
 0x597   :  { %v1534_v12 = vmul.f32 %v3327_v52, %v1533_v7 }
 0x598   :  { %v1547_v14 = vadd.f32 %v1546_v56, %v1399_v29 }
 0x599   :  { %v1535_v1 = vadd.f32 %v3327_v52, %v1534_v12 }
 0x59a   :  { %3328 = vtanh.f32 %v1547_v14 }
 0x59b   :  { %v1539_v16 = vsel %vm1538_vm1, %v3327_v52, %v1535_v1 }
 0x59c   :  { %v1544_v24 = vsel %vm1541_vm2, %v1543_v4, %v1539_v16  ;;  %v1250_v13 = vld [vmem:[#allocation2 + $0x38] sm:$0xff] }
 0x59d   :  { %3076 = vmatmul.msk.f32.gmra.mxu0 %vm348_vm9, %v1250_v13  ;;  %3084 = vmatmul.msk.f32.gmra.mxu1 %vm348_vm9, %v1250_v13  ;;  %v1549_v53 = vsub.f32 1.0, %v1544_v24  ;;  %v1551_v57 = vmul.f32 0.0, %v1544_v24 }
 0x59e   :  { %3092 = vmatmul.msk.f32.gmra.mxu2 %vm348_vm9, %v1250_v13 }
 0x5a0   :  { %v3329_v48 = vpop.eup %3328 }
 0x5a1   :  { %v1550_v0 = vmul.f32 %v3329_v48, %v1549_v53 }
 0x5a3   :  { %v4133_v28 = vadd.f32 %v1551_v57, %v1550_v0 }
 0x5a5   :  { %1553 = vst.msk [vmem:[#allocation2] sm:$0xff] %vm348_vm9, %v4133_v28  ;;  %3095 = vmatmul.msk.f32.vlgmr.msrb.gmra.mxu3 %vm348_vm9, %v4133_v28 }
 0x5a6   :  { %1609 = vmatpush.msrb.mxu3 %v3966_v26 }
 0x5a8   :  { %1610 = vmatpush.msrb.mxu3 %v3992_v19 }
 0x5aa   :  { %1611 = vmatpush.msrb.mxu3 %v4001_v20 }
 0x5ac   :  { %1612 = vmatpush.msrb.mxu3 %v4008_v22 }
 0x5ad   :  { %3096 = vmatmul.msk.f32.vlgmr.msra.gmra.mxu3 %vm348_vm9, %v4133_v28 }
 0x5ae   :  { %1680 = vmatpush.msra.mxu3 %v3927_v33 }
 0x5b0   :  { %1681 = vmatpush.msra.mxu3 %v3931_v59 }
 0x5b2   :  { %1682 = vmatpush.msra.mxu3 %v3934_v18 }
 0x5b4   :  { %1683 = vmatpush.msra.mxu3 %v3938_v36 }
 0x5b5   :  { %3097 = vmatmul.msk.f32.vlgmr.msrb.gmra.mxu3 %vm348_vm9, %v4133_v28 }
 0x5b6   :  { %1700 = vmatpush.msrb.mxu3 %v3973_v17 }
 0x5b8   :  { %1701 = vmatpush.msrb.mxu3 %v3989_v44 }
 0x5ba   :  { %1702 = vmatpush.msrb.mxu3 %v3998_v30 }
 0x5bc   :  { %1703 = vmatpush.msrb.mxu3 %v4025_v25 }
 0x628   :  { %v1574_v60 = vpop.f32.mrf.mxu3 }
 0x629   :  { %v1575_v32 = vadd.f32 %v4105_v27, %v1574_v60 }
 0x62b   :  { %v1617_v45 = vadd.f32 %v1575_v32, %v1304_v21 }
 0x62d   :  { %v3098_v8 = vmul.f32 -1.442695, %v1617_v45 }
 0x62f   :  { %3330 = vpow2.f32 %v3098_v8 }
 0x630   :  { %v1594_v10 = vpop.f32.mrf.mxu3 }
 0x631   :  { %v1595_v15 = vadd.f32 %v4113_v5, %v1594_v10 }
 0x633   :  { %v1637_v3 = vadd.f32 %v1595_v15, %v1353_v35 }
 0x635   :  { %v3331_v38 = vpop.eup %3330  ;;  %v3099_v39 = vmul.f32 -1.442695, %v1637_v3  ;;  %v1355_v3 = vpop.f32.mrf.mxu1 }
 0x636   :  { %v1621_v40 = vadd.f32 1.0, %v3331_v38 }
 0x637   :  { %3332 = vpow2.f32 %v3099_v39  ;;  %v1356_v39 = vadd.f32 %v4110_v51, %v1355_v3 }
 0x638   :  { %3334 = vrcp.f32 %v1621_v40  ;;  %v1633_v50 = vand.u32 2147483648, %v1621_v40  ;;  %v1631_v55 = vand.u32 2147483647, %v1621_v40  ;;  %v1614_v43 = vpop.f32.mrf.mxu3  ;;  %vm1627_vm4 = vweird.f32 %v1621_v40 }
 0x639   :  { %v1615_v9 = vadd.f32 %v4121_v37, %v1614_v43 }
 0x63a   :  { %v1634_v6 = vor.u32 1.1754944e-38, %v1633_v50  ;;  %vm1632_vm6 = vcmp.eq.f32.partialorder %v1631_v55, 8.507059e+37 }
 0x63d   :  { %v3333_v41 = vpop.eup %3332 }
 0x63e   :  { %v3335_v61 = vpop.eup %3334  ;;  %v1641_v42 = vadd.f32 1.0, %v3333_v41 }
 0x63f   :  { %v1623_v46 = vmul.f32 %v3335_v61, %v1621_v40  ;;  %vm1628_vm3 = vweird.f32 %v3335_v61 }
 0x640   :  { %3336 = vrcp.f32 %v1641_v42  ;;  %vm1629_vm5 = vmor %vm1627_vm4, %vm1628_vm3  ;;  %v1653_v56 = vand.u32 2147483648, %v1641_v42  ;;  %v1651_v14 = vand.u32 2147483647, %v1641_v42  ;;  %vm1647_vm8 = vweird.f32 %v1641_v42 }
 0x641   :  { %v1624_v49 = vsub.f32 1.0, %v1623_v46 }
 0x642   :  { %v1654_v24 = vor.u32 1.1754944e-38, %v1653_v56  ;;  %vm1652_vm11 = vcmp.eq.f32.partialorder %v1651_v14, 8.507059e+37 }
 0x643   :  { %v1625_v52 = vmul.f32 %v3335_v61, %v1624_v49 }
 0x645   :  { %v1626_v62 = vadd.f32 %v3335_v61, %v1625_v52 }
 0x646   :  { %v3337_v63 = vpop.eup %3336 }
 0x647   :  { %v1643_v7 = vmul.f32 %v3337_v63, %v1641_v42  ;;  %v1630_v29 = vsel %vm1629_vm5, %v3335_v61, %v1626_v62  ;;  %vm1648_vm7 = vweird.f32 %v3337_v63 }
 0x648   :  { %v1635_v47 = vsel %vm1632_vm6, %v1634_v6, %v1630_v29  ;;  %vm1649_vm10 = vmor %vm1647_vm8, %vm1648_vm7 }
 0x649   :  { %v1644_v12 = vsub.f32 1.0, %v1643_v7  ;;  %v1657_v23 = vmul.f32 %v1635_v47, %v1615_v9 }
 0x64b   :  { %v1645_v1 = vmul.f32 %v3337_v63, %v1644_v12  ;;  %v1658_v4 = vadd.f32 %v1657_v23, %v1402_v11  ;;  %v1404_v11 = vpop.f32.mrf.mxu2 }
 0x64d   :  { %v1646_v16 = vadd.f32 %v3337_v63, %v1645_v1  ;;  %3338 = vtanh.f32 %v1658_v4  ;;  %v1405_v4 = vadd.f32 %v4125_v54, %v1404_v11 }
 0x64f   :  { %v1650_v13 = vsel %vm1649_vm10, %v3337_v63, %v1646_v16 }
 0x650   :  { %v1655_v53 = vsel %vm1652_vm11, %v1654_v24, %v1650_v13 }
 0x651   :  { %v1660_v48 = vsub.f32 1.0, %v1655_v53  ;;  %v1662_v31 = vmul.f32 %v1655_v53, %v4133_v28  ;;  %v1306_v28 = vpop.f32.mrf.mxu0 }
 0x652   :  { %v1307_v8 = vadd.f32 %v4102_v58, %v1306_v28 }
 0x653   :  { %v3339_v0 = vpop.eup %3338 }
 0x654   :  { %v1661_v57 = vmul.f32 %v3339_v0, %v1660_v48 }
 0x656   :  { %v4162_v60 = vadd.f32 %v1662_v31, %v1661_v57 }
 0x658   :  { %1664 = vst.msk [vmem:[#allocation2 + $0x8] sm:$0xff] %vm348_vm9, %v4162_v60  ;;  %3100 = vmatmul.msk.f32.vlgmr.msra.gmra.mxu3 %vm348_vm9, %v4162_v60  ;;  %3102 = vmatmul.msk.f32.vlgmr.msrb.gmra.mxu0 %vm348_vm9, %v4162_v60 }
 0x659   :  { %1831 = vmatpush.msra.mxu3 %v3966_v26  ;;  %2033 = vmatpush.msrb.mxu0 %v3973_v17  ;;  %v4184_v21 = vpop.f32.mrf.mxu0 }
 0x65b   :  { %1832 = vmatpush.msra.mxu3 %v3992_v19  ;;  %2034 = vmatpush.msrb.mxu0 %v3989_v44 }
 0x65d   :  { %1833 = vmatpush.msra.mxu3 %v4001_v20  ;;  %2035 = vmatpush.msrb.mxu0 %v3998_v30 }
 0x65f   :  { %1834 = vmatpush.msra.mxu3 %v4008_v22  ;;  %2036 = vmatpush.msrb.mxu0 %v4025_v25 }
 0x660   :  { %3101 = vmatmul.msk.f32.vlgmr.msrb.gmra.mxu3 %vm348_vm9, %v4162_v60 }
 0x661   :  { %2013 = vmatpush.msrb.mxu3 %v3927_v33  ;;  %v4186_v32 = vpop.f32.mrf.mxu0 }
 0x663   :  { %2014 = vmatpush.msrb.mxu3 %v3931_v59 }
 0x665   :  { %2015 = vmatpush.msrb.mxu3 %v3934_v18 }
 0x667   :  { %2016 = vmatpush.msrb.mxu3 %v3938_v36 }
 0x669   :  { %v4190_v35 = vpop.f32.mrf.mxu0 }
 0x671   :  { %v4194_v61 = vpop.f32.mrf.mxu0 }
 0x679   :  { %v4196_v50 = vpop.f32.mrf.mxu0 }
 0x6d5   :  { %v1725_v9 = vpop.f32.mrf.mxu0 }
 0x6d6   :  { %v1726_v23 = vadd.f32 %v4121_v37, %v1725_v9 }
 0x6db   :  { %v1685_v45 = vpop.f32.mrf.mxu3 }
 0x6dc   :  { %v1686_v34 = vadd.f32 %v4105_v27, %v1685_v45 }
 0x6de   :  { %v1728_v10 = vadd.f32 %v1686_v34, %v1307_v8 }
 0x6e0   :  { %v3103_v15 = vmul.f32 -1.442695, %v1728_v10 }
 0x6e2   :  { %3340 = vpow2.f32 %v3103_v15 }
 0x6e3   :  { %v1705_v38 = vpop.f32.mrf.mxu3 }
 0x6e4   :  { %v1706_v40 = vadd.f32 %v4113_v5, %v1705_v38 }
 0x6e6   :  { %v1748_v41 = vadd.f32 %v1706_v40, %v1356_v39 }
 0x6e8   :  { %v3341_v42 = vpop.eup %3340  ;;  %v3104_v46 = vmul.f32 -1.442695, %v1748_v41 }
 0x6e9   :  { %v1732_v49 = vadd.f32 1.0, %v3341_v42 }
 0x6ea   :  { %3342 = vpow2.f32 %v3104_v46 }
 0x6eb   :  { %3344 = vrcp.f32 %v1732_v49  ;;  %v1744_v2 = vand.u32 2147483648, %v1732_v49  ;;  %v1742_v7 = vand.u32 2147483647, %v1732_v49  ;;  %vm1738_vm13 = vweird.f32 %v1732_v49 }
 0x6ed   :  { %v1745_v12 = vor.u32 1.1754944e-38, %v1744_v2  ;;  %vm1743_vm15 = vcmp.eq.f32.partialorder %v1742_v7, 8.507059e+37 }
 0x6f0   :  { %v3343_v52 = vpop.eup %3342 }
 0x6f1   :  { %v3345_v55 = vpop.eup %3344  ;;  %v1752_v43 = vadd.f32 1.0, %v3343_v52 }
 0x6f2   :  { %v1734_v62 = vmul.f32 %v3345_v55, %v1732_v49  ;;  %vm1739_vm12 = vweird.f32 %v3345_v55  ;;  %v1310_v49 = vadd.f32 %v4102_v58, %v4184_v21 }
 0x6f3   :  { %3346 = vrcp.f32 %v1752_v43  ;;  %vm1740_vm14 = vmor %vm1738_vm13, %vm1739_vm12  ;;  %v1764_v13 = vand.u32 2147483648, %v1752_v43  ;;  %v1762_v48 = vand.u32 2147483647, %v1752_v43  ;;  %vm1758_vm2 = vweird.f32 %v1752_v43 }
 0x6f4   :  { %v1735_v63 = vsub.f32 1.0, %v1734_v62 }
 0x6f5   :  { %v1765_v31 = vor.u32 1.1754944e-38, %v1764_v13  ;;  %vm1763_vm4 = vcmp.eq.f32.partialorder %v1762_v48, 8.507059e+37 }
 0x6f6   :  { %v1736_v6 = vmul.f32 %v3345_v55, %v1735_v63 }
 0x6f8   :  { %v1737_v29 = vadd.f32 %v3345_v55, %v1736_v6 }
 0x6f9   :  { %v3347_v47 = vpop.eup %3346 }
 0x6fa   :  { %v1741_v56 = vsel %vm1740_vm14, %v3345_v55, %v1737_v29  ;;  %v1754_v1 = vmul.f32 %v3347_v47, %v1752_v43  ;;  %vm1759_vm1 = vweird.f32 %v3347_v47 }
 0x6fb   :  { %v1746_v14 = vsel %vm1743_vm15, %v1745_v12, %v1741_v56  ;;  %vm1760_vm3 = vmor %vm1758_vm2, %vm1759_vm1 }
 0x6fc   :  { %v1768_v16 = vmul.f32 %v1746_v14, %v1726_v23  ;;  %v1755_v24 = vsub.f32 1.0, %v1754_v1 }
 0x6fe   :  { %v1756_v53 = vmul.f32 %v3347_v47, %v1755_v24  ;;  %v1769_v0 = vadd.f32 %v1768_v16, %v1405_v4 }
 0x700   :  { %v1757_v57 = vadd.f32 %v3347_v47, %v1756_v53  ;;  %3348 = vtanh.f32 %v1769_v0 }
 0x702   :  { %v1761_v28 = vsel %vm1760_vm3, %v3347_v47, %v1757_v57 }
 0x703   :  { %v1766_v45 = vsel %vm1763_vm4, %v1765_v31, %v1761_v28 }
 0x704   :  { %v1771_v8 = vsub.f32 1.0, %v1766_v45  ;;  %v1773_v15 = vmul.f32 %v1766_v45, %v4162_v60  ;;  %v1407_v60 = vpop.f32.mrf.mxu2 }
 0x705   :  { %v1408_v31 = vadd.f32 %v4125_v54, %v1407_v60 }
 0x706   :  { %v3349_v34 = vpop.eup %3348 }
 0x707   :  { %v1772_v10 = vmul.f32 %v3349_v34, %v1771_v8 }
 0x709   :  { %v4201_v3 = vadd.f32 %v1773_v15, %v1772_v10 }
 0x70b   :  { %1775 = vst.msk [vmem:[#allocation2 + $0x10] sm:$0xff] %vm348_vm9, %v4201_v3  ;;  %3105 = vmatmul.msk.f32.vlgmr.msrb.gmra.mxu1 %vm348_vm9, %v4201_v3  ;;  %3106 = vmatmul.msk.f32.vlgmr.msrb.gmra.mxu2 %vm348_vm9, %v4201_v3 }
 0x70c   :  { %3107 = vmatmul.msk.f32.vlgmr.msra.gmra.mxu3 %vm348_vm9, %v4201_v3  ;;  %2053 = vmatpush.msrb.mxu1 %v3966_v26  ;;  %v4225_v39 = vpop.f32.mrf.mxu2 }
 0x70d   :  { %2124 = vmatpush.msrb.mxu2 %v3927_v33  ;;  %2144 = vmatpush.msra.mxu3 %v3973_v17  ;;  %v1358_v33 = vpop.f32.mrf.mxu1 }
 0x70e   :  { %2054 = vmatpush.msrb.mxu1 %v3992_v19  ;;  %v1359_v63 = vadd.f32 %v4110_v51, %v1358_v33 }
 0x70f   :  { %2125 = vmatpush.msrb.mxu2 %v3931_v59  ;;  %2145 = vmatpush.msra.mxu3 %v3989_v44 }
 0x710   :  { %2055 = vmatpush.msrb.mxu1 %v4001_v20 }
 0x711   :  { %2126 = vmatpush.msrb.mxu2 %v3934_v18  ;;  %2146 = vmatpush.msra.mxu3 %v3998_v30 }
 0x712   :  { %2056 = vmatpush.msrb.mxu1 %v4008_v22 }
 0x713   :  { %2127 = vmatpush.msrb.mxu2 %v3938_v36  ;;  %2147 = vmatpush.msra.mxu3 %v4025_v25 }
 0x714   :  { %v4229_v40 = vpop.f32.mrf.mxu2 }
 0x715   :  { %v4223_v38 = vpop.f32.mrf.mxu1 }
 0x71c   :  { %v4233_v18 = vpop.f32.mrf.mxu2 }
 0x71d   :  { %v4227_v59 = vpop.f32.mrf.mxu1 }
 0x724   :  { %v4237_v46 = vpop.f32.mrf.mxu2 }
 0x725   :  { %v4231_v41 = vpop.f32.mrf.mxu1 }
 0x72d   :  { %v4235_v42 = vpop.f32.mrf.mxu1 }
 0x788   :  { %v1796_v36 = vpop.f32.mrf.mxu1 }
 0x789   :  { %v1797_v52 = vadd.f32 %v4105_v27, %v1796_v36 }
 0x78b   :  { %v1839_v55 = vadd.f32 %v1797_v52, %v1310_v49 }
 0x78d   :  { %v3108_v43 = vmul.f32 -1.442695, %v1839_v55 }
 0x78e   :  { %v1816_v62 = vpop.f32.mrf.mxu2 }
 0x78f   :  { %3350 = vpow2.f32 %v3108_v43  ;;  %v1817_v2 = vadd.f32 %v4113_v5, %v1816_v62  ;;  %v1836_v16 = vpop.f32.mrf.mxu3 }
 0x790   :  { %v1837_v0 = vadd.f32 %v4121_v37, %v1836_v16 }
 0x791   :  { %v1859_v6 = vadd.f32 %v1817_v2, %v1359_v63  ;;  %v3438_v2 = vld [vmem:[%s3915_s7 + $0x18] sm:$0xff] }
 0x793   :  { %v3109_v7 = vmul.f32 -1.442695, %v1859_v6  ;;  %v3440_v6 = vld [vmem:[%s3915_s7 + $0x8] sm:$0xff] }
 0x795   :  { %v3351_v9 = vpop.eup %3350  ;;  %3352 = vpow2.f32 %v3109_v7  ;;  %v3441_v7 = vld [vmem:[%s3915_s7] sm:$0xff] }
 0x796   :  { %v1843_v29 = vadd.f32 1.0, %v3351_v9 }
 0x798   :  { %3354 = vrcp.f32 %v1843_v29  ;;  %v1855_v56 = vand.u32 2147483648, %v1843_v29  ;;  %v1853_v14 = vand.u32 2147483647, %v1843_v29  ;;  %vm1849_vm6 = vweird.f32 %v1843_v29 }
 0x79a   :  { %v1856_v53 = vor.u32 1.1754944e-38, %v1855_v56  ;;  %vm1854_vm8 = vcmp.eq.f32.partialorder %v1853_v14, 8.507059e+37 }
 0x79b   :  { %v3353_v47 = vpop.eup %3352 }
 0x79c   :  { %v1863_v11 = vadd.f32 1.0, %v3353_v47 }
 0x79e   :  { %v3355_v12 = vpop.eup %3354  ;;  %3356 = vrcp.f32 %v1863_v11  ;;  %v1875_v8 = vand.u32 2147483648, %v1863_v11  ;;  %v1873_v10 = vand.u32 2147483647, %v1863_v11  ;;  %vm1869_vm11 = vweird.f32 %v1863_v11 }
 0x79f   :  { %v1845_v21 = vmul.f32 %v3355_v12, %v1843_v29  ;;  %vm1850_vm5 = vweird.f32 %v3355_v12 }
 0x7a0   :  { %vm1851_vm7 = vmor %vm1849_vm6, %vm1850_vm5  ;;  %v1876_v36 = vor.u32 1.1754944e-38, %v1875_v8  ;;  %vm1874_vm13 = vcmp.eq.f32.partialorder %v1873_v10, 8.507059e+37  ;;  %v1411_v8 = vadd.f32 %v4125_v54, %v4225_v39 }
 0x7a1   :  { %v1846_v23 = vsub.f32 1.0, %v1845_v21 }
 0x7a3   :  { %v1847_v1 = vmul.f32 %v3355_v12, %v1846_v23 }
 0x7a4   :  { %v3357_v4 = vpop.eup %3356 }
 0x7a5   :  { %v1865_v24 = vmul.f32 %v3357_v4, %v1863_v11  ;;  %v1848_v13 = vadd.f32 %v3355_v12, %v1847_v1  ;;  %vm1870_vm10 = vweird.f32 %v3357_v4 }
 0x7a6   :  { %vm1871_vm12 = vmor %vm1869_vm11, %vm1870_vm10 }
 0x7a7   :  { %v1866_v48 = vsub.f32 1.0, %v1865_v24  ;;  %v1852_v57 = vsel %vm1851_vm7, %v3355_v12, %v1848_v13 }
 0x7a8   :  { %v1857_v28 = vsel %vm1854_vm8, %v1856_v53, %v1852_v57 }
 0x7a9   :  { %v1867_v45 = vmul.f32 %v3357_v4, %v1866_v48  ;;  %v1879_v34 = vmul.f32 %v1857_v28, %v1837_v0 }
 0x7ab   :  { %v1868_v15 = vadd.f32 %v3357_v4, %v1867_v45  ;;  %v1880_v33 = vadd.f32 %v1879_v34, %v1408_v31 }
 0x7ad   :  { %v1872_v49 = vsel %vm1871_vm12, %v3357_v4, %v1868_v15  ;;  %3358 = vtanh.f32 %v1880_v33 }
 0x7ae   :  { %v1877_v52 = vsel %vm1874_vm13, %v1876_v36, %v1872_v49 }
 0x7af   :  { %v1882_v55 = vsub.f32 1.0, %v1877_v52  ;;  %v1884_v62 = vmul.f32 %v1877_v52, %v4201_v3  ;;  %v3439_v3 = vld [vmem:[%s3915_s7 + $0x10] sm:$0xff]  ;;  %s3478_s7 = smov 26  }
 0x7b0   :  { %s4311_s13 = sld [smem:[%s4532_s0 + %s3478_s7]]  }
 0x7b3   :  { %v3359_v43 = vpop.eup %3358 }
 0x7b4   :  { %v1883_v60 = vmul.f32 %v3359_v43, %v1882_v55 }
 0x7b6   :  { %v4247_v63 = vadd.f32 %v1884_v62, %v1883_v60 }
 0x7b8   :  { %1886 = vst.msk [vmem:[#allocation2 + $0x18] sm:$0xff] %vm348_vm9, %v4247_v63  ;;  %3110 = vmatmul.msk.f32.vlgmr.msra.gmra.mxu0 %vm348_vm9, %v4247_v63  ;;  %3111 = vmatmul.msk.f32.vlgmr.msra.gmra.mxu1 %vm348_vm9, %v4247_v63 }
 0x7b9   :  { %3112 = vmatmul.msk.f32.vlgmr.msra.gmra.mxu2 %vm348_vm9, %v4247_v63  ;;  %2164 = vmatpush.msra.mxu0 %v3966_v26 }
 0x7ba   :  { %2235 = vmatpush.msra.mxu1 %v3438_v2  ;;  %2255 = vmatpush.msra.mxu2 %v3973_v17  ;;  %v3442_v2 = vld [vmem:[%s3956_s20 + $0x18] sm:$0xff] }
 0x7bb   :  { %2165 = vmatpush.msra.mxu0 %v3992_v19  ;;  %v1313_v19 = vadd.f32 %v4102_v58, %v4186_v32 }
 0x7bc   :  { %2236 = vmatpush.msra.mxu1 %v3439_v3  ;;  %2256 = vmatpush.msra.mxu2 %v3989_v44  ;;  %v1362_v44 = vadd.f32 %v4110_v51, %v4223_v38  ;;  %v3443_v3 = vld [vmem:[%s3956_s20 + $0x10] sm:$0xff] }
 0x7bd   :  { %2166 = vmatpush.msra.mxu0 %v4001_v20 }
 0x7be   :  { %2237 = vmatpush.msra.mxu1 %v3440_v6  ;;  %2257 = vmatpush.msra.mxu2 %v3998_v30  ;;  %v3444_v6 = vld [vmem:[%s3956_s20 + $0x8] sm:$0xff] }
 0x7bf   :  { %2167 = vmatpush.msra.mxu0 %v4008_v22 }
 0x7c0   :  { %2238 = vmatpush.msra.mxu1 %v3441_v7  ;;  %2258 = vmatpush.msra.mxu2 %v4025_v25 }
 0x835   :  { %v1907_v26 = vpop.f32.mrf.mxu0  ;;  %v1927_v17 = vpop.f32.mrf.mxu1 }
 0x836   :  { %v1908_v20 = vadd.f32 %v4105_v27, %v1907_v26  ;;  %v1928_v9 = vadd.f32 %v4113_v5, %v1927_v17  ;;  %v1365_v26 = vadd.f32 %v4110_v51, %v4227_v59 }
 0x838   :  { %v1950_v29 = vadd.f32 %v1908_v20, %v1313_v19  ;;  %v1970_v30 = vadd.f32 %v1928_v9, %v1362_v44  ;;  %v1316_v9 = vadd.f32 %v4102_v58, %v4190_v35  ;;  %v2341_v58 = vld [vmem:[%s2995_s16 + $0x10] sm:$0xff]  ;;  %v2340_v35 = vld [vmem:[%s2995_s16 + $0x8] sm:$0xff] }
 0x83a   :  { %v3113_v47 = vmul.f32 -1.442695, %v1950_v29  ;;  %v3114_v22 = vmul.f32 -1.442695, %v1970_v30 }
 0x83c   :  { %3360 = vpow2.f32 %v3113_v47  ;;  %v1947_v53 = vpop.f32.mrf.mxu2 }
 0x83d   :  { %3362 = vpow2.f32 %v3114_v22  ;;  %v1948_v57 = vadd.f32 %v4121_v37, %v1947_v53 }
 0x842   :  { %v3361_v11 = vpop.eup %3360 }
 0x843   :  { %v3363_v25 = vpop.eup %3362  ;;  %v1954_v12 = vadd.f32 1.0, %v3361_v11 }
 0x844   :  { %v1974_v21 = vadd.f32 1.0, %v3363_v25  ;;  %v2342_v25 = vld [vmem:[%s2995_s16 + $0x18] sm:$0xff] }
 0x845   :  { %3364 = vrcp.f32 %v1954_v12  ;;  %v1966_v4 = vand.u32 2147483648, %v1954_v12  ;;  %v1964_v24 = vand.u32 2147483647, %v1954_v12  ;;  %vm1960_vm15 = vweird.f32 %v1954_v12 }
 0x846   :  { %3366 = vrcp.f32 %v1974_v21  ;;  %v1986_v34 = vand.u32 2147483648, %v1974_v21  ;;  %vm1980_vm4 = vweird.f32 %v1974_v21  ;;  %v1984_v15 = vand.u32 2147483647, %v1974_v21 }
 0x847   :  { %v1967_v0 = vor.u32 1.1754944e-38, %v1966_v4  ;;  %vm1965_vm2 = vcmp.eq.f32.partialorder %v1964_v24, 8.507059e+37 }
 0x848   :  { %v1987_v49 = vor.u32 1.1754944e-38, %v1986_v34  ;;  %vm1985_vm6 = vcmp.eq.f32.partialorder %v1984_v15, 8.507059e+37 }
 0x84b   :  { %v3365_v32 = vpop.eup %3364 }
 0x84c   :  { %v3367_v23 = vpop.eup %3366  ;;  %v1956_v56 = vmul.f32 %v3365_v32, %v1954_v12  ;;  %vm1961_vm14 = vweird.f32 %v3365_v32  ;;  %v2339_v12 = vld [vmem:[%s2995_s16] sm:$0xff] }
 0x84d   :  { %v1976_v38 = vmul.f32 %v3367_v23, %v1974_v21  ;;  %vm1962_vm1 = vmor %vm1960_vm15, %vm1961_vm14  ;;  %vm1981_vm3 = vweird.f32 %v3367_v23 }
 0x84e   :  { %v1957_v1 = vsub.f32 1.0, %v1956_v56  ;;  %vm1982_vm5 = vmor %vm1980_vm4, %vm1981_vm3 }
 0x84f   :  { %v1977_v14 = vsub.f32 1.0, %v1976_v38 }
 0x850   :  { %v1958_v16 = vmul.f32 %v3365_v32, %v1957_v1 }
 0x851   :  { %v1978_v13 = vmul.f32 %v3367_v23, %v1977_v14 }
 0x852   :  { %v1959_v48 = vadd.f32 %v3365_v32, %v1958_v16 }
 0x853   :  { %v1979_v45 = vadd.f32 %v3367_v23, %v1978_v13 }
 0x854   :  { %v1963_v31 = vsel %vm1962_vm1, %v3365_v32, %v1959_v48 }
 0x855   :  { %v1968_v28 = vsel %vm1965_vm2, %v1967_v0, %v1963_v31  ;;  %v1983_v36 = vsel %vm1982_vm5, %v3367_v23, %v1979_v45  ;;  %v1414_v31 = vadd.f32 %v4125_v54, %v4229_v40  ;;  %v2331_v54 = vld [vmem:[#allocation2] sm:$0xff]  ;;  %v2332_v40 = vld [vmem:[#allocation2 + $0x8] sm:$0xff] }
 0x856   :  { %v1990_v10 = vmul.f32 %v1968_v28, %v1948_v57  ;;  %v1988_v52 = vsel %vm1985_vm6, %v1987_v49, %v1983_v36 }
 0x857   :  { %v1993_v55 = vsub.f32 1.0, %v1988_v52  ;;  %v1995_v39 = vmul.f32 %v1988_v52, %v4247_v63  ;;  %v3445_v63 = vld [vmem:[%s3956_s20] sm:$0xff]  ;;  %s3003_s20 = sld [smem:[%s4532_s0 + %s3485_s11]]  }
 0x858   :  { %v1991_v33 = vadd.f32 %v1990_v10, %v1411_v8 }
 0x85a   :  { %3368 = vtanh.f32 %v1991_v33 }
 0x860   :  { %v3369_v43 = vpop.eup %3368 }
 0x861   :  { %v1994_v60 = vmul.f32 %v3369_v43, %v1993_v55  ;;  %v2333_v43 = vld [vmem:[#allocation2 + $0x10] sm:$0xff] }
 0x863   :  { %v4279_v62 = vadd.f32 %v1995_v39, %v1994_v60  ;;  %v2334_v60 = vld [vmem:[#allocation2 + $0x18] sm:$0xff] }
 0x865   :  { %1997 = vst.msk [vmem:[#allocation2 + $0x20] sm:$0xff] %vm348_vm9, %v4279_v62  ;;  %3115 = vmatmul.msk.f32.vlgmr.msrb.gmra.mxu3 %vm348_vm9, %v4279_v62  ;;  %3116 = vmatmul.msk.f32.vlgmr.msrb.gmra.mxu0 %vm348_vm9, %v4279_v62 }
 0x866   :  { %3117 = vmatmul.msk.f32.vlgmr.msrb.gmra.mxu1 %vm348_vm9, %v4279_v62  ;;  %2275 = vmatpush.msrb.mxu3 %v3442_v2  ;;  %v2435_v2 = vld [vmem:[%s4330_s28 + $0x78] sm:$0xff] }
 0x867   :  { %2383 = vmatpush.msrb.mxu0 %v2342_v25  ;;  %2440 = vmatpush.msrb.mxu1 %v2435_v2  ;;  %v2428_v25 = vld [vmem:[%s4330_s28 + $0x40] sm:$0xff] }
 0x868   :  { %2276 = vmatpush.msrb.mxu3 %v3443_v3  ;;  %v2434_v3 = vld [vmem:[%s4330_s28 + $0x70] sm:$0xff] }
 0x869   :  { %2384 = vmatpush.msrb.mxu0 %v2341_v58  ;;  %2441 = vmatpush.msrb.mxu1 %v2434_v3  ;;  %v2427_v58 = vld [vmem:[%s4330_s28 + $0x38] sm:$0xff] }
 0x86a   :  { %2277 = vmatpush.msrb.mxu3 %v3444_v6  ;;  %v2433_v6 = vld [vmem:[%s4330_s28 + $0x68] sm:$0xff] }
 0x86b   :  { %2385 = vmatpush.msrb.mxu0 %v2340_v35  ;;  %2442 = vmatpush.msrb.mxu1 %v2433_v6  ;;  %v2426_v35 = vld [vmem:[%s4330_s28 + $0x30] sm:$0xff] }
 0x86c   :  { %2278 = vmatpush.msrb.mxu3 %v3445_v63  ;;  %v2335_v39 = vld [vmem:[#allocation2 + $0x20] sm:$0xff] }
 0x86d   :  { %2386 = vmatpush.msrb.mxu0 %v2339_v12  ;;  %v2432_v63 = vld [vmem:[%s4330_s28 + $0x60] sm:$0xff]  ;;  %v2425_v12 = vld [vmem:[%s4330_s28 + $0x28] sm:$0xff] }
 0x86e   :  { %2443 = vmatpush.msrb.mxu1 %v2432_v63 }
 0x8e2   :  { %v2038_v7 = vpop.f32.mrf.mxu0 }
 0x8e3   :  { %v2039_v17 = vadd.f32 %v4113_v5, %v2038_v7  ;;  %v2058_v16 = vpop.f32.mrf.mxu1 }
 0x8e4   :  { %v2059_v53 = vadd.f32 %v4121_v37, %v2058_v16 }
 0x8e5   :  { %v2081_v19 = vadd.f32 %v2039_v17, %v1365_v26  ;;  %v4337_v17 = vld [vmem:[%s3872_s2] ss:$0 sm:$0xff]  ;;  %s3480_s2 = smov 28  }
 0x8e6   :  { %s4384_s3 = sld [smem:[%s4532_s0 + %s3480_s2]]  }
 0x8e7   :  { %v3119_v44 = vmul.f32 -1.442695, %v2081_v19  ;;  %v1319_v19 = vadd.f32 %v4337_v17, %v4194_v61 }
 0x8e8   :  { %v2018_v20 = vpop.f32.mrf.mxu3 }
 0x8e9   :  { %3370 = vpow2.f32 %v3119_v44  ;;  %v2019_v29 = vadd.f32 %v4105_v27, %v2018_v20  ;;  %v4342_v44 = vld [vmem:[%s3978_s30] ss:$0 sm:$0xff]  ;;  %s3005_s30 = sld [smem:[%s4532_s0 + %s3487_s27]]  }
 0x8ea   :  { %v1368_v20 = vadd.f32 %v4342_v44, %v4231_v41  ;;  %v2429_v41 = vld [vmem:[%s4330_s28 + $0x48] sm:$0xff] }
 0x8eb   :  { %v2061_v30 = vadd.f32 %v2019_v29, %v1316_v9  ;;  %v4347_v9 = vld [vmem:[%s4021_s12] ss:$0 sm:$0xff]  ;;  %s4509_s12 = sld [smem:[%s4532_s0 + %s3489_s6]]  }
 0x8ed   :  { %v3118_v47 = vmul.f32 -1.442695, %v2061_v30  ;;  %v4351_v30 = vld [vmem:[%s4046_s18] ss:$0 sm:$0xff] }
 0x8ef   :  { %v3371_v22 = vpop.eup %3370  ;;  %3372 = vpow2.f32 %v3118_v47 }
 0x8f0   :  { %v2085_v11 = vadd.f32 1.0, %v3371_v22  ;;  %v2431_v22 = vld [vmem:[%s4330_s28 + $0x58] sm:$0xff] }
 0x8f1   :  { %2444 = vmatpush.msrb.mxu1 %v2431_v22 }
 0x8f2   :  { %3374 = vrcp.f32 %v2085_v11  ;;  %v2097_v28 = vand.u32 2147483648, %v2085_v11  ;;  %vm2091_vm13 = vweird.f32 %v2085_v11  ;;  %v2095_v8 = vand.u32 2147483647, %v2085_v11 }
 0x8f4   :  { %v2098_v15 = vor.u32 1.1754944e-38, %v2097_v28  ;;  %vm2096_vm15 = vcmp.eq.f32.partialorder %v2095_v8, 8.507059e+37 }
 0x8f5   :  { %v3373_v51 = vpop.eup %3372 }
 0x8f6   :  { %v2065_v5 = vadd.f32 1.0, %v3373_v51  ;;  %v2430_v51 = vld [vmem:[%s4330_s28 + $0x50] sm:$0xff] }
 0x8f7   :  { %2445 = vmatpush.msrb.mxu1 %v2430_v51 }
 0x8f8   :  { %3376 = vrcp.f32 %v2065_v5  ;;  %v3375_v59 = vpop.eup %3374  ;;  %v2077_v38 = vand.u32 2147483648, %v2065_v5  ;;  %v2075_v14 = vand.u32 2147483647, %v2065_v5  ;;  %vm2071_vm8 = vweird.f32 %v2065_v5 }
 0x8f9   :  { %v2087_v27 = vmul.f32 %v3375_v59, %v2085_v11  ;;  %vm2092_vm12 = vweird.f32 %v3375_v59  ;;  %2446 = vmatpush.msrb.mxu1 %v2429_v41 }
 0x8fa   :  { %v2078_v13 = vor.u32 1.1754944e-38, %v2077_v38  ;;  %vm2076_vm11 = vcmp.eq.f32.partialorder %v2075_v14, 8.507059e+37  ;;  %vm2093_vm14 = vmor %vm2091_vm13, %vm2092_vm12  ;;  %v2423_v38 = vld [vmem:[%s4330_s28 + $0x18] sm:$0xff]  ;;  %v2421_v14 = vld [vmem:[%s4330_s28 + $0x8] sm:$0xff] }
 0x8fb   :  { %v2088_v23 = vsub.f32 1.0, %v2087_v27  ;;  %2447 = vmatpush.msrb.mxu1 %v2428_v25 }
 0x8fd   :  { %v2089_v4 = vmul.f32 %v3375_v59, %v2088_v23  ;;  %2448 = vmatpush.msrb.mxu1 %v2427_v58  ;;  %v2424_v23 = vld [vmem:[%s4330_s28 + $0x20] sm:$0xff] }
 0x8fe   :  { %v3377_v21 = vpop.eup %3376 }
 0x8ff   :  { %v2067_v32 = vmul.f32 %v3377_v21, %v2065_v5  ;;  %vm2072_vm7 = vweird.f32 %v3377_v21  ;;  %v2090_v57 = vadd.f32 %v3375_v59, %v2089_v4  ;;  %2449 = vmatpush.msrb.mxu1 %v2426_v35  ;;  %v2420_v4 = vld [vmem:[%s4330_s28] sm:$0xff] }
 0x900   :  { %vm2073_vm10 = vmor %vm2071_vm8, %vm2072_vm7 }
 0x901   :  { %v2068_v56 = vsub.f32 1.0, %v2067_v32  ;;  %v2094_v10 = vsel %vm2093_vm14, %v3375_v59, %v2090_v57  ;;  %2450 = vmatpush.msrb.mxu1 %v2425_v12 }
 0x902   :  { %v2099_v33 = vsel %vm2096_vm15, %v2098_v15, %v2094_v10  ;;  %v4367_v15 = vld [vmem:[%s4083_s23] ss:$0 sm:$0xff] }
 0x903   :  { %v2069_v1 = vmul.f32 %v3377_v21, %v2068_v56  ;;  %v2104_v37 = vsub.f32 1.0, %v2099_v33  ;;  %v2106_v52 = vmul.f32 %v2099_v33, %v4279_v62  ;;  %2451 = vmatpush.msrb.mxu1 %v2424_v23 }
 0x905   :  { %v2070_v24 = vadd.f32 %v3377_v21, %v2069_v1  ;;  %v2422_v1 = vld [vmem:[%s4330_s28 + $0x10] sm:$0xff]  ;;  %2452 = vmatpush.msrb.mxu1 %v2423_v38 }
 0x906   :  { %v2495_v38 = vld [vmem:[%s4399_s9 + $0x30] sm:$0xff] }
 0x907   :  { %v2074_v48 = vsel %vm2073_vm10, %v3377_v21, %v2070_v24  ;;  %2453 = vmatpush.msrb.mxu1 %v2422_v1  ;;  %v2494_v1 = vld [vmem:[%s4399_s9 + $0x28] sm:$0xff]  ;;  %vm2501_vm10 = vcmask 523264  }
 0x908   :  { %v2079_v0 = vsel %vm2076_vm11, %v2078_v13, %v2074_v48 }
 0x909   :  { %v2101_v45 = vmul.f32 %v2079_v0, %v2059_v53  ;;  %2454 = vmatpush.msrb.mxu1 %v2421_v14  ;;  %v2493_v14 = vld [vmem:[%s4399_s9 + $0x20] sm:$0xff] }
 0x90b   :  { %v2102_v34 = vadd.f32 %v2101_v45, %v1414_v31  ;;  %2455 = vmatpush.msrb.mxu1 %v2420_v4  ;;  %v2492_v4 = vld [vmem:[%s4399_s9 + $0x18] sm:$0xff] }
 0x90d   :  { %3378 = vtanh.f32 %v2102_v34 }
 0x913   :  { %v3379_v36 = vpop.eup %3378 }
 0x914   :  { %v2105_v49 = vmul.f32 %v3379_v36, %v2104_v37 }
 0x916   :  { %v4306_v55 = vadd.f32 %v2106_v52, %v2105_v49  ;;  %v4371_v52 = vld [vmem:[%s4013_s5] ss:$0 sm:$0xff]  ;;  %s3006_s5 = sld [smem:[%s4532_s0 + %s3488_s1]]  }
 0x918   :  { %2108 = vst.msk [vmem:[#allocation2 + $0x28] sm:$0xff] %vm348_vm9, %v4306_v55  ;;  %3120 = vmatmul.msk.f32.vlgmr.msrb.gmra.mxu2 %vm348_vm9, %v4306_v55  ;;  %3121 = vmatmul.msk.f32.vlgmr.msra.gmra.mxu3 %vm348_vm9, %v4306_v55 }
 0x919   :  { %3122 = vmatmul.msk.f32.vlgmr.msra.gmra.mxu0 %vm348_vm9, %v4306_v55 }
 0x91f   :  { %v2336_v62 = vld [vmem:[#allocation2 + $0x28] sm:$0xff] }
 0x921   :  { %3130 = vmatmul.msk.f32.vlgmr.msrb.gmra.mxu0 %vm348_vm9, %v2331_v54  ;;  %v1417_v54 = vadd.f32 %v4371_v52, %v4233_v18 }
 0x929   :  { %3131 = vmatmul.msk.f32.gmra.mxu0 %vm348_vm9, %v2332_v40 }
 0x931   :  { %3132 = vmatmul.msk.f32.gmra.mxu0 %vm348_vm9, %v2333_v43 }
 0x939   :  { %3133 = vmatmul.msk.f32.gmra.mxu0 %vm348_vm9, %v2334_v60 }
 0x941   :  { %3134 = vmatmul.msk.f32.gmra.mxu0 %vm348_vm9, %v2335_v39 }
 0x949   :  { %3135 = vmatmul.msk.f32.gmra.mxu0 %vm348_vm9, %v2336_v62 }
 0x996   :  { %v2169_v31 = vpop.f32.mrf.mxu0 }
 0x997   :  { %v2170_v33 = vadd.f32 %v4367_v15, %v2169_v31 }
 0x99b   :  { %v2129_v7 = vpop.f32.mrf.mxu2  ;;  %v2149_v26 = vpop.f32.mrf.mxu3 }
 0x99c   :  { %v2130_v29 = vadd.f32 %v4347_v9, %v2129_v7  ;;  %v2150_v47 = vadd.f32 %v4351_v30, %v2149_v26 }
 0x99e   :  { %v2172_v11 = vadd.f32 %v2130_v29, %v1319_v19  ;;  %v2192_v61 = vadd.f32 %v2150_v47, %v1368_v20  ;;  %v2388_v3 = vpop.f32.mrf.mxu0  ;;  %v4377_v20 = vld [vmem:[%s4311_s13] ss:$0 sm:$0xff] }
 0x9a0   :  { %v3123_v5 = vmul.f32 -1.442695, %v2172_v11  ;;  %v3124_v59 = vmul.f32 -1.442695, %v2192_v61 }
 0x9a2   :  { %3380 = vpow2.f32 %v3123_v5  ;;  %v2496_v5 = vld [vmem:[%s4399_s9 + $0x38] sm:$0xff] }
 0x9a3   :  { %3382 = vpow2.f32 %v3124_v59  ;;  %2534 = vmatpush.msrb.mxu2 %v2496_v5 }
 0x9a5   :  { %2535 = vmatpush.msrb.mxu2 %v2495_v38 }
 0x9a6   :  { %v2391_v29 = vpop.f32.mrf.mxu0 }
 0x9a7   :  { %v2392_v61 = vadd.f32 %v4377_v20, %v2391_v29  ;;  %2536 = vmatpush.msrb.mxu2 %v2494_v1 }
 0x9a8   :  { %v3381_v27 = vpop.eup %3380 }
 0x9a9   :  { %v3383_v21 = vpop.eup %3382  ;;  %v2176_v32 = vadd.f32 1.0, %v3381_v27  ;;  %v2413_v51 = vmax.f32 %v2392_v61, 0.0  ;;  %2537 = vmatpush.msrb.mxu2 %v2493_v14 }
 0x9aa   :  { %v2196_v56 = vadd.f32 1.0, %v3383_v21 }
 0x9ab   :  { %3384 = vrcp.f32 %v2176_v32  ;;  %v2188_v0 = vand.u32 2147483648, %v2176_v32  ;;  %v2186_v45 = vand.u32 2147483647, %v2176_v32  ;;  %vm2182_vm2 = vweird.f32 %v2176_v32  ;;  %2538 = vmatpush.msrb.mxu2 %v2492_v4 }
 0x9ac   :  { %3386 = vrcp.f32 %v2196_v56  ;;  %v2208_v43 = vand.u32 2147483648, %v2196_v56  ;;  %vm2202_vm6 = vweird.f32 %v2196_v56  ;;  %v2206_v60 = vand.u32 2147483647, %v2196_v56 }
 0x9ad   :  { %v2189_v10 = vor.u32 1.1754944e-38, %v2188_v0  ;;  %vm2187_vm4 = vcmp.eq.f32.partialorder %v2186_v45, 8.507059e+37 }
 0x9ae   :  { %v2209_v2 = vor.u32 1.1754944e-38, %v2208_v43  ;;  %vm2207_vm8 = vcmp.eq.f32.partialorder %v2206_v60, 8.507059e+37  ;;  %v2394_v11 = vpop.f32.mrf.mxu0 }
 0x9af   :  { %v2395_v59 = vadd.f32 %v4377_v20, %v2394_v11 }
 0x9b1   :  { %v3385_v16 = vpop.eup %3384  ;;  %v2414_v25 = vmax.f32 %v2395_v59, 0.0  ;;  %v1420_v59 = vadd.f32 %v4371_v52, %v4237_v46 }
 0x9b2   :  { %v3387_v24 = vpop.eup %3386  ;;  %v2178_v13 = vmul.f32 %v3385_v16, %v2176_v32  ;;  %vm2183_vm1 = vweird.f32 %v3385_v16 }
 0x9b3   :  { %v2198_v53 = vmul.f32 %v3387_v24, %v2196_v56  ;;  %vm2184_vm3 = vmor %vm2182_vm2, %vm2183_vm1  ;;  %vm2203_vm5 = vweird.f32 %v3387_v24 }
 0x9b4   :  { %v2179_v48 = vsub.f32 1.0, %v2178_v13  ;;  %vm2204_vm7 = vmor %vm2202_vm6, %vm2203_vm5  ;;  %v2489_v13 = vld [vmem:[%s4399_s9] sm:$0xff]  ;;  %vm2958_vm6 = vcmask 7168  }
 0x9b5   :  { %v2199_v57 = vsub.f32 1.0, %v2198_v53 }
 0x9b6   :  { %v2180_v28 = vmul.f32 %v3385_v16, %v2179_v48  ;;  %v2397_v41 = vpop.f32.mrf.mxu0  ;;  %v1322_v48 = vadd.f32 %v4337_v17, %v4196_v50 }
 0x9b7   :  { %v2200_v8 = vmul.f32 %v3387_v24, %v2199_v57  ;;  %v2398_v58 = vadd.f32 %v4377_v20, %v2397_v41 }
 0x9b8   :  { %v2181_v34 = vadd.f32 %v3385_v16, %v2180_v28  ;;  %v4418_v28 = vld [vmem:[%s4384_s3] ss:$0 sm:$0xff] }
 0x9b9   :  { %v2201_v49 = vadd.f32 %v3387_v24, %v2200_v8  ;;  %v2415_v27 = vmax.f32 %v2398_v58, 0.0  ;;  %v1371_v8 = vadd.f32 %v4342_v44, %v4235_v42 }
 0x9ba   :  { %v2185_v37 = vsel %vm2184_vm3, %v3385_v16, %v2181_v34  ;;  %v2491_v16 = vld [vmem:[%s4399_s9 + $0x10] sm:$0xff] }
 0x9bb   :  { %v2190_v36 = vsel %vm2187_vm4, %v2189_v10, %v2185_v37  ;;  %v2205_v62 = vsel %vm2204_vm7, %v3387_v24, %v2201_v49  ;;  %2539 = vmatpush.msrb.mxu2 %v2491_v16  ;;  %v2490_v24 = vld [vmem:[%s4399_s9 + $0x8] sm:$0xff] }
 0x9bc   :  { %v2212_v40 = vmul.f32 %v2190_v36, %v2170_v33  ;;  %v2210_v6 = vsel %vm2207_vm8, %v2209_v2, %v2205_v62 }
 0x9bd   :  { %v2215_v63 = vsub.f32 1.0, %v2210_v6  ;;  %v2217_v19 = vmul.f32 %v2210_v6, %v4306_v55  ;;  %v2389_v55 = vadd.f32 %v4377_v20, %v2388_v3  ;;  %2540 = vmatpush.msrb.mxu2 %v2490_v24 }
 0x9be   :  { %v2213_v39 = vadd.f32 %v2212_v40, %v1417_v54  ;;  %v2400_v35 = vpop.f32.mrf.mxu0 }
 0x9bf   :  { %v2412_v47 = vmax.f32 %v2389_v55, 0.0  ;;  %v2401_v12 = vadd.f32 %v4377_v20, %v2400_v35  ;;  %2541 = vmatpush.msrb.mxu2 %v2489_v13 }
 0x9c0   :  { %3388 = vtanh.f32 %v2213_v39 }
 0x9c1   :  { %v2416_v21 = vmax.f32 %v2401_v12, 0.0 }
 0x9c6   :  { %v3389_v7 = vpop.eup %3388  ;;  %v2403_v32 = vpop.f32.mrf.mxu0 }
 0x9c7   :  { %v2216_v26 = vmul.f32 %v3389_v7, %v2215_v63  ;;  %v2404_v23 = vadd.f32 %v4377_v20, %v2403_v32 }
 0x9c9   :  { %v4379_v18 = vadd.f32 %v2217_v19, %v2216_v26  ;;  %v2417_v56 = vmax.f32 %v2404_v23, 0.0 }
 0x9cb   :  { %2219 = vst.msk [vmem:[#allocation2 + $0x30] sm:$0xff] %vm348_vm9, %v4379_v18  ;;  %3125 = vmatmul.msk.f32.vlgmr.msra.gmra.mxu1 %vm348_vm9, %v4379_v18  ;;  %3126 = vmatmul.msk.f32.vlgmr.msra.gmra.mxu2 %vm348_vm9, %v4379_v18 }
 0x9cc   :  { %3127 = vmatmul.msk.f32.vlgmr.msrb.gmra.mxu3 %vm348_vm9, %v4379_v18 }
 0x9d2   :  { %v2337_v22 = vld [vmem:[#allocation2 + $0x30] sm:$0xff] }
 0x9d3   :  { %3136 = vmatmul.msk.f32.gmra.mxu0 %vm348_vm9, %v2337_v22  ;;  %2456 = vmatmul.f32.vlgmr.msrb.gmra.mxu1 %v2412_v47 }
 0x9db   :  { %2459 = vmatmul.f32.gmra.mxu1 %v2413_v51 }
 0x9e3   :  { %2462 = vmatmul.f32.gmra.mxu1 %v2414_v25 }
 0x9eb   :  { %2465 = vmatmul.f32.gmra.mxu1 %v2415_v27 }
 0x9f3   :  { %2468 = vmatmul.f32.gmra.mxu1 %v2416_v21 }
 0x9fb   :  { %2471 = vmatmul.f32.gmra.mxu1 %v2417_v56 }
 0xa48   :  { %v2240_v53 = vpop.f32.mrf.mxu1 }
 0xa49   :  { %v2241_v0 = vadd.f32 %v4347_v9, %v2240_v53 }
 0xa4b   :  { %v2283_v57 = vadd.f32 %v2241_v0, %v1322_v48 }
 0xa4d   :  { %v3128_v31 = vmul.f32 -1.442695, %v2283_v57 }
 0xa4e   :  { %v2260_v45 = vpop.f32.mrf.mxu2 }
 0xa4f   :  { %3390 = vpow2.f32 %v3128_v31  ;;  %v2261_v34 = vadd.f32 %v4351_v30, %v2260_v45  ;;  %v2280_v55 = vpop.f32.mrf.mxu3  ;;  %v2577_v45 = vld [vmem:[%s3001_s21 + $0x10] sm:$0xff] }
 0xa50   :  { %v2406_v10 = vpop.f32.mrf.mxu0  ;;  %v2457_v33 = vpop.f32.mrf.mxu1  ;;  %v2281_v51 = vadd.f32 %v4367_v15, %v2280_v55 }
 0xa51   :  { %v2303_v37 = vadd.f32 %v2261_v34, %v1371_v8  ;;  %v2407_v36 = vadd.f32 %v4377_v20, %v2406_v10  ;;  %v2458_v50 = vadd.f32 %v4418_v28, %v2457_v33  ;;  %v2576_v34 = vld [vmem:[%s3001_s21 + $0x8] sm:$0xff]  ;;  %v2575_v33 = vld [vmem:[%s3001_s21] sm:$0xff] }
 0xa53   :  { %v3129_v17 = vmul.f32 -1.442695, %v2303_v37  ;;  %v2418_v9 = vmax.f32 %v2407_v36, 0.0  ;;  %v2481_v42 = vmax.f32 %v2458_v50, 0.0 }
 0xa55   :  { %v3391_v44 = vpop.eup %3390  ;;  %3392 = vpow2.f32 %v3129_v17  ;;  %2474 = vmatmul.f32.gmra.mxu1 %v2418_v9  ;;  %3138 = vmatmul.msk.f32.vlgmr.msrb.gmra.mxu2 %vm2501_vm10, %v2481_v42  ;;  %v3236_v9 = vld [vmem:[%s4428_s15] ss:$0 sm:$0xff] }
 0xa56   :  { %v2287_v30 = vadd.f32 1.0, %v3391_v44 }
 0xa58   :  { %3394 = vrcp.f32 %v2287_v30  ;;  %v2460_v49 = vpop.f32.mrf.mxu1  ;;  %v2299_v63 = vand.u32 2147483648, %v2287_v30  ;;  %v2297_v26 = vand.u32 2147483647, %v2287_v30  ;;  %vm2293_vm12 = vweird.f32 %v2287_v30 }
 0xa59   :  { %v2461_v54 = vadd.f32 %v4418_v28, %v2460_v49 }
 0xa5a   :  { %v2300_v11 = vor.u32 1.1754944e-38, %v2299_v63  ;;  %vm2298_vm14 = vcmp.eq.f32.partialorder %v2297_v26, 8.507059e+37 }
 0xa5b   :  { %v3393_v40 = vpop.eup %3392  ;;  %v2482_v43 = vmax.f32 %v2461_v54, 0.0 }
 0xa5c   :  { %v2307_v60 = vadd.f32 1.0, %v3393_v40 }
 0xa5d   :  { %3139 = vmatmul.msk.f32.gmra.mxu2 %vm2501_vm10, %v2482_v43 }
 0xa5e   :  { %v3395_v39 = vpop.eup %3394  ;;  %3396 = vrcp.f32 %v2307_v60  ;;  %v2319_v41 = vand.u32 2147483648, %v2307_v60  ;;  %v2317_v21 = vand.u32 2147483647, %v2307_v60  ;;  %vm2313_vm1 = vweird.f32 %v2307_v60 }
 0xa5f   :  { %v2289_v62 = vmul.f32 %v3395_v39, %v2287_v30  ;;  %vm2294_vm11 = vweird.f32 %v3395_v39 }
 0xa60   :  { %v2463_v2 = vpop.f32.mrf.mxu1  ;;  %vm2295_vm13 = vmor %vm2293_vm12, %vm2294_vm11  ;;  %v2320_v15 = vor.u32 1.1754944e-38, %v2319_v41  ;;  %vm2318_vm3 = vcmp.eq.f32.partialorder %v2317_v21, 8.507059e+37 }
 0xa61   :  { %v2290_v3 = vsub.f32 1.0, %v2289_v62  ;;  %v2464_v6 = vadd.f32 %v4418_v28, %v2463_v2 }
 0xa63   :  { %v2291_v7 = vmul.f32 %v3395_v39, %v2290_v3  ;;  %v2483_v19 = vmax.f32 %v2464_v6, 0.0 }
 0xa64   :  { %v3397_v29 = vpop.eup %3396 }
 0xa65   :  { %v2309_v47 = vmul.f32 %v3397_v29, %v2307_v60  ;;  %v2292_v22 = vadd.f32 %v3395_v39, %v2291_v7  ;;  %3140 = vmatmul.msk.f32.gmra.mxu2 %vm2501_vm10, %v2483_v19  ;;  %vm2314_vm15 = vweird.f32 %v3397_v29 }
 0xa66   :  { %vm2315_vm2 = vmor %vm2313_vm1, %vm2314_vm15 }
 0xa67   :  { %v2310_v61 = vsub.f32 1.0, %v2309_v47  ;;  %v2296_v5 = vsel %vm2295_vm13, %v3395_v39, %v2292_v22 }
 0xa68   :  { %v2301_v25 = vsel %vm2298_vm14, %v2300_v11, %v2296_v5  ;;  %v2466_v58 = vpop.f32.mrf.mxu1 }
 0xa69   :  { %v2311_v35 = vmul.f32 %v3397_v29, %v2310_v61  ;;  %v2323_v27 = vmul.f32 %v2301_v25, %v2281_v51  ;;  %v2467_v12 = vadd.f32 %v4418_v28, %v2466_v58  ;;  %v2656_v51 = vld [vmem:[%s3003_s20] sm:$0xff] }
 0xa6a   :  { %v3237_v25 = vld [vmem:[%s4455_s8] ss:$0 sm:$0xff] }
 0xa6b   :  { %v2312_v32 = vadd.f32 %v3397_v29, %v2311_v35  ;;  %v2324_v23 = vadd.f32 %v2323_v27, %v1420_v59  ;;  %v2484_v56 = vmax.f32 %v2467_v12, 0.0 }
 0xa6d   :  { %v2316_v38 = vsel %vm2315_vm2, %v3397_v29, %v2312_v32  ;;  %3398 = vtanh.f32 %v2324_v23  ;;  %3141 = vmatmul.msk.f32.gmra.mxu2 %vm2501_vm10, %v2484_v56 }
 0xa6e   :  { %v2321_v46 = vsel %vm2318_vm3, %v2320_v15, %v2316_v38 }
 0xa6f   :  { %v2326_v14 = vsub.f32 1.0, %v2321_v46  ;;  %v2328_v13 = vmul.f32 %v2321_v46, %v4379_v18  ;;  %v2578_v18 = vld [vmem:[%s3001_s21 + $0x18] sm:$0xff] }
 0xa70   :  { %v2469_v52 = vpop.f32.mrf.mxu1  ;;  %3180 = vmatpush.msra.mxu3 %v2578_v18  ;;  %2619 = vmatpush.msra.mxu2 %v2578_v18 }
 0xa71   :  { %v2470_v1 = vadd.f32 %v4418_v28, %v2469_v52 }
 0xa72   :  { %3181 = vmatpush.msra.mxu3 %v2577_v45  ;;  %2620 = vmatpush.msra.mxu2 %v2577_v45 }
 0xa73   :  { %v3399_v4 = vpop.eup %3398  ;;  %v2485_v16 = vmax.f32 %v2470_v1, 0.0 }
 0xa74   :  { %v2327_v24 = vmul.f32 %v3399_v4, %v2326_v14  ;;  %3182 = vmatpush.msra.mxu3 %v2576_v34  ;;  %2621 = vmatpush.msra.mxu2 %v2576_v34 }
 0xa75   :  { %3142 = vmatmul.msk.f32.gmra.mxu2 %vm2501_vm10, %v2485_v16 }
 0xa76   :  { %v2329_v53 = vadd.f32 %v2328_v13, %v2327_v24  ;;  %3183 = vmatpush.msra.mxu3 %v2575_v33  ;;  %2622 = vmatpush.msra.mxu2 %v2575_v33 }
 0xa78   :  { %2330 = vst.msk [vmem:[#allocation2 + $0x38] sm:$0xff] %vm348_vm9, %v2329_v53  ;;  %v2472_v48 = vpop.f32.mrf.mxu1 }
 0xa79   :  { %v2473_v0 = vadd.f32 %v4418_v28, %v2472_v48 }
 0xa7b   :  { %v2486_v57 = vmax.f32 %v2473_v0, 0.0 }
 0xa7d   :  { %3143 = vmatmul.msk.f32.gmra.mxu2 %vm2501_vm10, %v2486_v57  ;;  %v2735_v57 = vld [vmem:[%s3005_s30] sm:$0xff] }
 0xa7e   :  { %2780 = vmatpush.msrb.mxu3 %v2735_v57 }
 0xa7f   :  { %v2338_v31 = vld [vmem:[#allocation2 + $0x38] sm:$0xff] }
 0xa80   :  { %3137 = vmatmul.msk.f32.gmra.mxu0 %vm348_vm9, %v2338_v31  ;;  %v3238_v31 = vld [vmem:[%s4474_s26] ss:$0 sm:$0xff] }
 0xad2   :  { %v2475_v8 = vpop.f32.mrf.mxu1 }
 0xad3   :  { %v2476_v10 = vadd.f32 %v4418_v28, %v2475_v8 }
 0xad5   :  { %v2487_v37 = vmax.f32 %v2476_v10, 0.0 }
 0xad7   :  { %3144 = vmatmul.msk.f32.gmra.mxu2 %vm2501_vm10, %v2487_v37 }
 0xad8   :  { %v2543_v36 = vpop.f32.mrf.mxu2 }
 0xad9   :  { %v2544_v55 = vadd.f32 %v3236_v9, %v2543_v36 }
 0xae0   :  { %v2546_v50 = vpop.f32.mrf.mxu2 }
 0xae1   :  { %v2547_v47 = vadd.f32 %v3236_v9, %v2546_v50 }
 0xae3   :  { %v2568_v22 = vmax.f32 %v2547_v47, 0.0 }
 0xae8   :  { %v2549_v17 = vpop.f32.mrf.mxu2 }
 0xae9   :  { %v2550_v11 = vadd.f32 %v3236_v9, %v2549_v17 }
 0xaeb   :  { %v2569_v61 = vmax.f32 %v2550_v11, 0.0 }
 0xaf0   :  { %v2552_v42 = vpop.f32.mrf.mxu2 }
 0xaf1   :  { %v2553_v44 = vadd.f32 %v3236_v9, %v2552_v42 }
 0xaf3   :  { %v2570_v30 = vmax.f32 %v2553_v44, 0.0 }
 0xaf5   :  { %3149 = vmatmul.msk.f32.vlgmr.msra.gmra.mxu3 %vm348_vm9, %v2570_v30 }
 0xaf8   :  { %v2555_v49 = vpop.f32.mrf.mxu2 }
 0xaf9   :  { %v2556_v54 = vadd.f32 %v3236_v9, %v2555_v49 }
 0xafb   :  { %v2571_v40 = vmax.f32 %v2556_v54, 0.0 }
 0xafd   :  { %v2409_v43 = vpop.f32.mrf.mxu0  ;;  %3150 = vmatmul.msk.f32.gmra.mxu3 %vm348_vm9, %v2571_v40 }
 0xafe   :  { %v2410_v60 = vadd.f32 %v4377_v20, %v2409_v43  ;;  %v2567_v20 = vmax.f32 %v2544_v55, 0.0 }
 0xb00   :  { %v2419_v39 = vmax.f32 %v2410_v60, 0.0  ;;  %v2558_v62 = vpop.f32.mrf.mxu2 }
 0xb01   :  { %v2559_v2 = vadd.f32 %v3236_v9, %v2558_v62 }
 0xb02   :  { %2477 = vmatmul.f32.gmra.mxu1 %v2419_v39 }
 0xb03   :  { %v2572_v3 = vmax.f32 %v2559_v2, 0.0 }
 0xb05   :  { %3151 = vmatmul.msk.f32.gmra.mxu3 %vm348_vm9, %v2572_v3 }
 0xb5a   :  { %v2561_v6 = vpop.f32.mrf.mxu2 }
 0xb5b   :  { %v2562_v63 = vadd.f32 %v3236_v9, %v2561_v6 }
 0xb5d   :  { %v2573_v7 = vmax.f32 %v2562_v63, 0.0  ;;  %v80_v63 = vstv %s3006_s5 }
 0xb5e   :  { %81 = vst [vmem:[#allocation3] sm:$0x1] %v80_v63 }
 0xb5f   :  { %3152 = vmatmul.msk.f32.gmra.mxu3 %vm348_vm9, %v2573_v7 }
 0xb78   :  { %v2633_v23 = vpop.f32.mrf.mxu3 }
 0xb79   :  { %v2634_v46 = vadd.f32 %v3237_v25, %v2633_v23 }
 0xb7b   :  { %v2651_v1 = vmax.f32 %v2634_v46, 0.0 }
 0xb7f   :  { %v2478_v26 = vpop.f32.mrf.mxu1 }
 0xb80   :  { %v2479_v19 = vadd.f32 %v4418_v28, %v2478_v26  ;;  %v2657_v28 = vld [vmem:[%s3003_s20 + $0x8] sm:$0xff]  ;;  %v2636_v52 = vpop.f32.mrf.mxu3 }
 0xb81   :  { %2700 = vmatpush.msra.mxu0 %v2657_v28  ;;  %v2637_v14 = vadd.f32 %v3237_v25, %v2636_v52 }
 0xb82   :  { %v2488_v29 = vmax.f32 %v2479_v19, 0.0 }
 0xb83   :  { %2701 = vmatpush.msra.mxu0 %v2656_v51  ;;  %v2652_v4 = vmax.f32 %v2637_v14, 0.0 }
 0xb84   :  { %3145 = vmatmul.msk.f32.gmra.mxu2 %vm2501_vm10, %v2488_v29  ;;  %v4501_v29 = vld [vmem:[#allocation3] ss:$0 sm:$0xff] }
 0xb88   :  { %v2639_v16 = vpop.f32.mrf.mxu3 }
 0xb89   :  { %v2640_v24 = vadd.f32 %v3237_v25, %v2639_v16 }
 0xb8b   :  { %v2653_v13 = vmax.f32 %v2640_v24, 0.0 }
 0xb8c   :  { %3146 = vmatmul.msk.f32.vlgmr.msra.gmra.mxu2 %vm348_vm9, %v2567_v20 }
 0xb94   :  { %3147 = vmatmul.msk.f32.gmra.mxu2 %vm348_vm9, %v2568_v22 }
 0xb9c   :  { %3148 = vmatmul.msk.f32.gmra.mxu2 %vm348_vm9, %v2569_v61 }
 0xbe2   :  { %v2642_v53 = vpop.f32.mrf.mxu3 }
 0xbe3   :  { %v2643_v48 = vadd.f32 %v3237_v25, %v2642_v53 }
 0xbe5   :  { %v2654_v0 = vmax.f32 %v2643_v48, 0.0 }
 0xc07   :  { %v2564_v5 = vpop.f32.mrf.mxu2 }
 0xc08   :  { %v2565_v59 = vadd.f32 %v3236_v9, %v2564_v5 }
 0xc0a   :  { %v2574_v41 = vmax.f32 %v2565_v59, 0.0 }
 0xc0c   :  { %3153 = vmatmul.msk.f32.gmra.mxu3 %vm348_vm9, %v2574_v41  ;;  %vm2740_vm9 = vcmask 64512  }
 0xc0f   :  { %v2624_v58 = vpop.f32.mrf.mxu2 }
 0xc10   :  { %v2625_v35 = vadd.f32 %v3237_v25, %v2624_v58 }
 0xc12   :  { %v2648_v27 = vmax.f32 %v2625_v35, 0.0 }
 0xc14   :  { %3154 = vmatmul.msk.f32.vlgmr.msra.gmra.mxu0 %vm170_vm0, %v2648_v27 }
 0xc17   :  { %v2627_v12 = vpop.f32.mrf.mxu2 }
 0xc18   :  { %v2628_v21 = vadd.f32 %v3237_v25, %v2627_v12 }
 0xc1a   :  { %v2649_v32 = vmax.f32 %v2628_v21, 0.0 }
 0xc1c   :  { %3155 = vmatmul.msk.f32.gmra.mxu0 %vm170_vm0, %v2649_v32 }
 0xc1f   :  { %v2630_v56 = vpop.f32.mrf.mxu2 }
 0xc20   :  { %v2631_v15 = vadd.f32 %v3237_v25, %v2630_v56 }
 0xc22   :  { %v2650_v38 = vmax.f32 %v2631_v15, 0.0 }
 0xc24   :  { %3156 = vmatmul.msk.f32.gmra.mxu0 %vm170_vm0, %v2650_v38 }
 0xc2c   :  { %3157 = vmatmul.msk.f32.gmra.mxu0 %vm170_vm0, %v2651_v1 }
 0xc34   :  { %3158 = vmatmul.msk.f32.gmra.mxu0 %vm170_vm0, %v2652_v4 }
 0xc3c   :  { %3159 = vmatmul.msk.f32.gmra.mxu0 %vm170_vm0, %v2653_v13 }
 0xc44   :  { %3160 = vmatmul.msk.f32.gmra.mxu0 %vm170_vm0, %v2654_v0 }
 0xc8f   :  { %v2645_v18 = vpop.f32.mrf.mxu3 }
 0xc90   :  { %v2646_v45 = vadd.f32 %v3237_v25, %v2645_v18 }
 0xc91   :  { %v2703_v8 = vpop.f32.mrf.mxu0 }
 0xc92   :  { %v2655_v34 = vmax.f32 %v2646_v45, 0.0  ;;  %v2704_v10 = vadd.f32 %v3238_v31, %v2703_v8 }
 0xc94   :  { %v2727_v33 = vmax.f32 %v2704_v10, 0.0  ;;  %3161 = vmatmul.msk.f32.gmra.mxu0 %vm170_vm0, %v2655_v34 }
 0xc96   :  { %3162 = vmatmul.msk.f32.vlgmr.msrb.gmra.mxu3 %vm2740_vm9, %v2727_v33 }
 0xc99   :  { %v2706_v37 = vpop.f32.mrf.mxu0 }
 0xc9a   :  { %v2707_v36 = vadd.f32 %v3238_v31, %v2706_v37 }
 0xc9c   :  { %v2728_v50 = vmax.f32 %v2707_v36, 0.0 }
 0xc9e   :  { %3163 = vmatmul.msk.f32.gmra.mxu3 %vm2740_vm9, %v2728_v50 }
 0xca1   :  { %v2709_v17 = vpop.f32.mrf.mxu0 }
 0xca2   :  { %v2710_v9 = vadd.f32 %v3238_v31, %v2709_v17 }
 0xca4   :  { %v2729_v42 = vmax.f32 %v2710_v9, 0.0 }
 0xca6   :  { %3164 = vmatmul.msk.f32.gmra.mxu3 %vm2740_vm9, %v2729_v42 }
 0xca9   :  { %v2712_v44 = vpop.f32.mrf.mxu0 }
 0xcaa   :  { %v2713_v30 = vadd.f32 %v3238_v31, %v2712_v44 }
 0xcac   :  { %v2730_v49 = vmax.f32 %v2713_v30, 0.0 }
 0xcae   :  { %3165 = vmatmul.msk.f32.gmra.mxu3 %vm2740_vm9, %v2730_v49 }
 0xcb1   :  { %v2715_v54 = vpop.f32.mrf.mxu0 }
 0xcb2   :  { %v2716_v40 = vadd.f32 %v3238_v31, %v2715_v54 }
 0xcb4   :  { %v2731_v43 = vmax.f32 %v2716_v40, 0.0 }
 0xcb6   :  { %3166 = vmatmul.msk.f32.gmra.mxu3 %vm2740_vm9, %v2731_v43 }
 0xcb9   :  { %v2718_v60 = vpop.f32.mrf.mxu0 }
 0xcba   :  { %v2719_v39 = vadd.f32 %v3238_v31, %v2718_v60 }
 0xcbc   :  { %v2732_v62 = vmax.f32 %v2719_v39, 0.0 }
 0xcbe   :  { %3167 = vmatmul.msk.f32.gmra.mxu3 %vm2740_vm9, %v2732_v62 }
 0xcc1   :  { %v2721_v2 = vpop.f32.mrf.mxu0 }
 0xcc2   :  { %v2722_v3 = vadd.f32 %v3238_v31, %v2721_v2 }
 0xcc4   :  { %v2733_v6 = vmax.f32 %v2722_v3, 0.0 }
 0xcc6   :  { %3168 = vmatmul.msk.f32.gmra.mxu3 %vm2740_vm9, %v2733_v6 }
 0xd11   :  { %v2724_v7 = vpop.f32.mrf.mxu0 }
 0xd12   :  { %v2725_v26 = vadd.f32 %v3238_v31, %v2724_v7 }
 0xd14   :  { %v2734_v19 = vmax.f32 %v2725_v26, 0.0 }
 0xd16   :  { %3169 = vmatmul.msk.f32.gmra.mxu3 %vm2740_vm9, %v2734_v19 }
 0xd19   :  { %v2782_v55 = vpop.f32.mrf.mxu3 }
 0xd1a   :  { %v2783_v20 = vadd.f32 %v4501_v29, %v2782_v55 }
 0xd1c   :  { %v3170_v47 = vmul.f32 -1.442695, %v2783_v20 }
 0xd1e   :  { %3400 = vpow2.f32 %v3170_v47 }
 0xd21   :  { %v2785_v22 = vpop.f32.mrf.mxu3 }
 0xd22   :  { %v2786_v11 = vadd.f32 %v4501_v29, %v2785_v22 }
 0xd24   :  { %v3401_v61 = vpop.eup %3400  ;;  %v3171_v28 = vmul.f32 -1.442695, %v2786_v11 }
 0xd25   :  { %v2830_v51 = vadd.f32 1.0, %v3401_v61 }
 0xd26   :  { %3402 = vpow2.f32 %v3171_v28 }
 0xd27   :  { %3404 = vrcp.f32 %v2830_v51  ;;  %v2849_v21 = vand.u32 2147483648, %v2830_v51  ;;  %v2847_v56 = vand.u32 2147483647, %v2830_v51  ;;  %vm2843_vm4 = vweird.f32 %v2830_v51 }
 0xd29   :  { %v2788_v5 = vpop.f32.mrf.mxu3  ;;  %v2850_v14 = vor.u32 1.1754944e-38, %v2849_v21  ;;  %vm2848_vm7 = vcmp.eq.f32.partialorder %v2847_v56, 8.507059e+37 }
 0xd2a   :  { %v2789_v59 = vadd.f32 %v4501_v29, %v2788_v5 }
 0xd2c   :  { %v3403_v41 = vpop.eup %3402  ;;  %v3172_v25 = vmul.f32 -1.442695, %v2789_v59 }
 0xd2d   :  { %v3405_v58 = vpop.eup %3404  ;;  %v2831_v35 = vadd.f32 1.0, %v3403_v41 }
 0xd2e   :  { %v2839_v27 = vmul.f32 %v3405_v58, %v2830_v51  ;;  %3406 = vpow2.f32 %v3172_v25  ;;  %vm2844_vm0 = vweird.f32 %v3405_v58 }
 0xd2f   :  { %3408 = vrcp.f32 %v2831_v35  ;;  %vm2845_vm5 = vmor %vm2843_vm4, %vm2844_vm0  ;;  %v2864_v48 = vand.u32 2147483648, %v2831_v35  ;;  %v2862_v31 = vand.u32 2147483647, %v2831_v35  ;;  %vm2858_vm10 = vweird.f32 %v2831_v35 }
 0xd30   :  { %v2840_v12 = vsub.f32 1.0, %v2839_v27 }
 0xd31   :  { %v2791_v32 = vpop.f32.mrf.mxu3  ;;  %v2865_v33 = vor.u32 1.1754944e-38, %v2864_v48  ;;  %vm2863_vm12 = vcmp.eq.f32.partialorder %v2862_v31, 8.507059e+37 }
 0xd32   :  { %v2841_v23 = vmul.f32 %v3405_v58, %v2840_v12  ;;  %v2792_v15 = vadd.f32 %v4501_v29, %v2791_v32 }
 0xd34   :  { %v3407_v38 = vpop.eup %3406  ;;  %v2842_v46 = vadd.f32 %v3405_v58, %v2841_v23  ;;  %v3173_v52 = vmul.f32 -1.442695, %v2792_v15 }
 0xd35   :  { %v3409_v1 = vpop.eup %3408  ;;  %v2832_v4 = vadd.f32 1.0, %v3407_v38 }
 0xd36   :  { %v2846_v16 = vsel %vm2845_vm5, %v3405_v58, %v2842_v46  ;;  %v2854_v24 = vmul.f32 %v3409_v1, %v2831_v35  ;;  %3410 = vpow2.f32 %v3173_v52  ;;  %vm2859_vm8 = vweird.f32 %v3409_v1 }
 0xd37   :  { %v2851_v13 = vsel %vm2848_vm7, %v2850_v14, %v2846_v16  ;;  %3412 = vrcp.f32 %v2832_v4  ;;  %vm2860_vm11 = vmor %vm2858_vm10, %vm2859_vm8  ;;  %v2879_v42 = vand.u32 2147483648, %v2832_v4  ;;  %v2877_v49 = vand.u32 2147483647, %v2832_v4 }
 0xd38   :  { %2959 = vst.msk [vmem:[%s4509_s12] sm:$0xff] %vm2958_vm6, %v2851_v13  ;;  %v2855_v53 = vsub.f32 1.0, %v2854_v24  ;;  %vm2873_vm14 = vweird.f32 %v2832_v4 }
 0xd39   :  { %v2794_v0 = vpop.f32.mrf.mxu3  ;;  %v2880_v62 = vor.u32 1.1754944e-38, %v2879_v42  ;;  %vm2878_vm1 = vcmp.eq.f32.partialorder %v2877_v49, 8.507059e+37 }
 0xd3a   :  { %v2856_v57 = vmul.f32 %v3409_v1, %v2855_v53  ;;  %v2795_v18 = vadd.f32 %v4501_v29, %v2794_v0 }
 0xd3c   :  { %v3411_v45 = vpop.eup %3410  ;;  %v2857_v8 = vadd.f32 %v3409_v1, %v2856_v57  ;;  %v3174_v34 = vmul.f32 -1.442695, %v2795_v18 }
 0xd3d   :  { %v3413_v10 = vpop.eup %3412  ;;  %v2833_v37 = vadd.f32 1.0, %v3411_v45 }
 0xd3e   :  { %v2861_v36 = vsel %vm2860_vm11, %v3409_v1, %v2857_v8  ;;  %v2869_v50 = vmul.f32 %v3413_v10, %v2832_v4  ;;  %3414 = vpow2.f32 %v3174_v34  ;;  %vm2874_vm13 = vweird.f32 %v3413_v10 }
 0xd3f   :  { %v2866_v17 = vsel %vm2863_vm12, %v2865_v33, %v2861_v36  ;;  %3416 = vrcp.f32 %v2833_v37  ;;  %vm2875_vm15 = vmor %vm2873_vm14, %vm2874_vm13  ;;  %v2894_v26 = vand.u32 2147483648, %v2833_v37  ;;  %v2892_v20 = vand.u32 2147483647, %v2833_v37 }
 0xd40   :  { %2960 = vst.msk [vmem:[%s4509_s12 + $0x8] sm:$0xff] %vm2958_vm6, %v2866_v17  ;;  %v2870_v9 = vsub.f32 1.0, %v2869_v50  ;;  %vm2888_vm3 = vweird.f32 %v2833_v37 }
 0xd41   :  { %v2797_v44 = vpop.f32.mrf.mxu3  ;;  %v2895_v51 = vor.u32 1.1754944e-38, %v2894_v26  ;;  %vm2893_vm0 = vcmp.eq.f32.partialorder %v2892_v20, 8.507059e+37 }
 0xd42   :  { %v2871_v30 = vmul.f32 %v3413_v10, %v2870_v9  ;;  %v2798_v54 = vadd.f32 %v4501_v29, %v2797_v44 }
 0xd44   :  { %v3415_v40 = vpop.eup %3414  ;;  %v2872_v43 = vadd.f32 %v3413_v10, %v2871_v30  ;;  %v3175_v60 = vmul.f32 -1.442695, %v2798_v54 }
 0xd45   :  { %v3417_v39 = vpop.eup %3416  ;;  %v2834_v2 = vadd.f32 1.0, %v3415_v40 }
 0xd46   :  { %v2876_v3 = vsel %vm2875_vm15, %v3413_v10, %v2872_v43  ;;  %v2884_v6 = vmul.f32 %v3417_v39, %v2833_v37  ;;  %3418 = vpow2.f32 %v3175_v60  ;;  %vm2889_vm2 = vweird.f32 %v3417_v39 }
 0xd47   :  { %v2881_v63 = vsel %vm2878_vm1, %v2880_v62, %v2876_v3  ;;  %3420 = vrcp.f32 %v2834_v2  ;;  %vm2890_vm9 = vmor %vm2888_vm3, %vm2889_vm2  ;;  %v2909_v35 = vand.u32 2147483648, %v2834_v2  ;;  %v2907_v12 = vand.u32 2147483647, %v2834_v2 }
 0xd48   :  { %2961 = vst.msk [vmem:[%s4509_s12 + $0x10] sm:$0xff] %vm2958_vm6, %v2881_v63  ;;  %v2885_v7 = vsub.f32 1.0, %v2884_v6  ;;  %vm2903_vm5 = vweird.f32 %v2834_v2 }
 0xd49   :  { %v2800_v19 = vpop.f32.mrf.mxu3  ;;  %v2910_v56 = vor.u32 1.1754944e-38, %v2909_v35  ;;  %vm2908_vm8 = vcmp.eq.f32.partialorder %v2907_v12, 8.507059e+37 }
 0xd4a   :  { %v2886_v55 = vmul.f32 %v3417_v39, %v2885_v7  ;;  %v2801_v47 = vadd.f32 %v4501_v29, %v2800_v19 }
 0xd4c   :  { %v3419_v22 = vpop.eup %3418  ;;  %v2887_v11 = vadd.f32 %v3417_v39, %v2886_v55  ;;  %v3176_v61 = vmul.f32 -1.442695, %v2801_v47 }
 0xd4d   :  { %v3421_v28 = vpop.eup %3420  ;;  %v2835_v5 = vadd.f32 1.0, %v3419_v22 }
 0xd4e   :  { %v2891_v59 = vsel %vm2890_vm9, %v3417_v39, %v2887_v11  ;;  %v2899_v41 = vmul.f32 %v3421_v28, %v2834_v2  ;;  %3422 = vpow2.f32 %v3176_v61  ;;  %vm2904_vm4 = vweird.f32 %v3421_v28 }
 0xd4f   :  { %v2896_v25 = vsel %vm2893_vm0, %v2895_v51, %v2891_v59  ;;  %3424 = vrcp.f32 %v2835_v5  ;;  %vm2905_vm7 = vmor %vm2903_vm5, %vm2904_vm4  ;;  %v2924_v14 = vand.u32 2147483648, %v2835_v5  ;;  %v2922_v16 = vand.u32 2147483647, %v2835_v5 }
 0xd50   :  { %2962 = vst.msk [vmem:[%s4509_s12 + $0x18] sm:$0xff] %vm2958_vm6, %v2896_v25  ;;  %v2900_v58 = vsub.f32 1.0, %v2899_v41  ;;  %vm2918_vm11 = vweird.f32 %v2835_v5 }
 0xd51   :  { %v2925_v53 = vor.u32 1.1754944e-38, %v2924_v14  ;;  %vm2923_vm13 = vcmp.eq.f32.partialorder %v2922_v16, 8.507059e+37 }
 0xd52   :  { %v2901_v27 = vmul.f32 %v3421_v28, %v2900_v58 }
 0xd54   :  { %v3423_v21 = vpop.eup %3422  ;;  %v2902_v32 = vadd.f32 %v3421_v28, %v2901_v27 }
 0xd55   :  { %v3425_v23 = vpop.eup %3424  ;;  %v2836_v15 = vadd.f32 1.0, %v3423_v21 }
 0xd56   :  { %v2906_v38 = vsel %vm2905_vm7, %v3421_v28, %v2902_v32  ;;  %v2914_v46 = vmul.f32 %v3425_v23, %v2835_v5  ;;  %vm2919_vm10 = vweird.f32 %v3425_v23 }
 0xd57   :  { %v2911_v52 = vsel %vm2908_vm8, %v2910_v56, %v2906_v38  ;;  %3426 = vrcp.f32 %v2836_v15  ;;  %vm2920_vm12 = vmor %vm2918_vm11, %vm2919_vm10  ;;  %v2939_v18 = vand.u32 2147483648, %v2836_v15  ;;  %v2937_v8 = vand.u32 2147483647, %v2836_v15 }
 0xd58   :  { %2963 = vst.msk [vmem:[%s4509_s12 + $0x20] sm:$0xff] %vm2958_vm6, %v2911_v52  ;;  %v2915_v1 = vsub.f32 1.0, %v2914_v46  ;;  %vm2933_vm15 = vweird.f32 %v2836_v15 }
 0xd59   :  { %v2940_v10 = vor.u32 1.1754944e-38, %v2939_v18  ;;  %vm2938_vm2 = vcmp.eq.f32.partialorder %v2937_v8, 8.507059e+37 }
 0xd5a   :  { %v2916_v4 = vmul.f32 %v3425_v23, %v2915_v1 }
 0xd5c   :  { %v2917_v24 = vadd.f32 %v3425_v23, %v2916_v4 }
 0xd5d   :  { %v3427_v13 = vpop.eup %3426 }
 0xd5e   :  { %v2921_v48 = vsel %vm2920_vm12, %v3425_v23, %v2917_v24  ;;  %v2929_v0 = vmul.f32 %v3427_v13, %v2836_v15  ;;  %vm2934_vm14 = vweird.f32 %v3427_v13 }
 0xd5f   :  { %v2926_v57 = vsel %vm2923_vm13, %v2925_v53, %v2921_v48  ;;  %vm2935_vm1 = vmor %vm2933_vm15, %vm2934_vm14 }
 0xd60   :  { %2964 = vst.msk [vmem:[%s4509_s12 + $0x28] sm:$0xff] %vm2958_vm6, %v2926_v57  ;;  %v2930_v31 = vsub.f32 1.0, %v2929_v0 }
 0xd62   :  { %v2931_v45 = vmul.f32 %v3427_v13, %v2930_v31 }
 0xd64   :  { %v2932_v34 = vadd.f32 %v3427_v13, %v2931_v45 }
 0xd66   :  { %v2936_v33 = vsel %vm2935_vm1, %v3427_v13, %v2932_v34 }
 0xd67   :  { %v2941_v37 = vsel %vm2938_vm2, %v2940_v10, %v2936_v33 }
 0xd68   :  { %2965 = vst.msk [vmem:[%s4509_s12 + $0x30] sm:$0xff] %vm2958_vm6, %v2941_v37 }
 0xd99   :  { %v2803_v36 = vpop.f32.mrf.mxu3 }
 0xd9a   :  { %v2804_v50 = vadd.f32 %v4501_v29, %v2803_v36 }
 0xd9c   :  { %v3177_v17 = vmul.f32 -1.442695, %v2804_v50 }
 0xd9e   :  { %3428 = vpow2.f32 %v3177_v17 }
 0xda4   :  { %v3429_v9 = vpop.eup %3428 }
 0xda5   :  { %v2837_v42 = vadd.f32 1.0, %v3429_v9 }
 0xda7   :  { %3430 = vrcp.f32 %v2837_v42  ;;  %v2954_v54 = vand.u32 2147483648, %v2837_v42  ;;  %v2952_v43 = vand.u32 2147483647, %v2837_v42  ;;  %vm2948_vm9 = vweird.f32 %v2837_v42 }
 0xda9   :  { %v2955_v39 = vor.u32 1.1754944e-38, %v2954_v54  ;;  %vm2953_vm4 = vcmp.eq.f32.partialorder %v2952_v43, 8.507059e+37 }
 0xdad   :  { %v3431_v44 = vpop.eup %3430 }
 0xdae   :  { %v2944_v30 = vmul.f32 %v3431_v44, %v2837_v42  ;;  %vm2949_vm3 = vweird.f32 %v3431_v44 }
 0xdaf   :  { %vm2950_vm0 = vmor %vm2948_vm9, %vm2949_vm3 }
 0xdb0   :  { %v2945_v49 = vsub.f32 1.0, %v2944_v30 }
 0xdb2   :  { %v2946_v40 = vmul.f32 %v3431_v44, %v2945_v49 }
 0xdb4   :  { %v2947_v60 = vadd.f32 %v3431_v44, %v2946_v40 }
 0xdb6   :  { %v2951_v62 = vsel %vm2950_vm0, %v3431_v44, %v2947_v60 }
 0xdb7   :  { %v2956_v29 = vsel %vm2953_vm4, %v2955_v39, %v2951_v62 }
 0xdb8   :  { %2966 = vst.msk [vmem:[%s4509_s12 + $0x38] sm:$0xff] %vm2958_vm6, %v2956_v29 }

</bundles_post_ra>
